<compile_context>
chip_gen: v7x
topology: tpu7x:2x2x1
jax: 0.10.0
libtpu: 0.0.40
codegen_flags: <defaults>
</compile_context>

<pallas_src>
import functools

import numpy as np

import jax
import jax.numpy as jnp
from jax.experimental import pallas as pl
from jax.experimental.pallas import tpu as pltpu


# ----------------------------------------------------------------------------
# Pallas kernels
# ----------------------------------------------------------------------------
def _lin_conv1_kernel(a_ref, wext_ref, mbig_ref, b1_ref, y_ref, stats_ref):
    # Fused: Linear(20,1568)+ReLU (block-one-hot matmul that directly emits the
    # 3-row im2row of the zero-padded NHWC activation), then the sub-pixel 3x3
    # conv of ConvTranspose2d(32,16,4,2,1) as ONE banded matmul, + conv bias.
    h3 = jnp.dot(a_ref[...], wext_ref[...],
                 preferred_element_type=jnp.float32)            # (N, 672)
    h3 = jnp.maximum(h3, 0.0)
    acc = jnp.dot(h3.astype(jnp.bfloat16), mbig_ref[...],
                  preferred_element_type=jnp.float32)           # (N, 448)
    acc = acc + b1_ref[...]
    y_ref[...] = acc.astype(y_ref.dtype)
    # Per-tile partial BatchNorm statistics (per-column sum / sum-of-squares;
    # the 448 columns fold to 16 real channels in the XLA glue).  Keeping the
    # partials per tile keeps the batch statistics exact under the parallel
    # batch-tile grid.
    stats_ref[0, 0:1, :] = jnp.sum(acc, axis=0, keepdims=True)
    stats_ref[0, 1:2, :] = jnp.sum(acc * acc, axis=0, keepdims=True)


def _bn_conv2_tanh_kernel(x_ref, sc_ref, sh_ref, m2_ref, b2_ref, o_ref):
    # Fused: BatchNorm affine (exact batch stats from kernel 1) + ReLU, then the
    # sub-pixel 3x3 conv of ConvTranspose2d(16,1,4,2,1) as 3 banded matmuls
    # (dY = -1/0/+1 via sublane shifts + image-boundary masks), + bias, tanh.
    x = x_ref[...].astype(jnp.float32)                          # (N, 224)
    ybn = jnp.maximum(x * sc_ref[...] + sh_ref[...], 0.0)       # BN + ReLU (f32)

    n = ybn.shape[0]
    zrow = jnp.zeros((1, ybn.shape[1]), jnp.float32)
    r = jax.lax.broadcasted_iota(jnp.int32, (n, 1), 0)
    # Row r of `up` holds image row Y-1 (zero at the top edge of each image);
    # row r of `dn` holds image row Y+1 (zero at the bottom edge).
    up = jnp.concatenate([zrow, ybn[:-1, :]], axis=0)
    up = up * (r % 14 != 0).astype(jnp.float32)
    dn = jnp.concatenate([ybn[1:, :], zrow], axis=0)
    dn = dn * (r % 14 != 13).astype(jnp.float32)

    s = jnp.dot(ybn.astype(jnp.bfloat16), m2_ref[1],
                preferred_element_type=jnp.float32)
    s = s + jnp.dot(up.astype(jnp.bfloat16), m2_ref[0],
                    preferred_element_type=jnp.float32)
    s = s + jnp.dot(dn.astype(jnp.bfloat16), m2_ref[2],
                    preferred_element_type=jnp.float32)
    o_ref[...] = jnp.tanh(s + b2_ref[0, 0])                     # (N, 56)


# ----------------------------------------------------------------------------
# pallas_call wrappers / tiling
# ----------------------------------------------------------------------------
_CPARAMS = pltpu.CompilerParams(
    dimension_semantics=("parallel",),           # batch tiles (v7x: 2 TCs)
    vmem_limit_bytes=48 * 1024 * 1024,           # explicit, with headroom
)


def _pick_bt(batch):
    # Batch-tile sizes keep the row counts (BT*7 / BT*14) multiples of 16 so
    # the bf16 blocks stay on native sublane tiling; otherwise one whole-batch
    # tile (full-dim block) is used.
    for cand in (64, 16):
        if batch % cand == 0:
            return cand
    return batch


# ----------------------------------------------------------------------------
# One-time host-side weight re-layout
# ----------------------------------------------------------------------------
# (phase, 3x3 window offset) -> original 4x4 tap index used by that phase
_PHASE_TAP = {(0, 0): 3, (0, 1): 1, (1, 1): 2, (1, 2): 0}


def _convT421_subpixel_matrix(w_pt):
    """ConvTranspose2d(k=4,s=2,p=1) weight (Cin,Cout,4,4) -> (9*Cin, 4*Cout)
    matrix of the equivalent 3x3 SAME conv whose output channels are ordered
    (py, px, cout), i.e. ready for depth-to-space(2)."""
    cin, cout = w_pt.shape[0], w_pt.shape[1]
    wm = np.zeros((9 * cin, 4 * cout), np.float32)
    for py in range(2):
        for px in range(2):
            for dy in range(3):
                ky = _PHASE_TAP.get((py, dy))
                if ky is None:
                    continue
                for dx in range(3):
                    kx = _PHASE_TAP.get((px, dx))
                    if kx is None:
                        continue
                    r = (dy * 3 + dx) * cin
                    c = (py * 2 + px) * cout
                    wm[r:r + cin, c:c + cout] = w_pt[:, :, ky, kx]
    return wm


def prepare_kernel_params(p):
    w_lin = np.asarray(p["w_lin"], np.float32)            # (20,1568), cols (c,y,x)
    b_lin = np.asarray(p["b_lin"], np.float32)
    # Fold the NCHW view(B,32,7,7) -> NHWC permutation into the weight/bias.
    w_nhwc = w_lin.reshape(20, 32, 7, 7).transpose(0, 2, 3, 1)     # (20,7,7,32)
    b_nhwc = b_lin.reshape(32, 7, 7).transpose(1, 2, 0)            # (7,7,32)

    # Fused linear weight: A row (b, y) has z[b] in one-hot block y (cols
    # y*20+k) and a 1 at col 140+y.  Output col j = dy*224 + x*32 + c holds the
    # pre-ReLU linear value at image row y+dy-1 (or 0 for y-padding).
    w_ext = np.zeros((147, 672), np.float32)
    for y in range(7):
        for dy in range(3):
            ys = y + dy - 1
            if 0 <= ys < 7:
                w_ext[y * 20:(y + 1) * 20, dy * 224:(dy + 1) * 224] = \
                    w_nhwc[:, ys].reshape(20, 224)
                w_ext[140 + y, dy * 224:(dy + 1) * 224] = b_nhwc[ys].reshape(224)

    # conv1: banded matrix folding the x-taps (and x-padding) of the sub-pixel
    # 3x3 conv.  Row i = dy*224 + x'*32 + c, col o = x*64 + (py*2+px)*16 + co.
    w1sp = _convT421_subpixel_matrix(np.asarray(p["w_ct1"], np.float32))
    w1sp = w1sp.reshape(3, 3, 32, 64)
    mbig = np.zeros((672, 448), np.float32)
    for dy in range(3):
        for xs in range(7):
            for x in range(7):
                dx = xs - x + 1
                if 0 <= dx < 3:
                    mbig[dy * 224 + xs * 32: dy * 224 + (xs + 1) * 32,
                         x * 64:(x + 1) * 64] = w1sp[dy, dx]
    b1row = np.tile(np.asarray(p["b_ct1"], np.float32), 28)[None, :]   # (1,448)

    # conv2: 3 banded matrices (one per dY).  Row i = X'*16 + co, col = X*4 + q.
    w2sp = _convT421_subpixel_matrix(np.asarray(p["w_ct2"], np.float32))
    w2sp = w2sp.reshape(3, 3, 16, 4)
    m2 = np.zeros((3, 224, 56), np.float32)
    for dY in range(3):
        for Xs in range(14):
            for X in range(14):
                dX = Xs - X + 1
                if 0 <= dX < 3:
                    m2[dY, Xs * 16:(Xs + 1) * 16, X * 4:(X + 1) * 4] = w2sp[dY, dX]

    return {
        "w_ext": jnp.asarray(w_ext, jnp.bfloat16),
        "mbig": jnp.asarray(mbig, jnp.bfloat16),
        "b1row": jnp.asarray(b1row, jnp.float32),
        "m2": jnp.asarray(m2, jnp.bfloat16),
        "b2": jnp.asarray(np.asarray(p["b_ct2"], np.float32)).reshape(1, 1),
        "gamma": jnp.asarray(np.asarray(p["gamma"], np.float32)),
        "beta": jnp.asarray(np.asarray(p["beta"], np.float32)),
    }


# ----------------------------------------------------------------------------
# Full GeneratorNet forward
# ----------------------------------------------------------------------------
def generator_forward(z, kp):
    B = z.shape[0]
    bt = _pick_bt(B)
    n_tiles = B // bt

    # Glue: block-one-hot expansion of the latent (~0.3 KB / image).
    eye7 = jnp.eye(7, dtype=jnp.float32)
    a_main = (z[:, None, None, :] * eye7[None, :, :, None]).reshape(B, 7, 140)
    a_bias = jnp.broadcast_to(eye7[None, :, :], (B, 7, 7))
    a = jnp.concatenate([a_main, a_bias], axis=-1).reshape(B * 7, 147)
    a = a.astype(jnp.bfloat16)

    # Kernel 1: Linear + ReLU + ConvTranspose2d(32,16,4,2,1) (sub-pixel) + bias,
    # plus per-tile BatchNorm partial statistics.
    y1_pre, stats = pl.pallas_call(
        _lin_conv1_kernel,
        out_shape=(jax.ShapeDtypeStruct((B * 7, 448), jnp.bfloat16),
                   jax.ShapeDtypeStruct((n_tiles, 2, 448), jnp.float32)),
        grid=(n_tiles,),
        in_specs=[
            pl.BlockSpec((bt * 7, 147), lambda i: (i, 0)),
            pl.BlockSpec((147, 672), lambda i: (0, 0)),
            pl.BlockSpec((672, 448), lambda i: (0, 0)),
            pl.BlockSpec((1, 448), lambda i: (0, 0)),
        ],
        out_specs=(
            pl.BlockSpec((bt * 7, 448), lambda i: (i, 0)),
            pl.BlockSpec((1, 2, 448), lambda i: (i, 0, 0)),
        ),
        compiler_params=_CPARAMS,
    )(a, kp["w_ext"], kp["mbig"], kp["b1row"])

    # Glue: exact train-mode BatchNorm statistics (tiny reductions).
    tot = jnp.sum(stats, axis=0)                         # (2, 448)
    sum16 = jnp.sum(tot[0].reshape(28, 16), axis=0)
    sq16 = jnp.sum(tot[1].reshape(28, 16), axis=0)
    n = float(B * 196)                                   # B * 14 * 14 samples/ch
    mean = sum16 / n
    var = sq16 / n - mean * mean                         # biased batch variance
    scale16 = kp["gamma"] * jax.lax.rsqrt(var + 1e-5)
    shift16 = kp["beta"] - mean * scale16
    scale_row = jnp.tile(scale16, 14)[None, :]           # (1, 224), col = X*16+c
    shift_row = jnp.tile(shift16, 14)[None, :]

    # Glue: depth-to-space(2) of the pre-BN conv1 output (~6 KB / image, bf16).
    y1dts = (y1_pre.reshape(B, 7, 7, 2, 2, 16)
             .transpose(0, 1, 3, 2, 4, 5)
             .reshape(B * 14, 224))

    # Kernel 2: BN affine + ReLU + ConvTranspose2d(16,1,4,2,1) (sub-pixel) +
    # bias (SMEM scalar) + tanh.
    y2 = pl.pallas_call(
        _bn_conv2_tanh_kernel,
        out_shape=jax.ShapeDtypeStruct((B * 14, 56), jnp.float32),
        grid=(n_tiles,),
        in_specs=[
            pl.BlockSpec((bt * 14, 224), lambda i: (i, 0)),
            pl.BlockSpec((1, 224), lambda i: (0, 0)),
            pl.BlockSpec((1, 224), lambda i: (0, 0)),
            pl.BlockSpec((3, 224, 56), lambda i: (0, 0, 0)),
            pl.BlockSpec(memory_space=pltpu.MemorySpace.SMEM),
        ],
        out_specs=pl.BlockSpec((bt * 14, 56), lambda i: (i, 0)),
        compiler_params=_CPARAMS,
    )(y1dts, scale_row, shift_row, kp["m2"], kp["b2"])

    # Glue: final depth-to-space(2) -> (B, 1, 28, 28).
    out = (y2.reshape(B, 14, 14, 2, 2)
           .transpose(0, 1, 3, 2, 4)
           .reshape(B, 28, 28))
    return out[:, None, :, :]


# ----------------------------------------------------------------------------
# Pure-JAX/XLA reference with PyTorch semantics (for the in-script self check)
# ----------------------------------------------------------------------------
def _conv_transpose_ref(x, w, b):
    w_conv = jnp.transpose(w, (1, 0, 2, 3))[:, :, ::-1, ::-1]
    y = jax.lax.conv_general_dilated(
        x, w_conv, window_strides=(1, 1), padding=[(2, 2), (2, 2)],
        lhs_dilation=(2, 2), rhs_dilation=(1, 1),
        dimension_numbers=("NCHW", "OIHW", "NCHW"),
        precision=jax.lax.Precision.HIGHEST)
    return y + b.reshape(1, -1, 1, 1)


def reference_forward(z, p):
    h = jnp.dot(z, p["w_lin"], precision=jax.lax.Precision.HIGHEST) + p["b_lin"]
    h = jnp.maximum(h, 0.0)
    x = h.reshape(-1, 32, 7, 7)
    y = _conv_transpose_ref(x, p["w_ct1"], p["b_ct1"])
    mu = jnp.mean(y, axis=(0, 2, 3), keepdims=True)
    var = jnp.mean((y - mu) ** 2, axis=(0, 2, 3), keepdims=True)
    y = (y - mu) * jax.lax.rsqrt(var + 1e-5)
    y = y * p["gamma"].reshape(1, -1, 1, 1) + p["beta"].reshape(1, -1, 1, 1)
    y = jnp.maximum(y, 0.0)
    y = _conv_transpose_ref(y, p["w_ct2"], p["b_ct2"])
    return jnp.tanh(y)


# ----------------------------------------------------------------------------
# Parameter init (PyTorch-layout "raw" params)
# ----------------------------------------------------------------------------
def init_params(key):
    ks = jax.random.split(key, 6)
    return {
        "w_lin": 0.05 * jax.random.normal(ks[0], (20, 1568), jnp.float32),
        "b_lin": 0.05 * jax.random.normal(ks[1], (1568,), jnp.float32),
        "w_ct1": 0.05 * jax.random.normal(ks[2], (32, 16, 4, 4), jnp.float32),
        "b_ct1": 0.05 * jax.random.normal(ks[3], (16,), jnp.float32),
        "gamma": jnp.ones((16,), jnp.float32),
        "beta": jnp.zeros((16,), jnp.float32),
        "w_ct2": 0.05 * jax.random.normal(ks[4], (16, 1, 4, 4), jnp.float32),
        "b_ct2": 0.05 * jax.random.normal(ks[5], (1,), jnp.float32),
    }


if __name__ == "__main__":
    key = jax.random.PRNGKey(0)
    pkey, zkey = jax.random.split(key)
    raw_params = init_params(pkey)
    kparams = prepare_kernel_params(raw_params)

    B = 32                                # exercises the 2-tile "parallel" grid
    z = jax.random.normal(zkey, (B, 20), jnp.float32)

    fwd = jax.jit(functools.partial(generator_forward, kp=kparams))
    out = jax.block_until_ready(fwd(z))

    assert out.shape == (B, 1, 28, 28), out.shape
    assert out.dtype == jnp.float32
    assert bool(jnp.all(jnp.isfinite(out)))
    assert bool(jnp.all(jnp.abs(out) <= 1.0 + 1e-6))     # Tanh range

    # Cross-check against the pure-JAX f32 reference (PyTorch semantics).
    ref_fn = jax.jit(functools.partial(reference_forward, p=raw_params))
    ref = jax.block_until_ready(ref_fn(z))
    max_err = float(jnp.max(jnp.abs(out - ref)))
    assert max_err < 5e-2, f"kernel/reference mismatch: max|diff|={max_err}"

    print("KERNEL_OK")
</pallas_src>

<mosaic_0001>
module attributes {stable_mosaic.version = 11 : i64} {
  func.func @_lin_conv1_kernel(%arg0: i32, %arg1: memref<112x147xbf16, #tpu.memory_space<vmem>>, %arg2: memref<147x672xbf16, #tpu.memory_space<vmem>>, %arg3: memref<672x448xbf16, #tpu.memory_space<vmem>>, %arg4: memref<1x448xf32, #tpu.memory_space<vmem>>, %arg5: memref<112x448xbf16, #tpu.memory_space<vmem>>, %arg6: memref<1x2x448xf32, #tpu.memory_space<vmem>>) attributes {dimension_semantics = [#tpu.dimension_semantics<parallel>], iteration_bounds = array<i64: 2>, scalar_prefetch = 0 : i64, scratch_operands = 0 : i64, tpu.core_type = #tpu.core_type<tc>, window_params = [{transform_indices = @transform_0, window_bounds = array<i64: 112, 147>}, {pipeline_mode = #tpu.pipeline_mode<synchronous>, transform_indices = @transform_1, window_bounds = array<i64: 147, 672>}, {pipeline_mode = #tpu.pipeline_mode<synchronous>, transform_indices = @transform_2, window_bounds = array<i64: 672, 448>}, {pipeline_mode = #tpu.pipeline_mode<synchronous>, transform_indices = @transform_3, window_bounds = array<i64: 1, 448>}, {transform_indices = @transform_4, window_bounds = array<i64: 112, 448>}, {transform_indices = @transform_5, window_bounds = array<i64: 1, 2, 448>}]} {
    %c0 = arith.constant 0 : index
    %c0_0 = arith.constant 0 : index
    %0 = vector.load %arg1[%c0, %c0_0] : memref<112x147xbf16, #tpu.memory_space<vmem>>, vector<112x147xbf16>
    %c0_1 = arith.constant 0 : index
    %c0_2 = arith.constant 0 : index
    %1 = vector.load %arg2[%c0_1, %c0_2] : memref<147x672xbf16, #tpu.memory_space<vmem>>, vector<147x672xbf16>
    %cst = arith.constant dense<0.000000e+00> : vector<112x672xf32>
    %2 = tpu.matmul %0, %1, %cst {dimension_numbers = #tpu.dot_dimension_numbers<[1], [0], [0], [1], [0, 0, 1, 1], [], []>} : vector<112x147xbf16>, vector<147x672xbf16>, vector<112x672xf32> -> vector<112x672xf32>
    %cst_3 = arith.constant 0.000000e+00 : f32
    %3 = vector.broadcast %cst_3 : f32 to vector<112x672xf32>
    %4 = arith.maximumf %2, %3 : vector<112x672xf32>
    %5 = arith.truncf %4 : vector<112x672xf32> to vector<112x672xbf16>
    %c0_4 = arith.constant 0 : index
    %c0_5 = arith.constant 0 : index
    %6 = vector.load %arg3[%c0_4, %c0_5] : memref<672x448xbf16, #tpu.memory_space<vmem>>, vector<672x448xbf16>
    %cst_6 = arith.constant dense<0.000000e+00> : vector<112x448xf32>
    %7 = tpu.matmul %5, %6, %cst_6 {dimension_numbers = #tpu.dot_dimension_numbers<[1], [0], [0], [1], [0, 0, 1, 1], [], []>} : vector<112x672xbf16>, vector<672x448xbf16>, vector<112x448xf32> -> vector<112x448xf32>
    %c0_7 = arith.constant 0 : index
    %c0_8 = arith.constant 0 : index
    %8 = vector.load %arg4[%c0_7, %c0_8] : memref<1x448xf32, #tpu.memory_space<vmem>>, vector<1x448xf32>
    %9 = vector.broadcast %8 : vector<1x448xf32> to vector<112x448xf32>
    %10 = arith.addf %7, %9 : vector<112x448xf32>
    %11 = arith.truncf %10 : vector<112x448xf32> to vector<112x448xbf16>
    %c0_9 = arith.constant 0 : index
    %c0_10 = arith.constant 0 : index
    %12 = vector.load %arg5[%c0_9, %c0_10] : memref<112x448xbf16, #tpu.memory_space<vmem>>, vector<112x448xbf16>
    tpu.vector_store %arg5[%c0_9, %c0_10], %11 {strides = array<i32>} : memref<112x448xbf16, #tpu.memory_space<vmem>>, vector<112x448xbf16>,
    %cst_11 = arith.constant dense<0.000000e+00> : vector<448xf32>
    %13 = vector.multi_reduction <add>, %10, %cst_11 [0] : vector<112x448xf32> to vector<448xf32>
    %14 = vector.shape_cast %13 : vector<448xf32> to vector<1x448xf32>
    %c0_12 = arith.constant 0 : index
    %c0_13 = arith.constant 0 : index
    %c0_14 = arith.constant 0 : index
    %15 = vector.load %arg6[%c0_12, %c0_13, %c0_14] : memref<1x2x448xf32, #tpu.memory_space<vmem>>, vector<1x1x448xf32>
    %16 = vector.shape_cast %15 : vector<1x1x448xf32> to vector<1x448xf32>
    %17 = vector.shape_cast %14 : vector<1x448xf32> to vector<1x1x448xf32>
    tpu.vector_store %arg6[%c0_12, %c0_13, %c0_14], %17 {strides = array<i32>} : memref<1x2x448xf32, #tpu.memory_space<vmem>>, vector<1x1x448xf32>,
    %18 = arith.mulf %10, %10 : vector<112x448xf32>
    %cst_15 = arith.constant dense<0.000000e+00> : vector<448xf32>
    %19 = vector.multi_reduction <add>, %18, %cst_15 [0] : vector<112x448xf32> to vector<448xf32>
    %20 = vector.shape_cast %19 : vector<448xf32> to vector<1x448xf32>
    %c0_16 = arith.constant 0 : index
    %c1 = arith.constant 1 : index
    %c0_17 = arith.constant 0 : index
    %21 = vector.load %arg6[%c0_16, %c1, %c0_17] : memref<1x2x448xf32, #tpu.memory_space<vmem>>, vector<1x1x448xf32>
    %22 = vector.shape_cast %21 : vector<1x1x448xf32> to vector<1x448xf32>
    %23 = vector.shape_cast %20 : vector<1x448xf32> to vector<1x1x448xf32>
    tpu.vector_store %arg6[%c0_16, %c1, %c0_17], %23 {strides = array<i32>} : memref<1x2x448xf32, #tpu.memory_space<vmem>>, vector<1x1x448xf32>,
    return
  }
  func.func @transform_0(%arg0: i32) -> (i32, i32) {
    %c0_i32 = arith.constant 0 : i32
    %c0_i32_0 = arith.constant 0 : i32
    return %arg0, %c0_i32 : i32, i32
  }
  func.func @transform_1(%arg0: i32) -> (i32, i32) {
    %c0_i32 = arith.constant 0 : i32
    %c0_i32_0 = arith.constant 0 : i32
    %c0_i32_1 = arith.constant 0 : i32
    return %c0_i32, %c0_i32_0 : i32, i32
  }
  func.func @transform_2(%arg0: i32) -> (i32, i32) {
    %c0_i32 = arith.constant 0 : i32
    %c0_i32_0 = arith.constant 0 : i32
    %c0_i32_1 = arith.constant 0 : i32
    return %c0_i32, %c0_i32_0 : i32, i32
  }
  func.func @transform_3(%arg0: i32) -> (i32, i32) {
    %c0_i32 = arith.constant 0 : i32
    %c0_i32_0 = arith.constant 0 : i32
    %c0_i32_1 = arith.constant 0 : i32
    return %c0_i32, %c0_i32_0 : i32, i32
  }
  func.func @transform_4(%arg0: i32) -> (i32, i32) {
    %c0_i32 = arith.constant 0 : i32
    %c0_i32_0 = arith.constant 0 : i32
    return %arg0, %c0_i32 : i32, i32
  }
  func.func @transform_5(%arg0: i32) -> (i32, i32, i32) {
    %c0_i32 = arith.constant 0 : i32
    %c0_i32_0 = arith.constant 0 : i32
    %c0_i32_1 = arith.constant 0 : i32
    return %arg0, %c0_i32, %c0_i32_0 : i32, i32, i32
  }
}

module attributes {stable_mosaic.version = 11 : i64} {
  func.func @_bn_conv2_tanh_kernel(%arg0: i32, %arg1: memref<224x224xbf16, #tpu.memory_space<vmem>>, %arg2: memref<1x224xf32, #tpu.memory_space<vmem>>, %arg3: memref<1x224xf32, #tpu.memory_space<vmem>>, %arg4: memref<3x224x56xbf16, #tpu.memory_space<vmem>>, %arg5: memref<1x1xf32, #tpu.memory_space<smem>>, %arg6: memref<224x56xf32, #tpu.memory_space<vmem>>) attributes {dimension_semantics = [#tpu.dimension_semantics<parallel>], iteration_bounds = array<i64: 2>, scalar_prefetch = 0 : i64, scratch_operands = 0 : i64, tpu.core_type = #tpu.core_type<tc>, window_params = [{transform_indices = @transform_0, window_bounds = array<i64: 224, 224>}, {pipeline_mode = #tpu.pipeline_mode<synchronous>, transform_indices = @transform_1, window_bounds = array<i64: 1, 224>}, {pipeline_mode = #tpu.pipeline_mode<synchronous>, transform_indices = @transform_2, window_bounds = array<i64: 1, 224>}, {pipeline_mode = #tpu.pipeline_mode<synchronous>, transform_indices = @transform_3, window_bounds = array<i64: 3, 224, 56>}, {transform_indices = @transform_4, window_bounds = array<i64: 1, 1>}, {transform_indices = @transform_5, window_bounds = array<i64: 224, 56>}]} {
    %c0 = arith.constant 0 : index
    %c0_0 = arith.constant 0 : index
    %0 = vector.load %arg1[%c0, %c0_0] : memref<224x224xbf16, #tpu.memory_space<vmem>>, vector<224x224xbf16>
    %1 = arith.extf %0 : vector<224x224xbf16> to vector<224x224xf32>
    %c0_1 = arith.constant 0 : index
    %c0_2 = arith.constant 0 : index
    %2 = vector.load %arg2[%c0_1, %c0_2] : memref<1x224xf32, #tpu.memory_space<vmem>>, vector<1x224xf32>
    %3 = vector.broadcast %2 : vector<1x224xf32> to vector<224x224xf32>
    %4 = arith.mulf %1, %3 : vector<224x224xf32>
    %c0_3 = arith.constant 0 : index
    %c0_4 = arith.constant 0 : index
    %5 = vector.load %arg3[%c0_3, %c0_4] : memref<1x224xf32, #tpu.memory_space<vmem>>, vector<1x224xf32>
    %6 = vector.broadcast %5 : vector<1x224xf32> to vector<224x224xf32>
    %7 = arith.addf %4, %6 : vector<224x224xf32>
    %cst = arith.constant 0.000000e+00 : f32
    %8 = vector.broadcast %cst : f32 to vector<224x224xf32>
    %9 = arith.maximumf %7, %8 : vector<224x224xf32>
    %cst_5 = arith.constant 0.000000e+00 : f32
    %10 = vector.broadcast %cst_5 : f32 to vector<1x224xf32>
    %11 = tpu.iota {dimensions = array<i32: 0>} : vector<224x1xi32>
    %12 = vector.extract_strided_slice %9 {offsets = [0, 0], sizes = [223, 224], strides = [1, 1]} : vector<224x224xf32> to vector<223x224xf32>
    %13 = tpu.concatenate %10, %12 in 0 : vector<1x224xf32>, vector<223x224xf32> -> vector<224x224xf32>
    %c14_i32 = arith.constant 14 : i32
    %c0_i32 = arith.constant 0 : i32
    %14 = arith.cmpi eq, %c14_i32, %c0_i32 : i32
    %c1_i32 = arith.constant 1 : i32
    %15 = arith.select %14, %c1_i32, %c14_i32 : i32
    %16 = vector.broadcast %15 : i32 to vector<224x1xi32>
    %17 = arith.remsi %11, %16 : vector<224x1xi32>
    %c0_i32_6 = arith.constant 0 : i32
    %18 = vector.broadcast %c0_i32_6 : i32 to vector<224x1xi32>
    %19 = arith.cmpi ne, %17, %18 : vector<224x1xi32>
    %c0_i32_7 = arith.constant 0 : i32
    %20 = vector.broadcast %c0_i32_7 : i32 to vector<224x1xi32>
    %21 = arith.cmpi slt, %17, %20 : vector<224x1xi32>
    %c0_i32_8 = arith.constant 0 : i32
    %22 = arith.cmpi slt, %15, %c0_i32_8 : i32
    %23 = vector.broadcast %22 : i1 to vector<224x1xi1>
    %24 = vector.broadcast %23 : vector<224x1xi1> to vector<224x1xi1>
    %25 = arith.xori %21, %24 : vector<224x1xi1>
    %26 = arith.andi %25, %19 : vector<224x1xi1>
    %27 = vector.broadcast %15 : i32 to vector<224x1xi32>
    %28 = arith.addi %17, %27 : vector<224x1xi32>
    %29 = arith.select %26, %28, %17 : vector<224x1xi1>, vector<224x1xi32>
    %c0_i32_9 = arith.constant 0 : i32
    %30 = vector.broadcast %c0_i32_9 : i32 to vector<224x1xi32>
    %31 = arith.cmpi ne, %29, %30 : vector<224x1xi32>
    %32 = arith.extui %31 : vector<224x1xi1> to vector<224x1xi32>
    %33 = arith.sitofp %32 : vector<224x1xi32> to vector<224x1xf32>
    %34 = vector.broadcast %33 : vector<224x1xf32> to vector<224x224xf32>
    %35 = arith.mulf %13, %34 : vector<224x224xf32>
    %36 = vector.extract_strided_slice %9 {offsets = [1, 0], sizes = [223, 224], strides = [1, 1]} : vector<224x224xf32> to vector<223x224xf32>
    %37 = tpu.concatenate %36, %10 in 0 : vector<223x224xf32>, vector<1x224xf32> -> vector<224x224xf32>
    %c14_i32_10 = arith.constant 14 : i32
    %c0_i32_11 = arith.constant 0 : i32
    %38 = arith.cmpi eq, %c14_i32_10, %c0_i32_11 : i32
    %c1_i32_12 = arith.constant 1 : i32
    %39 = arith.select %38, %c1_i32_12, %c14_i32_10 : i32
    %40 = vector.broadcast %39 : i32 to vector<224x1xi32>
    %41 = arith.remsi %11, %40 : vector<224x1xi32>
    %c0_i32_13 = arith.constant 0 : i32
    %42 = vector.broadcast %c0_i32_13 : i32 to vector<224x1xi32>
    %43 = arith.cmpi ne, %41, %42 : vector<224x1xi32>
    %c0_i32_14 = arith.constant 0 : i32
    %44 = vector.broadcast %c0_i32_14 : i32 to vector<224x1xi32>
    %45 = arith.cmpi slt, %41, %44 : vector<224x1xi32>
    %c0_i32_15 = arith.constant 0 : i32
    %46 = arith.cmpi slt, %39, %c0_i32_15 : i32
    %47 = vector.broadcast %46 : i1 to vector<224x1xi1>
    %48 = vector.broadcast %47 : vector<224x1xi1> to vector<224x1xi1>
    %49 = arith.xori %45, %48 : vector<224x1xi1>
    %50 = arith.andi %49, %43 : vector<224x1xi1>
    %51 = vector.broadcast %39 : i32 to vector<224x1xi32>
    %52 = arith.addi %41, %51 : vector<224x1xi32>
    %53 = arith.select %50, %52, %41 : vector<224x1xi1>, vector<224x1xi32>
    %c13_i32 = arith.constant 13 : i32
    %54 = vector.broadcast %c13_i32 : i32 to vector<224x1xi32>
    %55 = arith.cmpi ne, %53, %54 : vector<224x1xi32>
    %56 = arith.extui %55 : vector<224x1xi1> to vector<224x1xi32>
    %57 = arith.sitofp %56 : vector<224x1xi32> to vector<224x1xf32>
    %58 = vector.broadcast %57 : vector<224x1xf32> to vector<224x224xf32>
    %59 = arith.mulf %37, %58 : vector<224x224xf32>
    %60 = arith.truncf %9 : vector<224x224xf32> to vector<224x224xbf16>
    %c1 = arith.constant 1 : index
    %c0_16 = arith.constant 0 : index
    %c0_17 = arith.constant 0 : index
    %61 = vector.load %arg4[%c1, %c0_16, %c0_17] : memref<3x224x56xbf16, #tpu.memory_space<vmem>>, vector<1x224x56xbf16>
    %62 = vector.shape_cast %61 : vector<1x224x56xbf16> to vector<224x56xbf16>
    %cst_18 = arith.constant dense<0.000000e+00> : vector<224x56xf32>
    %63 = tpu.matmul %60, %62, %cst_18 {dimension_numbers = #tpu.dot_dimension_numbers<[1], [0], [0], [1], [0, 0, 1, 1], [], []>} : vector<224x224xbf16>, vector<224x56xbf16>, vector<224x56xf32> -> vector<224x56xf32>
    %64 = arith.truncf %35 : vector<224x224xf32> to vector<224x224xbf16>
    %c0_19 = arith.constant 0 : index
    %c0_20 = arith.constant 0 : index
    %c0_21 = arith.constant 0 : index
    %65 = vector.load %arg4[%c0_19, %c0_20, %c0_21] : memref<3x224x56xbf16, #tpu.memory_space<vmem>>, vector<1x224x56xbf16>
    %66 = vector.shape_cast %65 : vector<1x224x56xbf16> to vector<224x56xbf16>
    %cst_22 = arith.constant dense<0.000000e+00> : vector<224x56xf32>
    %67 = tpu.matmul %64, %66, %cst_22 {dimension_numbers = #tpu.dot_dimension_numbers<[1], [0], [0], [1], [0, 0, 1, 1], [], []>} : vector<224x224xbf16>, vector<224x56xbf16>, vector<224x56xf32> -> vector<224x56xf32>
    %68 = arith.addf %63, %67 : vector<224x56xf32>
    %69 = arith.truncf %59 : vector<224x224xf32> to vector<224x224xbf16>
    %c2 = arith.constant 2 : index
    %c0_23 = arith.constant 0 : index
    %c0_24 = arith.constant 0 : index
    %70 = vector.load %arg4[%c2, %c0_23, %c0_24] : memref<3x224x56xbf16, #tpu.memory_space<vmem>>, vector<1x224x56xbf16>
    %71 = vector.shape_cast %70 : vector<1x224x56xbf16> to vector<224x56xbf16>
    %cst_25 = arith.constant dense<0.000000e+00> : vector<224x56xf32>
    %72 = tpu.matmul %69, %71, %cst_25 {dimension_numbers = #tpu.dot_dimension_numbers<[1], [0], [0], [1], [0, 0, 1, 1], [], []>} : vector<224x224xbf16>, vector<224x56xbf16>, vector<224x56xf32> -> vector<224x56xf32>
    %73 = arith.addf %68, %72 : vector<224x56xf32>
    %c0_26 = arith.constant 0 : index
    %c0_27 = arith.constant 0 : index
    %74 = memref.load %arg5[%c0_26, %c0_27] : memref<1x1xf32, #tpu.memory_space<smem>>
    %75 = vector.broadcast %74 : f32 to vector<224x56xf32>
    %76 = arith.addf %73, %75 : vector<224x56xf32>
    %77 = math.tanh %76 : vector<224x56xf32>
    %c0_28 = arith.constant 0 : index
    %c0_29 = arith.constant 0 : index
    %78 = vector.load %arg6[%c0_28, %c0_29] : memref<224x56xf32, #tpu.memory_space<vmem>>, vector<224x56xf32>
    tpu.vector_store %arg6[%c0_28, %c0_29], %77 {strides = array<i32>} : memref<224x56xf32, #tpu.memory_space<vmem>>, vector<224x56xf32>,
    return
  }
  func.func @transform_0(%arg0: i32) -> (i32, i32) {
    %c0_i32 = arith.constant 0 : i32
    %c0_i32_0 = arith.constant 0 : i32
    return %arg0, %c0_i32 : i32, i32
  }
  func.func @transform_1(%arg0: i32) -> (i32, i32) {
    %c0_i32 = arith.constant 0 : i32
    %c0_i32_0 = arith.constant 0 : i32
    %c0_i32_1 = arith.constant 0 : i32
    return %c0_i32, %c0_i32_0 : i32, i32
  }
  func.func @transform_2(%arg0: i32) -> (i32, i32) {
    %c0_i32 = arith.constant 0 : i32
    %c0_i32_0 = arith.constant 0 : i32
    %c0_i32_1 = arith.constant 0 : i32
    return %c0_i32, %c0_i32_0 : i32, i32
  }
  func.func @transform_3(%arg0: i32) -> (i32, i32, i32) {
    %c0_i32 = arith.constant 0 : i32
    %c0_i32_0 = arith.constant 0 : i32
    %c0_i32_1 = arith.constant 0 : i32
    %c0_i32_2 = arith.constant 0 : i32
    return %c0_i32, %c0_i32_0, %c0_i32_1 : i32, i32, i32
  }
  func.func @transform_4(%arg0: i32) -> (i32, i32) {
    %c0_i32 = arith.constant 0 : i32
    %c0_i32_0 = arith.constant 0 : i32
    %c0_i32_1 = arith.constant 0 : i32
    return %c0_i32, %c0_i32_0 : i32, i32
  }
  func.func @transform_5(%arg0: i32) -> (i32, i32) {
    %c0_i32 = arith.constant 0 : i32
    %c0_i32_0 = arith.constant 0 : i32
    return %arg0, %c0_i32 : i32, i32
  }
}

</mosaic_0001>

<bundles_post_ra>
// kernel: squeeze.2
= control target key start
LH: loop header
LB: loop body
LE: loop exit
PB: predicated region body
PF: predicated region fallthrough
CT: control target
= control target key end

     0   :  { %s66_s8 = smov 80   ;;  %vm7_vm0 = vcmask 130048   ;;  %s67_s11 = smov 96   ;;  %s117_s0 = inlined_call_operand.vmem [shape: f32[448], index: 0, kind: input, shape index: {}]   ;;  %s118_s1 = inlined_call_operand.vmem [shape: f32[28,16], index: 1, kind: output, shape index: {}]  }
   0x1   :  { %v4_v0 = vld [vmem:[%s117_s0] sm:$0xf]  ;;  %s65_s0 = smov 112   ;;  %s68_s12 = smov 64  }
   0x2   :  { %5 = vst [vmem:[#allocation0] sm:$0xf] %v4_v0  ;;  %s69_s13 = smov 48   ;;  %s70_s14 = smov 32  }
   0x3   :  { %s71_s15 = smov 16  }
   0x9   :  { %v9_v1 = vld [vmem:[#allocation0] sm:$0xf]  }
   0xa   :  { %v21_v2 = vld [vmem:[#allocation0] sm:$0xf]   ;;  %10 = vrot.lane.b32.xlu0 %v9_v1, %s65_s0 }
   0xb   :  { %22 = vrot.lane.b32.xlu1 %v21_v2, %s66_s8  ;;  %v15_v3 = vld [vmem:[#allocation0] sm:$0xf]  }
   0xc   :  { %v27_v4 = vld [vmem:[#allocation0] sm:$0x7]  }
   0xd   :  { %v6_v5 = vld [vmem:[#allocation0] sm:$0xf]  }
   0xe   :  { %8 = vst.msk [vmem:[%s118_s1] ss:$8 sm:$0xf] %vm7_vm0, %v6_v5   ;;  %16 = vrot.lane.b32.xlu0 %v15_v3, %s67_s11  ;;  %v33_v6 = vld [vmem:[#allocation0] sm:$0x7]  }
   0xf   :  { %28 = vrot.lane.b32.xlu1 %v27_v4, %s68_s12  ;;  %v39_v7 = vld [vmem:[#allocation0] sm:$0x7]  }
  0x10   :  { %v45_v8 = vld [vmem:[#allocation0] sm:$0x7]  }
  0x12   :  { %34 = vrot.lane.b32.xlu0 %v33_v6, %s69_s13 }
  0x13   :  { %40 = vrot.lane.b32.xlu1 %v39_v7, %s70_s14 }
  0x16   :  { %46 = vrot.lane.b32.xlu0 %v45_v8, %s71_s15 }
  0x7c   :  { %v11_v9 = vpop.permute.xlu0 %10  }
  0x7d   :  { %v23_v10 = vpop.permute.xlu1 %22   ;;  %51 = vst.msk [vmem:[%s118_s1 + $0x1] ss:$8 sm:$0xf] %vm7_vm0, %v11_v9  }
  0x7e   :  { %53 = vst.msk [vmem:[%s118_s1 + $0x3] ss:$8 sm:$0xf] %vm7_vm0, %v23_v10  }
  0x80   :  { %v17_v11 = vpop.permute.xlu0 %16  }
  0x81   :  { %v29_v12 = vpop.permute.xlu1 %28   ;;  %52 = vst.msk [vmem:[%s118_s1 + $0x2] ss:$8 sm:$0xf] %vm7_vm0, %v17_v11  }
  0x82   :  { %54 = vst.msk [vmem:[%s118_s1 + $0x4] ss:$8 sm:$0x7] %vm7_vm0, %v29_v12  }
  0x84   :  { %v35_v13 = vpop.permute.xlu0 %34  }
  0x85   :  { %v41_v14 = vpop.permute.xlu1 %40   ;;  %55 = vst.msk [vmem:[%s118_s1 + $0x5] ss:$8 sm:$0x7] %vm7_vm0, %v35_v13  }
  0x86   :  { %56 = vst.msk [vmem:[%s118_s1 + $0x6] ss:$8 sm:$0x7] %vm7_vm0, %v41_v14  }
  0x88   :  { %v47_v15 = vpop.permute.xlu0 %46  }
  0x89   :  { %57 = vst.msk [vmem:[%s118_s1 + $0x7] ss:$8 sm:$0x7] %vm7_vm0, %v47_v15  }

// kernel: tile.18
= control target key start
LH: loop header
LB: loop body
LE: loop exit
PB: predicated region body
PF: predicated region fallthrough
CT: control target
= control target key end

     0   :  { %s28_s0 = inlined_call_operand.vmem [shape: f32[16], index: 0, kind: input, shape index: {}]   ;;  %s29_s1 = inlined_call_operand.vmem [shape: f32[14,16], index: 1, kind: output, shape index: {}]  }
   0x1   :  { %v4_v0 = vld [vmem:[%s28_s0] ss:$0 sm:$0xff] }
   0x2   :  { %5 = vst [vmem:[%s29_s1] sm:$0xff] %v4_v0  ;;  %8 = vst [vmem:[%s29_s1 + $0x8] sm:$0xff] %v4_v0 }

// kernel: tile.19
= control target key start
LH: loop header
LB: loop body
LE: loop exit
PB: predicated region body
PF: predicated region fallthrough
CT: control target
= control target key end

     0   :  { %s19_s8 = smov 3  ;;  %s79_s9 = smov 112   ;;  %vm4_vm0 = vcmask 130048   ;;  %vm10_vm1 = vcmask 1048448   ;;  %vm16_vm2 = vcmask 917248   ;;  %vm23_vm3 = vcmask 786048   ;;  %s126_s0 = inlined_call_operand.vmem [shape: f32[14,16], index: 0, kind: input, shape index: {}]   ;;  %s127_s1 = inlined_call_operand.vmem [shape: f32[1,224], index: 1, kind: output, shape index: {}]  }
   0x1   :  { %v64_v0 = vld [vmem:[%s126_s0 + $0x7] sm:$0x1]   ;;  %v66_v1 = vld [vmem:[%s126_s0 + $0x5] ss:$8 sm:%s19_s8]   ;;  %s80_s12 = smov 80   ;;  %s26_s15 = smov 3 }
   0x2   :  { %8 = vrot.lane.b32.xlu0 %v64_v0, %s79_s9  ;;  %21 = vrot.lane.b32.xlu1 %v66_v1, %s80_s12  ;;  %v65_v2 = vld [vmem:[%s126_s0 + $0x6] sm:$0x1]   ;;  %s33_s18 = smov 3  ;;  %s40_s19 = smov 3  ;;  %vm30_vm4 = vcmask 654848   ;;  %vm37_vm5 = vcmask 523648  }
   0x3   :  { %v67_v3 = vld [vmem:[%s126_s0 + $0x4] ss:$8 sm:%s26_s15]   ;;  %s81_s20 = smov 96   ;;  %s82_s21 = smov 64   ;;  %v68_v4 = vld [vmem:[%s126_s0 + $0x3] ss:$8 sm:%s33_s18]  }
   0x4   :  { %s2_s24 = smov 3  ;;  %v69_v5 = vld [vmem:[%s126_s0 + $0x2] ss:$8 sm:%s40_s19]   ;;  %s47_s27 = smov 3  ;;  %vm44_vm6 = vcmask 392448   ;;  %vm51_vm7 = vcmask 261248  }
   0x5   :  { %v3_v6 = vld [vmem:[%s126_s0] ss:$8 sm:%s2_s24]   ;;  %s83_s30 = smov 48   ;;  %s84_s2 = smov 32   ;;  %v70_v7 = vld [vmem:[%s126_s0 + $0x1] ss:$8 sm:%s47_s27]  }
   0x6   :  { %14 = vrot.lane.b32.xlu0 %v65_v2, %s81_s20  ;;  %28 = vrot.lane.b32.xlu1 %v67_v3, %s82_s21  ;;  %5 = vst.msk [vmem:[#allocation0] ss:$8 sm:$0x3] %vm4_vm0, %v3_v6   ;;  %s85_s0 = smov 16  }
   0xa   :  { %35 = vrot.lane.b32.xlu0 %v68_v4, %s83_s30  ;;  %42 = vrot.lane.b32.xlu1 %v69_v5, %s84_s2 }
   0xe   :  { %49 = vrot.lane.b32.xlu0 %v70_v7, %s85_s0 }
  0x74   :  { %v9_v8 = vpop.permute.xlu0 %8   ;;  %v22_v9 = vpop.permute.xlu1 %21  }
  0x75   :  { %11 = vst.msk [vmem:[#allocation0] sm:$0x1] %vm10_vm1, %v9_v8  }
  0x78   :  { %v15_v10 = vpop.permute.xlu0 %14   ;;  %v29_v11 = vpop.permute.xlu1 %28  }
  0x79   :  { %17 = vst.msk [vmem:[#allocation0] sm:$0x1] %vm16_vm2, %v15_v10  }
  0x7a   :  { %24 = vst.msk [vmem:[#allocation0] ss:$8 sm:$0x3] %vm23_vm3, %v22_v9  }
  0x7b   :  { %31 = vst.msk [vmem:[#allocation0] ss:$8 sm:$0x3] %vm30_vm4, %v29_v11  }
  0x7c   :  { %v36_v12 = vpop.permute.xlu0 %35   ;;  %v43_v13 = vpop.permute.xlu1 %42  }
  0x7d   :  { %38 = vst.msk [vmem:[#allocation0] ss:$8 sm:$0x3] %vm37_vm5, %v36_v12  }
  0x7e   :  { %45 = vst.msk [vmem:[#allocation0] ss:$8 sm:$0x3] %vm44_vm6, %v43_v13  }
  0x80   :  { %v50_v14 = vpop.permute.xlu0 %49  }
  0x81   :  { %52 = vst.msk [vmem:[#allocation0] ss:$8 sm:$0x3] %vm51_vm7, %v50_v14  }
  0x88   :  { %v56_v15 = vld [vmem:[#allocation0] sm:$0x1]  ;;  %v60_v16 = vld [vmem:[#allocation0 + $0x8] sm:$0x1] }
  0x89   :  { %58 = vst [vmem:[%s127_s1] sm:$0x1] %v56_v15  ;;  %71 = vst [vmem:[%s127_s1 + $0x1] sm:$0x1] %v60_v16 }

// kernel: generator_forward.2
= control target key start
LH: loop header
LB: loop body
LE: loop exit
PB: predicated region body
PF: predicated region fallthrough
CT: control target
= control target key end

     0   :  { %s4355_s18 = smov 0   ;;  %s5592_s0 = inlined_call_operand.vmem [shape: bf16[224,147], index: 0, kind: input, shape index: {}]   ;;  %s5593_s1 = inlined_call_operand.vmem [shape: bf16[147,672], index: 1, kind: input, shape index: {}]   ;;  %s5594_s2 = inlined_call_operand.vmem [shape: bf16[672,448], index: 2, kind: input, shape index: {}]   ;;  %s5595_s3 = inlined_call_operand.vmem [shape: f32[1,448], index: 3, kind: input, shape index: {}]   ;;  %s5596_s4 = inlined_call_operand.vmem [shape: bf16[224,448], index: 4, kind: output, shape index: {0}]   ;;  %s5597_s5 = inlined_call_operand.vmem [shape: f32[2,2,448], index: 5, kind: output, shape index: {1}]  }
   0x1 LB: > { %s4361_s19 = sadd.s32 4294967295, %s4321_s18   ;;  %p3411_p0 = scmp.ge.s32.totalorder %s4321_s18, 1  ;;  %s4321_s18 = sphi %s4355_s18, %s16_s18  }
   0x2   : > { %p192_p1 = scmp.lt.s32.totalorder %s4321_s18, 3 }
   0x4   : > { %p193_p2 = pnand %p3411_p0, %p192_p1 }
   0x5   : > { %v3955_v0 = vld [vmem:[%s5593_s1 + $0x4] ss:$24 sps:$4 sm:$0xff] (!%p193_p2)   ;;  %v3957_v1 = vld [vmem:[%s5593_s1] ss:$24 sps:$4 sm:$0xff] (!%p193_p2)   ;;  %s227_s24 = smul.u32 (!%p193_p2), 14, %s4361_s19  ;;  %vm666_vm0 = vcmask (!%p193_p2), 154624  }
   0x6   : > { %196 = sbr.rel (%p193_p2) target bundleno = 702 (0x2be), region = 36  ;;  %710 = vmatprep.subr.bf16.mxu0 (!%p193_p2), %v3955_v0  ;;  %v3958_v2 = vld [vmem:[%s5593_s1 + $0x34] ss:$24 sps:$4 sm:$0xff] (!%p193_p2)   ;;  %v3960_v3 = vld [vmem:[%s5593_s1 + $0x30] ss:$24 sps:$4 sm:$0xff] (!%p193_p2)   ;;  %vm688_vm1 = vcmask (!%p193_p2), 1040384  }
   0x7   : > { %711 = vmatpush1.bf16.msra.mxu0 (!%p193_p2), %v3957_v1  ;;  %v3961_v4 = vld [vmem:[%s5593_s1 + $0x64] ss:$24 sps:$4 sm:$0xff] (!%p193_p2)   ;;  %p228_p3 = scmp.lt.s32.totalorder (!%p193_p2), %s227_s24, 27  ;;  %v3963_v5 = vld [vmem:[%s5593_s1 + $0x60] ss:$24 sps:$4 sm:$0xff] (!%p193_p2)   ;;  %vm689_vm2 = vcmask (!%p193_p2), 1041408  }
   0x8   : > { %712 = vmatprep.subr.bf16.mxu0 (!%p193_p2), %v3958_v2  ;;  %v3964_v6 = vld [vmem:[%s5593_s1 + $0x94] ss:$24 sps:$4 sm:$0xff] (!%p193_p2)   ;;  %v3966_v7 = vld [vmem:[%s5593_s1 + $0x90] ss:$24 sps:$4 sm:$0xff] (!%p193_p2)   ;;  %v3967_v8 = vld [vmem:[%s5593_s1 + $0xc4] ss:$24 sps:$4 sm:$0xff] (!%p193_p2)  }
   0x9   : > { %v3969_v10 = vld [vmem:[%s5593_s1 + $0xc0] ss:$24 sps:$4 sm:$0xff] (!%p193_p2)   ;;  %v3970_v11 = vld [vmem:[%s5593_s1 + $0xf4] ss:$24 sps:$4 sm:$0xff] (!%p193_p2)   ;;  %v3972_v14 = vld [vmem:[%s5593_s1 + $0xf0] ss:$24 sps:$4 sm:$0xff] (!%p193_p2)  }
   0xa   : > { %v3993_v12 = vld [vmem:[%s5593_s1 + $0xc] ss:$24 sps:$4 sm:$0xff] (!%p193_p2)   ;;  %v3995_v13 = vld [vmem:[%s5593_s1 + $0x8] ss:$24 sps:$4 sm:$0xff] (!%p193_p2)   ;;  %v3996_v15 = vld [vmem:[%s5593_s1 + $0x3c] ss:$24 sps:$4 sm:$0xff] (!%p193_p2)  }
   0xb   : > { %713 = vmatpush1.bf16.msra.mxu0 (!%p193_p2), %v3960_v3  ;;  %v3973_v16 = vld [vmem:[%s5593_s1 + $0x124] ss:$24 sps:$4 sm:$0xff] (!%p193_p2)   ;;  %813 = vmatprep.subr.bf16.mxu1 (!%p193_p2), %v3993_v12  ;;  %v3998_v17 = vld [vmem:[%s5593_s1 + $0x38] ss:$24 sps:$4 sm:$0xff] (!%p193_p2)   ;;  %v3976_v20 = vld [vmem:[%s5593_s1 + $0x154] ss:$24 sps:$4 sm:$0xff] (!%p193_p2)  }
   0xc   : > { %714 = vmatprep.subr.bf16.mxu0 (!%p193_p2), %v3961_v4  ;;  %814 = vmatpush1.bf16.msra.mxu1 (!%p193_p2), %v3995_v13  ;;  %v4002_v18 = vld [vmem:[%s5593_s1 + $0x6c] ss:$24 sps:$4 sm:$0xff] (!%p193_p2)   ;;  %v3975_v19 = vld [vmem:[%s5593_s1 + $0x120] ss:$24 sps:$4 sm:$0xff] (!%p193_p2)   ;;  %v315_v22 = vld [vmem:[%s5593_s1 + $0x1b0] sm:$0x33] (!%p193_p2) }
   0xd   : > { %s5601_s24 = smov (!%p228_p3, %s227_s24), 27  ;;  %815 = vmatprep.subr.bf16.mxu1 %v3996_v15  ;;  %v4004_v21 = vld [vmem:[%s5593_s1 + $0x68] ss:$24 sps:$4 sm:$0xff]   ;;  %v4005_v23 = vld [vmem:[%s5593_s1 + $0x9c] ss:$24 sps:$4 sm:$0xff]   ;;  %v4323_v25 = vmov 65535   ;;  %v3487_v28 = vcombine.high %v315_v22, %v315_v22  ;;  %v3486_v33 = vcombine.low %v315_v22, %v315_v22 }
   0xe   : > { %s3726_s10 = sshll.u32 %s5601_s24, 3  ;;  %v3978_v24 = vld [vmem:[%s5593_s1 + $0x150] ss:$24 sps:$4 sm:$0xff]   ;;  %v690_v26 = vsel %vm688_vm1, 4294967295, %v4323_v25  ;;  %v3979_v27 = vld [vmem:[%s5593_s1 + $0x184] ss:$24 sps:$4 sm:$0xff]  }
   0xf   : > { %s4393_s13 = scalar_lea.vmem %s5592_s0, %s3726_s10  ;;  %715 = vmatpush1.bf16.msra.mxu0 %v3963_v5  ;;  %v4007_v29 = vld [vmem:[%s5593_s1 + $0x98] ss:$24 sps:$4 sm:$0xff]   ;;  %v4459_v30 = vsel %vm689_vm2, %v690_v26, 0  ;;  %v4011_v31 = vld [vmem:[%s5593_s1 + $0xcc] ss:$24 sps:$4 sm:$0xff]   ;;  %vm2175_vm3 = vcmask 261120  }
  0x10   : > { %716 = vmatprep.subr.bf16.mxu0 %v3964_v6  ;;  %v4402_v9 = vld [vmem:[%s4393_s13 + $0x4] ss:$8 sps:$4 sm:$0xff]   ;;  %816 = vmatpush1.bf16.msra.mxu1 %v3998_v17  ;;  %v3981_v32 = vld [vmem:[%s5593_s1 + $0x180] ss:$24 sps:$4 sm:$0xff]   ;;  %v696_v34 = vand.u32 %v3487_v28, %v4459_v30  ;;  %v4014_v36 = vld [vmem:[%s5593_s1 + $0xfc] ss:$24 sps:$4 sm:$0xff]   ;;  %v693_v37 = vand.u32 %v3486_v33, %v4459_v30 }
  0x11   : > { %3492 = vmatprep.mubr.msk.bf16.mxu0 %vm666_vm0, %v4402_v9  ;;  %3499 = vmatprep.mubr.msk.bf16.mxu1 %vm666_vm0, %v4402_v9  ;;  %v4013_v35 = vld [vmem:[%s5593_s1 + $0xc8] ss:$24 sps:$4 sm:$0xff]   ;;  %v4016_v38 = vld [vmem:[%s5593_s1 + $0xf8] ss:$24 sps:$4 sm:$0xff]   ;;  %v4036_v39 = vld [vmem:[%s5593_s1 + $0x14] ss:$24 sps:$4 sm:$0xff]  }
  0x12   : > { %817 = vmatprep.subr.bf16.mxu1 %v4002_v18  ;;  %v4482_v40 = vld [vmem:[%s4393_s13] ss:$8 sps:$4 sm:$0xff]   ;;  %v4020_v41 = vld [vmem:[%s5593_s1 + $0x12c] ss:$24 sps:$4 sm:$0xff]   ;;  %v4488_v42 = vld [vmem:[%s4393_s13 + $0x14] ss:$8 sps:$4 sm:$0xff]  }
  0x13   : > { %717 = vmatpush1.bf16.msra.mxu0 %v3966_v7  ;;  %v4034_v43 = vld [vmem:[%s5593_s1 + $0x10] ss:$24 sps:$4 sm:$0xff]   ;;  %v4039_v45 = vld [vmem:[%s5593_s1 + $0x44] ss:$24 sps:$4 sm:$0xff]   ;;  %v4037_v48 = vld [vmem:[%s5593_s1 + $0x40] ss:$24 sps:$4 sm:$0xff]  }
  0x14   : > { %718 = vmatprep.subr.bf16.mxu0 %v3967_v8  ;;  %818 = vmatpush1.bf16.msra.mxu1 %v4004_v21  ;;  %v4022_v44 = vld [vmem:[%s5593_s1 + $0x128] ss:$24 sps:$4 sm:$0xff]   ;;  %v4023_v46 = vld [vmem:[%s5593_s1 + $0x15c] ss:$24 sps:$4 sm:$0xff]   ;;  %v4025_v49 = vld [vmem:[%s5593_s1 + $0x158] ss:$24 sps:$4 sm:$0xff]  }
  0x15   : > { %819 = vmatprep.subr.bf16.mxu1 %v4005_v23  ;;  %v316_v47 = vld [vmem:[%s5593_s1 + $0x1b8] sm:$0x33]  ;;  %v4042_v50 = vld [vmem:[%s5593_s1 + $0x74] ss:$24 sps:$4 sm:$0xff]   ;;  %v4040_v55 = vld [vmem:[%s5593_s1 + $0x70] ss:$24 sps:$4 sm:$0xff]  }
  0x16   : > { %v4029_v51 = vld [vmem:[%s5593_s1 + $0x18c] ss:$24 sps:$4 sm:$0xff]   ;;  %v3489_v52 = vcombine.high %v316_v47, %v316_v47  ;;  %v4521_v53 = vld [vmem:[%s4393_s13 + $0x10] ss:$8 sps:$4 sm:$0xff]   ;;  %v4031_v56 = vld [vmem:[%s5593_s1 + $0x188] ss:$24 sps:$4 sm:$0xff]   ;;  %v3488_v57 = vcombine.low %v316_v47, %v316_v47 }
  0x17   : > { %719 = vmatpush1.bf16.msra.mxu0 %v3969_v10  ;;  %v4524_v54 = vld [vmem:[%s4393_s13 + $0x24] ss:$8 sps:$4 sm:$0xff]   ;;  %v4043_v60 = vld [vmem:[%s5593_s1 + $0xa0] ss:$24 sps:$4 sm:$0xff]   ;;  %v4553_v1 = vld [vmem:[%s4393_s13 + $0x34] ss:$8 sps:$4 sm:$0xff]  }
  0x18   : > { %720 = vmatprep.subr.bf16.mxu0 %v3970_v11  ;;  %820 = vmatpush1.bf16.msra.mxu1 %v4007_v29  ;;  %v4045_v58 = vld [vmem:[%s5593_s1 + $0xa4] ss:$24 sps:$4 sm:$0xff]   ;;  %v702_v59 = vand.u32 %v3489_v52, %v4459_v30  ;;  %v699_v61 = vand.u32 %v3488_v57, %v4459_v30  ;;  %v4048_v62 = vld [vmem:[%s5593_s1 + $0xd4] ss:$24 sps:$4 sm:$0xff]   ;;  %v4550_v0 = vld [vmem:[%s4393_s13 + $0x20] ss:$8 sps:$4 sm:$0xff]  }
  0x19   : > { %821 = vmatprep.subr.bf16.mxu1 %v4011_v31  ;;  %v4065_v63 = vld [vmem:[%s5594_s2 + $0x4] ss:$16 sps:$4 sm:$0xff]   ;;  %v4046_v2 = vld [vmem:[%s5593_s1 + $0xd0] ss:$24 sps:$4 sm:$0xff]   ;;  %v4049_v7 = vld [vmem:[%s5593_s1 + $0x100] ss:$24 sps:$4 sm:$0xff]  }
  0x1a   : > { %v4051_v3 = vld [vmem:[%s5593_s1 + $0x104] ss:$24 sps:$4 sm:$0xff]   ;;  %v4063_v4 = vld [vmem:[%s5594_s2] ss:$16 sps:$4 sm:$0xff]   ;;  %v4054_v8 = vld [vmem:[%s5593_s1 + $0x134] ss:$24 sps:$4 sm:$0xff]  }
  0x1b   : > { %721 = vmatpush1.bf16.msra.mxu0 %v3972_v14  ;;  %v4071_v5 = vld [vmem:[%s5594_s2 + $0x24] ss:$16 sps:$4 sm:$0xff]   ;;  %v4572_v6 = vld [vmem:[%s4393_s13 + $0x30] ss:$8 sps:$4 sm:$0xff]   ;;  %v4611_v18 = vld [vmem:[%s4393_s13 + $0x40] ss:$8 sps:$4 sm:$0xff]  }
  0x1c   : > { %722 = vmatprep.subr.bf16.mxu0 %v3973_v16  ;;  %822 = vmatpush1.bf16.msra.mxu1 %v4013_v35  ;;  %v4069_v10 = vld [vmem:[%s5594_s2 + $0x20] ss:$16 sps:$4 sm:$0xff]   ;;  %v4077_v11 = vld [vmem:[%s5594_s2 + $0x44] ss:$16 sps:$4 sm:$0xff]   ;;  %v4068_v33 = vld [vmem:[%s5594_s2 + $0xc] ss:$16 sps:$4 sm:$0xff]  }
  0x1d   : > { %823 = vmatprep.subr.bf16.mxu1 %v4014_v36  ;;  %v4589_v12 = vld [vmem:[%s4393_s13 + $0x44] ss:$8 sps:$4 sm:$0xff]   ;;  %v4052_v13 = vld [vmem:[%s5593_s1 + $0x130] ss:$24 sps:$4 sm:$0xff]   ;;  %s3727_s20 = sshll.u32 %s5601_s24, 4  ;;  %vm2984_vm4 = vcmask 1043456  }
  0x1e   : > { %v4057_v14 = vld [vmem:[%s5593_s1 + $0x164] ss:$24 sps:$4 sm:$0xff]   ;;  %v4075_v16 = vld [vmem:[%s5594_s2 + $0x40] ss:$16 sps:$4 sm:$0xff]   ;;  %v4066_v47 = vld [vmem:[%s5594_s2 + $0x8] ss:$16 sps:$4 sm:$0xff]   ;;  %s5406_s24 = scalar_lea.vmem %s5596_s4, %s3727_s20 }
  0x1f   : > { %723 = vmatpush1.bf16.msra.mxu0 %v3975_v19  ;;  %v317_v15 = vld [vmem:[%s5593_s1 + $0x1c0] sm:$0x33]  ;;  %v4058_v25 = vld [vmem:[%s5593_s1 + $0x190] ss:$24 sps:$4 sm:$0xff]   ;;  %vm2985_vm5 = vcmask 523268   ;;  %vm3071_vm7 = vcmask 523264  }
  0x20   : > { %724 = vmatprep.subr.bf16.mxu0 %v3976_v20  ;;  %824 = vmatpush1.bf16.msra.mxu1 %v4016_v38  ;;  %v4083_v17 = vld [vmem:[%s5594_s2 + $0x64] ss:$16 sps:$4 sm:$0xff]   ;;  %v4055_v19 = vld [vmem:[%s5593_s1 + $0x160] ss:$24 sps:$4 sm:$0xff]   ;;  %v3491_v21 = vcombine.high %v317_v15, %v317_v15  ;;  %v3490_v26 = vcombine.low %v317_v15, %v317_v15  ;;  %vm5408_vm6 = vmor %vm2985_vm5, %vm2984_vm4  ;;  %p241_p4 = scmp.lt.s32.totalorder %s4361_s19, 1 }
  0x21   : > { %825 = vmatprep.subr.bf16.mxu1 %v4020_v41  ;;  %v4060_v20 = vld [vmem:[%s5593_s1 + $0x194] ss:$24 sps:$4 sm:$0xff]   ;;  %v4081_v22 = vld [vmem:[%s5594_s2 + $0x60] ss:$16 sps:$4 sm:$0xff]   ;;  %v4132_v15 = vld [vmem:[%s5594_s2 + $0x168] ss:$16 sps:$4 sm:$0xff]  }
  0x22   : > { %v4089_v23 = vld [vmem:[%s5594_s2 + $0x84] ss:$16 sps:$4 sm:$0xff]   ;;  %v4087_v28 = vld [vmem:[%s5594_s2 + $0x80] ss:$16 sps:$4 sm:$0xff]   ;;  %s5603_s19 = smov (!%p241_p4, %s4361_s19), 1 }
  0x23   : > { %725 = vmatpush1.bf16.msra.mxu0 %v3978_v24  ;;  %v4628_v24 = vld [vmem:[%s4393_s13 + $0x54] ss:$8 sps:$4 sm:$0xff]   ;;  %v4645_v31 = vld [vmem:[%s4393_s13 + $0x50] ss:$8 sps:$4 sm:$0xff]   ;;  %v4660_v36 = vld [vmem:[%s4393_s13 + $0x64] ss:$8 sps:$4 sm:$0xff]  }
  0x24   : > { %726 = vmatprep.subr.bf16.mxu0 %v3979_v27  ;;  %826 = vmatpush1.bf16.msra.mxu1 %v4022_v44  ;;  %v708_v27 = vand.u32 %v3491_v21, %v4459_v30  ;;  %v4095_v29 = vld [vmem:[%s5594_s2 + $0xa4] ss:$16 sps:$4 sm:$0xff]   ;;  %v4105_v38 = vld [vmem:[%s5594_s2 + $0xe0] ss:$16 sps:$4 sm:$0xff]   ;;  %v4150_v21 = vld [vmem:[%s5594_s2 + $0x1c8] ss:$16 sps:$4 sm:$0xff]  }
  0x25   : > { %827 = vmatprep.subr.bf16.mxu1 %v4023_v46  ;;  %v4101_v35 = vld [vmem:[%s5594_s2 + $0xc4] ss:$16 sps:$4 sm:$0xff]   ;;  %v4129_v52 = vld [vmem:[%s5594_s2 + $0x160] ss:$16 sps:$4 sm:$0xff]   ;;  %s3728_s23 = sshll.u32 %s5603_s19, 3 }
  0x26   : > { %v4113_v41 = vld [vmem:[%s5594_s2 + $0x104] ss:$16 sps:$4 sm:$0xff]   ;;  %s245_s27 = scalar_lea.vmem %s5597_s5, %s3728_s23 }
  0x27   : > { %727 = vmatpush1.bf16.msra.mxu0 %v3981_v32  ;;  %v705_v32 = vand.u32 %v3490_v26, %v4459_v30  ;;  %v4099_v30 = vld [vmem:[%s5594_s2 + $0xc0] ss:$16 sps:$4 sm:$0xff]   ;;  %v4119_v44 = vld [vmem:[%s5594_s2 + $0x124] ss:$16 sps:$4 sm:$0xff]  }
  0x28   : > { %728 = vmatprep.subr.bf16.mxu0 %v696_v34  ;;  %828 = vmatpush1.bf16.msra.mxu1 %v4025_v49  ;;  %v4093_v34 = vld [vmem:[%s5594_s2 + $0xa0] ss:$16 sps:$4 sm:$0xff]   ;;  %v4125_v46 = vld [vmem:[%s5594_s2 + $0x144] ss:$16 sps:$4 sm:$0xff]  }
  0x29   : > { %829 = vmatprep.subr.bf16.mxu1 %v4029_v51  ;;  %v4131_v49 = vld [vmem:[%s5594_s2 + $0x164] ss:$16 sps:$4 sm:$0xff]   ;;  %v4080_v51 = vld [vmem:[%s5594_s2 + $0x4c] ss:$16 sps:$4 sm:$0xff]  }
  0x2a   : > { %v4143_v57 = vld [vmem:[%s5594_s2 + $0x1a4] ss:$16 sps:$4 sm:$0xff]  }
  0x2b   : > { %729 = vmatpush1.bf16.msra.mxu0 %v693_v37  ;;  %v4107_v37 = vld [vmem:[%s5594_s2 + $0xe4] ss:$16 sps:$4 sm:$0xff]  }
  0x2c   : > { %916 = vmatprep.subr.bf16.mxu0 %v4036_v39  ;;  %830 = vmatpush1.bf16.msra.mxu1 %v4031_v56  ;;  %v4676_v39 = vld [vmem:[%s4393_s13 + $0x60] ss:$8 sps:$4 sm:$0xff]  }
  0x2d   : > { %831 = vmatprep.subr.bf16.mxu1 %v702_v59  ;;  %v4135_v56 = vld [vmem:[%s5594_s2 + $0x180] ss:$16 sps:$4 sm:$0xff]   ;;  %v4092_v59 = vld [vmem:[%s5594_s2 + $0x8c] ss:$16 sps:$4 sm:$0xff]  }
  0x2e   : > { %743 = vmatmul.mubr.bf16.vlgmr.msra.gmra.mrb[0].mxu0 %v4482_v40 }
  0x2f   : > { %3493 = vmatprep.mubr.msk.bf16.mxu0 %vm666_vm0, %v4488_v42  ;;  %917 = vmatpush1.bf16.msra.mxu0 %v4034_v43  ;;  %v4111_v43 = vld [vmem:[%s5594_s2 + $0x100] ss:$16 sps:$4 sm:$0xff]  }
  0x30   : > { %918 = vmatprep.subr.bf16.mxu0 %v4039_v45  ;;  %832 = vmatpush1.bf16.msra.mxu1 %v699_v61  ;;  %v4117_v45 = vld [vmem:[%s5594_s2 + $0x120] ss:$16 sps:$4 sm:$0xff]   ;;  %v4096_v61 = vld [vmem:[%s5594_s2 + $0xa8] ss:$16 sps:$4 sm:$0xff]  }
  0x31   : > { %2197 = vmatprep.subr.bf16.mxu1 %v4065_v63  ;;  %v4102_v63 = vld [vmem:[%s5594_s2 + $0xc8] ss:$16 sps:$4 sm:$0xff]  }
  0x33   : > { %919 = vmatpush1.bf16.msra.mxu0 %v4037_v48  ;;  %846 = vmatmul.mubr.bf16.vlgmr.msra.gmra.mrb[0].mxu1 %v4482_v40  ;;  %v4123_v48 = vld [vmem:[%s5594_s2 + $0x140] ss:$16 sps:$4 sm:$0xff]  }
  0x34   : > { %920 = vmatprep.subr.bf16.mxu0 %v4042_v50  ;;  %3500 = vmatprep.mubr.msk.bf16.mxu1 %vm666_vm0, %v4488_v42  ;;  %v4072_v50 = vld [vmem:[%s5594_s2 + $0x28] ss:$16 sps:$4 sm:$0xff]  }
  0x35   : > { %2198 = vmatpush1.bf16.msra.mxu1 %v4063_v4  ;;  %v4116_v4 = vld [vmem:[%s5594_s2 + $0x10c] ss:$16 sps:$4 sm:$0xff]  }
  0x36   : > { %753 = vmatmul.mubr.bf16.gmra.mrb[4].mxu0 %v4521_v53  ;;  %2199 = vmatprep.subr.bf16.mxu1 %v4071_v5  ;;  %v4155_v5 = vld [vmem:[%s5594_s2 + $0x1e4] ss:$16 sps:$4 sm:$0xff]  }
  0x37   : > { %3494 = vmatprep.mubr.msk.bf16.mxu0 %vm666_vm0, %v4524_v54  ;;  %921 = vmatpush1.bf16.msra.mxu0 %v4040_v55  ;;  %v4086_v55 = vld [vmem:[%s5594_s2 + $0x6c] ss:$16 sps:$4 sm:$0xff]  }
  0x38   : > { %922 = vmatprep.subr.bf16.mxu0 %v4045_v58  ;;  %v4084_v58 = vld [vmem:[%s5594_s2 + $0x68] ss:$16 sps:$4 sm:$0xff]  }
  0x39   : > { %2200 = vmatpush1.bf16.msra.mxu1 %v4069_v10  ;;  %v4161_v10 = vld [vmem:[%s5594_s2 + $0x204] ss:$16 sps:$4 sm:$0xff]  }
  0x3a   : > { %2201 = vmatprep.subr.bf16.mxu1 %v4077_v11  ;;  %v4120_v11 = vld [vmem:[%s5594_s2 + $0x128] ss:$16 sps:$4 sm:$0xff]  }
  0x3b   : > { %923 = vmatpush1.bf16.msra.mxu0 %v4043_v60  ;;  %856 = vmatmul.mubr.bf16.gmra.mrb[4].mxu1 %v4521_v53  ;;  %v4141_v60 = vld [vmem:[%s5594_s2 + $0x1a0] ss:$16 sps:$4 sm:$0xff]  }
  0x3c   : > { %924 = vmatprep.subr.bf16.mxu0 %v4048_v62  ;;  %3501 = vmatprep.mubr.msk.bf16.mxu1 %vm666_vm0, %v4524_v54  ;;  %v4104_v62 = vld [vmem:[%s5594_s2 + $0xcc] ss:$16 sps:$4 sm:$0xff]  }
  0x3d   : > { %2202 = vmatpush1.bf16.msra.mxu1 %v4075_v16  ;;  %v4140_v16 = vld [vmem:[%s5594_s2 + $0x18c] ss:$16 sps:$4 sm:$0xff]  }
  0x3e   : > { %763 = vmatmul.mubr.bf16.gmra.mrb[8].mxu0 %v4550_v0  ;;  %2203 = vmatprep.subr.bf16.mxu1 %v4083_v17  ;;  %v4138_v17 = vld [vmem:[%s5594_s2 + $0x188] ss:$16 sps:$4 sm:$0xff]  }
  0x3f   : > { %3495 = vmatprep.mubr.msk.bf16.mxu0 %vm666_vm0, %v4553_v1  ;;  %925 = vmatpush1.bf16.msra.mxu0 %v4046_v2  ;;  %v4108_v2 = vld [vmem:[%s5594_s2 + $0xe8] ss:$16 sps:$4 sm:$0xff]  }
  0x40   : > { %926 = vmatprep.subr.bf16.mxu0 %v4051_v3  ;;  %v4147_v3 = vld [vmem:[%s5594_s2 + $0x1c0] ss:$16 sps:$4 sm:$0xff]  }
  0x41   : > { %2204 = vmatpush1.bf16.msra.mxu1 %v4081_v22  ;;  %v4158_v22 = vld [vmem:[%s5594_s2 + $0x1ec] ss:$16 sps:$4 sm:$0xff]  }
  0x42   : > { %2205 = vmatprep.subr.bf16.mxu1 %v4089_v23  ;;  %v4156_v23 = vld [vmem:[%s5594_s2 + $0x1e8] ss:$16 sps:$4 sm:$0xff]  }
  0x43   : > { %927 = vmatpush1.bf16.msra.mxu0 %v4049_v7  ;;  %866 = vmatmul.mubr.bf16.gmra.mrb[8].mxu1 %v4550_v0  ;;  %v4153_v7 = vld [vmem:[%s5594_s2 + $0x1e0] ss:$16 sps:$4 sm:$0xff]  }
  0x44   : > { %928 = vmatprep.subr.bf16.mxu0 %v4054_v8  ;;  %3502 = vmatprep.mubr.msk.bf16.mxu1 %vm666_vm0, %v4553_v1  ;;  %v4122_v8 = vld [vmem:[%s5594_s2 + $0x12c] ss:$16 sps:$4 sm:$0xff]  }
  0x45   : > { %2206 = vmatpush1.bf16.msra.mxu1 %v4087_v28 }
  0x46   : > { %773 = vmatmul.mubr.bf16.gmra.mrb[12].mxu0 %v4572_v6  ;;  %2207 = vmatprep.subr.bf16.mxu1 %v4095_v29 }
  0x47   : > { %3496 = vmatprep.mubr.msk.bf16.mxu0 %vm666_vm0, %v4589_v12  ;;  %929 = vmatpush1.bf16.msra.mxu0 %v4052_v13  ;;  %v4126_v13 = vld [vmem:[%s5594_s2 + $0x148] ss:$16 sps:$4 sm:$0xff]  }
  0x48   : > { %930 = vmatprep.subr.bf16.mxu0 %v4057_v14  ;;  %v4134_v14 = vld [vmem:[%s5594_s2 + $0x16c] ss:$16 sps:$4 sm:$0xff]  }
  0x49   : > { %2208 = vmatpush1.bf16.msra.mxu1 %v4093_v34 }
  0x4a   : > { %2209 = vmatprep.subr.bf16.mxu1 %v4101_v35 }
  0x4b   : > { %931 = vmatpush1.bf16.msra.mxu0 %v4055_v19  ;;  %876 = vmatmul.mubr.bf16.gmra.mrb[12].mxu1 %v4572_v6  ;;  %v4144_v19 = vld [vmem:[%s5594_s2 + $0x1a8] ss:$16 sps:$4 sm:$0xff]  }
  0x4c   : > { %932 = vmatprep.subr.bf16.mxu0 %v4060_v20  ;;  %3503 = vmatprep.mubr.msk.bf16.mxu1 %vm666_vm0, %v4589_v12  ;;  %v4152_v20 = vld [vmem:[%s5594_s2 + $0x1cc] ss:$16 sps:$4 sm:$0xff]  }
  0x4d   : > { %2210 = vmatpush1.bf16.msra.mxu1 %v4099_v30  ;;  %v4162_v30 = vld [vmem:[%s5594_s2 + $0x208] ss:$16 sps:$4 sm:$0xff]  }
  0x4e   : > { %783 = vmatmul.mubr.bf16.gmra.mrb[16].mxu0 %v4611_v18  ;;  %2211 = vmatprep.subr.bf16.mxu1 %v4107_v37  ;;  %v4167_v37 = vld [vmem:[%s5594_s2 + $0x224] ss:$16 sps:$4 sm:$0xff]  }
  0x4f   : > { %3497 = vmatprep.mubr.msk.bf16.mxu0 %vm666_vm0, %v4628_v24  ;;  %933 = vmatpush1.bf16.msra.mxu0 %v4058_v25 }
  0x50   : > { %934 = vmatprep.subr.bf16.mxu0 %v708_v27 }
  0x51   : > { %2212 = vmatpush1.bf16.msra.mxu1 %v4105_v38  ;;  %v4170_v38 = vld [vmem:[%s5594_s2 + $0x22c] ss:$16 sps:$4 sm:$0xff]  }
  0x52   : > { %2213 = vmatprep.subr.bf16.mxu1 %v4113_v41 }
  0x53   : > { %935 = vmatpush1.bf16.msra.mxu0 %v705_v32  ;;  %886 = vmatmul.mubr.bf16.gmra.mrb[16].mxu1 %v4611_v18 }
  0x54   : > { %2506 = vmatprep.subr.bf16.mxu0 %v4068_v33  ;;  %3504 = vmatprep.mubr.msk.bf16.mxu1 %vm666_vm0, %v4628_v24 }
  0x55   : > { %2214 = vmatpush1.bf16.msra.mxu1 %v4111_v43 }
  0x56   : > { %793 = vmatmul.mubr.bf16.gmra.mrb[20].mxu0 %v4645_v31  ;;  %2215 = vmatprep.subr.bf16.mxu1 %v4119_v44  ;;  %v4165_v44 = vld [vmem:[%s5594_s2 + $0x220] ss:$16 sps:$4 sm:$0xff]  }
  0x57   : > { %3498 = vmatprep.mubr.msk.bf16.mxu0 %vm666_vm0, %v4660_v36 }
  0x59   : > { %2216 = vmatpush1.bf16.msra.mxu1 %v4117_v45  ;;  %v4168_v45 = vld [vmem:[%s5594_s2 + $0x228] ss:$16 sps:$4 sm:$0xff]  }
  0x5a   : > { %2217 = vmatprep.subr.bf16.mxu1 %v4125_v46 }
  0x5b   : > { %896 = vmatmul.mubr.bf16.gmra.mrb[20].mxu1 %v4645_v31 }
  0x5c   : > { %3505 = vmatprep.mubr.msk.bf16.mxu1 %vm666_vm0, %v4660_v36 }
  0x5d   : > { %2218 = vmatpush1.bf16.msra.mxu1 %v4123_v48 }
  0x5e   : > { %803 = vmatmul.mubr.bf16.gmra.mrb[24].mxu0 %v4676_v39  ;;  %2219 = vmatprep.subr.bf16.mxu1 %v4131_v49  ;;  %v4173_v49 = vld [vmem:[%s5594_s2 + $0x244] ss:$16 sps:$4 sm:$0xff]  }
  0x5f   : > { %3506 = vmatprep.mubr.msk.bf16.mxu0 %vm666_vm0, %v4402_v9  ;;  %v4074_v9 = vld [vmem:[%s5594_s2 + $0x2c] ss:$16 sps:$4 sm:$0xff]  }
  0x61   : > { %2220 = vmatpush1.bf16.msra.mxu1 %v4129_v52 }
  0x63   : > { %906 = vmatmul.mubr.bf16.gmra.mrb[24].mxu1 %v4676_v39 }
  0x66   : > { %949 = vmatmul.mubr.bf16.vlgmr.msra.gmra.mrb[28].mxu0 %v4482_v40  ;;  %v4137_v40 = vld [vmem:[%s5594_s2 + $0x184] ss:$16 sps:$4 sm:$0xff]  }
  0x67   : > { %3507 = vmatprep.mubr.msk.bf16.mxu0 %vm666_vm0, %v4488_v42  ;;  %2507 = vmatpush1.bf16.msra.mxu0 %v4066_v47  ;;  %v4078_v42 = vld [vmem:[%s5594_s2 + $0x48] ss:$16 sps:$4 sm:$0xff]  }
  0x68   : > { %2508 = vmatprep.subr.bf16.mxu0 %v4074_v9  ;;  %2221 = vmatprep.subr.bf16.mxu1 %v4137_v40 }
  0x69   : > { %2222 = vmatpush1.bf16.msra.mxu1 %v4135_v56  ;;  %v4179_v56 = vld [vmem:[%s5594_s2 + $0x264] ss:$16 sps:$4 sm:$0xff]  }
  0x6a   : > { %2223 = vmatprep.subr.bf16.mxu1 %v4143_v57  ;;  %v4182_v57 = vld [vmem:[%s5594_s2 + $0x26c] ss:$16 sps:$4 sm:$0xff]  }
  0x6b   : > { %2509 = vmatpush1.bf16.msra.mxu0 %v4072_v50  ;;  %v4176_v50 = vld [vmem:[%s5594_s2 + $0x24c] ss:$16 sps:$4 sm:$0xff]  }
  0x6c   : > { %2510 = vmatprep.subr.bf16.mxu0 %v4080_v51 }
  0x6d   : > { %2224 = vmatpush1.bf16.msra.mxu1 %v4141_v60 }
  0x6e   : > { %959 = vmatmul.mubr.bf16.gmra.mrb[32].mxu0 %v4521_v53  ;;  %v4090_v53 = vld [vmem:[%s5594_s2 + $0x88] ss:$16 sps:$4 sm:$0xff]  }
  0x6f   : > { %3508 = vmatprep.mubr.msk.bf16.mxu0 %vm666_vm0, %v4524_v54  ;;  %2511 = vmatpush1.bf16.msra.mxu0 %v4078_v42  ;;  %v4098_v54 = vld [vmem:[%s5594_s2 + $0xac] ss:$16 sps:$4 sm:$0xff]   ;;  %v4171_v42 = vld [vmem:[%s5594_s2 + $0x240] ss:$16 sps:$4 sm:$0xff]  }
  0x70   : > { %2512 = vmatprep.subr.bf16.mxu0 %v4086_v55  ;;  %v4174_v55 = vld [vmem:[%s5594_s2 + $0x248] ss:$16 sps:$4 sm:$0xff]  }
  0x73   : > { %2513 = vmatpush1.bf16.msra.mxu0 %v4084_v58 }
  0x74   : > { %2514 = vmatprep.subr.bf16.mxu0 %v4092_v59  ;;  %v4177_v59 = vld [vmem:[%s5594_s2 + $0x260] ss:$16 sps:$4 sm:$0xff]  }
  0x76   : > { %969 = vmatmul.mubr.bf16.gmra.mrb[36].mxu0 %v4550_v0  ;;  %v4110_v0 = vld [vmem:[%s5594_s2 + $0xec] ss:$16 sps:$4 sm:$0xff]  }
  0x77   : > { %3509 = vmatprep.mubr.msk.bf16.mxu0 %vm666_vm0, %v4553_v1  ;;  %2515 = vmatpush1.bf16.msra.mxu0 %v4090_v53  ;;  %v4149_v1 = vld [vmem:[%s5594_s2 + $0x1c4] ss:$16 sps:$4 sm:$0xff]   ;;  %v4180_v53 = vld [vmem:[%s5594_s2 + $0x268] ss:$16 sps:$4 sm:$0xff]  }
  0x78   : > { %2516 = vmatprep.subr.bf16.mxu0 %v4098_v54  ;;  %2225 = vmatprep.subr.bf16.mxu1 %v4149_v1 }
  0x79   : > { %2226 = vmatpush1.bf16.msra.mxu1 %v4147_v3 }
  0x7a   : > { %2227 = vmatprep.subr.bf16.mxu1 %v4155_v5  ;;  %v4188_v5 = vld [vmem:[%s5594_s2 + $0x28c] ss:$16 sps:$4 sm:$0xff]  }
  0x7b   : > { %2517 = vmatpush1.bf16.msra.mxu0 %v4096_v61 }
  0x7c   : > { %2518 = vmatprep.subr.bf16.mxu0 %v4104_v62 }
  0x7d   : > { %2228 = vmatpush1.bf16.msra.mxu1 %v4153_v7 }
  0x7e   : > { %979 = vmatmul.mubr.bf16.gmra.mrb[40].mxu0 %v4572_v6  ;;  %v4114_v6 = vld [vmem:[%s5594_s2 + $0x108] ss:$16 sps:$4 sm:$0xff]   ;;  %2300 = vmatprep.subr.bf16.mxu1 %v4161_v10 }
  0x7f   : > { %3510 = vmatprep.mubr.msk.bf16.mxu0 %vm666_vm0, %v4589_v12  ;;  %2519 = vmatpush1.bf16.msra.mxu0 %v4102_v63  ;;  %v4128_v12 = vld [vmem:[%s5594_s2 + $0x14c] ss:$16 sps:$4 sm:$0xff]  }
  0x80   : > { %2520 = vmatprep.subr.bf16.mxu0 %v4110_v0  ;;  %v4185_v0 = vld [vmem:[%s5594_s2 + $0x284] ss:$16 sps:$4 sm:$0xff]  }
  0x83   : > { %2521 = vmatpush1.bf16.msra.mxu0 %v4108_v2 }
  0x84   : > { %2522 = vmatprep.subr.bf16.mxu0 %v4116_v4 }
  0x86   : > { %989 = vmatmul.mubr.bf16.gmra.mrb[44].mxu0 %v4611_v18  ;;  %v4146_v18 = vld [vmem:[%s5594_s2 + $0x1ac] ss:$16 sps:$4 sm:$0xff]  }
  0x87   : > { %3511 = vmatprep.mubr.msk.bf16.mxu0 %vm666_vm0, %v4628_v24  ;;  %2523 = vmatpush1.bf16.msra.mxu0 %v4114_v6  ;;  %v4164_v24 = vld [vmem:[%s5594_s2 + $0x20c] ss:$16 sps:$4 sm:$0xff]  }
  0x88   : > { %2524 = vmatprep.subr.bf16.mxu0 %v4122_v8 }
  0x8b   : > { %2525 = vmatpush1.bf16.msra.mxu0 %v4120_v11 }
  0x8c   : > { %2526 = vmatprep.subr.bf16.mxu0 %v4128_v12 }
  0x8e   : > { %999 = vmatmul.mubr.bf16.gmra.mrb[48].mxu0 %v4645_v31 }
  0x8f   : > { %3512 = vmatprep.mubr.msk.bf16.mxu0 %vm666_vm0, %v4660_v36  ;;  %2527 = vmatpush1.bf16.msra.mxu0 %v4126_v13  ;;  %v4159_v36 = vld [vmem:[%s5594_s2 + $0x200] ss:$16 sps:$4 sm:$0xff]  }
  0x90   : > { %2528 = vmatprep.subr.bf16.mxu0 %v4134_v14 }
  0x93   : > { %2529 = vmatpush1.bf16.msra.mxu0 %v4132_v15  ;;  %v4183_v15 = vld [vmem:[%s5594_s2 + $0x280] ss:$16 sps:$4 sm:$0xff]  }
  0x94   : > { %2530 = vmatprep.subr.bf16.mxu0 %v4140_v16  ;;  %v4186_v16 = vld [vmem:[%s5594_s2 + $0x288] ss:$16 sps:$4 sm:$0xff]  }
  0x96   : > { %1009 = vmatmul.mubr.bf16.gmra.mrb[52].mxu0 %v4676_v39 }
  0x97   : > { %2531 = vmatpush1.bf16.msra.mxu0 %v4138_v17 }
  0x98   : > { %2532 = vmatprep.subr.bf16.mxu0 %v4146_v18  ;;  %v4191_v18 = vld [vmem:[%s5594_s2 + $0x2a4] ss:$16 sps:$4 sm:$0xff]  }
  0x9b   : > { %2533 = vmatpush1.bf16.msra.mxu0 %v4144_v19  ;;  %v4194_v19 = vld [vmem:[%s5594_s2 + $0x2ac] ss:$16 sps:$4 sm:$0xff]  }
  0x9c   : > { %2534 = vmatprep.subr.bf16.mxu0 %v4152_v20 }
  0x9f   : > { %2535 = vmatpush1.bf16.msra.mxu0 %v4150_v21 }
  0xa0   : > { %2536 = vmatprep.subr.bf16.mxu0 %v4158_v22  ;;  %v4189_v22 = vld [vmem:[%s5594_s2 + $0x2a0] ss:$16 sps:$4 sm:$0xff]  }
  0xa3   : > { %2537 = vmatpush1.bf16.msra.mxu0 %v4156_v23 }
  0xa4   : > { %2609 = vmatprep.subr.bf16.mxu0 %v4164_v24  ;;  %v4192_v24 = vld [vmem:[%s5594_s2 + $0x2a8] ss:$16 sps:$4 sm:$0xff]  }
 0x101   : > { %v744_v25 = vpop.f32.mrb[0].mxu0 }
 0x102   : > { %v746_v26 = vpop.f32.mrb[1].mxu0  ;;  %v1019_v28 = vmax.f32 %v744_v25, 0.0 }
 0x103   : > { %v748_v27 = vpop.f32.mrb[2].mxu0  ;;  %v1020_v32 = vmax.f32 %v746_v26, 0.0 }
 0x104   : > { %v1025_v29 = vmax.f32 %v748_v27, 0.0  ;;  %v750_v31 = vpop.f32.mrb[3].mxu0 }
 0x105   : > { %v1026_v33 = vmax.f32 %v750_v31, 0.0 }
 0x106   : > { %v1103_v34 = vpack.c.bf16 %v1025_v29, %v1019_v28  ;;  %v847_v61 = vpop.f32.mrb[0].mxu1  ;;  %v4197_v29 = vld [vmem:[%s5594_s2 + $0x2c4] ss:$16 sps:$4 sm:$0xff]  }
 0x107   : > { %v1104_v35 = vpack.c.bf16 %v1026_v33, %v1020_v32  ;;  %v1021_v1 = vmax.f32 %v847_v61, 0.0  ;;  %v849_v2 = vpop.f32.mrb[1].mxu1  ;;  %v4212_v61 = vld [vmem:[%s5594_s2 + $0x30c] ss:$16 sps:$4 sm:$0xff]  }
 0x108   : > { %v1022_v6 = vmax.f32 %v849_v2, 0.0  ;;  %v851_v7 = vpop.f32.mrb[2].mxu1 }
 0x109   : > { %2229 = vmatprep.mubr.bf16.mxu1 %v1104_v35  ;;  %2538 = vmatprep.mubr.bf16.mxu0 %v1104_v35  ;;  %v754_v39 = vpop.f32.mrb[4].mxu0  ;;  %v1027_v10 = vmax.f32 %v851_v7, 0.0  ;;  %v853_v11 = vpop.f32.mrb[3].mxu1  ;;  %v4200_v35 = vld [vmem:[%s5594_s2 + $0x2cc] ss:$16 sps:$4 sm:$0xff]  }
 0x10a   : > { %2230 = vmatmul.mubr.bf16.vlgmr.msra.gmra.mrb[28].mxu1 %v1103_v34  ;;  %2539 = vmatmul.mubr.bf16.vlgmr.msra.gmra.mrb[56].mxu0 %v1103_v34  ;;  %v1031_v41 = vmax.f32 %v754_v39, 0.0  ;;  %v756_v43 = vpop.f32.mrb[5].mxu0  ;;  %v1028_v13 = vmax.f32 %v853_v11, 0.0  ;;  %v4210_v7 = vld [vmem:[%s5594_s2 + $0x308] ss:$16 sps:$4 sm:$0xff]  }
 0x10b   : > { %2301 = vmatpush1.bf16.msra.mxu1 %v4159_v36  ;;  %2610 = vmatpush1.bf16.msra.mxu0 %v4162_v30  ;;  %v1032_v46 = vmax.f32 %v756_v43, 0.0  ;;  %v758_v47 = vpop.f32.mrb[6].mxu0  ;;  %v4910_v17 = vpack.c.bf16 %v1027_v10, %v1021_v1  ;;  %v4215_v10 = vld [vmem:[%s5594_s2 + $0x324] ss:$16 sps:$4 sm:$0xff]   ;;  %v4218_v11 = vld [vmem:[%s5594_s2 + $0x32c] ss:$16 sps:$4 sm:$0xff]  }
 0x10c   : > { %2302 = vmatprep.subr.bf16.mxu1 %v4167_v37  ;;  %2611 = vmatprep.subr.bf16.mxu0 %v4170_v38  ;;  %v1037_v9 = vmax.f32 %v758_v47, 0.0  ;;  %v760_v48 = vpop.f32.mrb[7].mxu0  ;;  %v4918_v20 = vpack.c.bf16 %v1028_v13, %v1022_v6  ;;  %v4207_v6 = vld [vmem:[%s5594_s2 + $0x300] ss:$16 sps:$4 sm:$0xff]  }
 0x10d   : > { %v1038_v51 = vmax.f32 %v760_v48, 0.0  ;;  %v4206_v48 = vld [vmem:[%s5594_s2 + $0x2ec] ss:$16 sps:$4 sm:$0xff]  }
 0x10e   : > { %v1109_v52 = vpack.c.bf16 %v1037_v9, %v1031_v41  ;;  %v857_v26 = vpop.f32.mrb[4].mxu1  ;;  %v4203_v9 = vld [vmem:[%s5594_s2 + $0x2e4] ss:$16 sps:$4 sm:$0xff]  }
 0x10f   : > { %2303 = vmatpush1.bf16.msra.mxu1 %v4165_v44  ;;  %2612 = vmatpush1.bf16.msra.mxu0 %v4168_v45  ;;  %v1110_v40 = vpack.c.bf16 %v1038_v51, %v1032_v46  ;;  %v1033_v31 = vmax.f32 %v857_v26, 0.0  ;;  %v859_v32 = vpop.f32.mrb[5].mxu1  ;;  %v4195_v45 = vld [vmem:[%s5594_s2 + $0x2c0] ss:$16 sps:$4 sm:$0xff]   ;;  %v4198_v46 = vld [vmem:[%s5594_s2 + $0x2c8] ss:$16 sps:$4 sm:$0xff]  }
 0x110   : > { %2304 = vmatprep.subr.bf16.mxu1 %v4173_v49  ;;  %2613 = vmatprep.subr.bf16.mxu0 %v4176_v50  ;;  %v1034_v36 = vmax.f32 %v859_v32, 0.0  ;;  %v861_v30 = vpop.f32.mrb[6].mxu1  ;;  %v4201_v51 = vld [vmem:[%s5594_s2 + $0x2e0] ss:$16 sps:$4 sm:$0xff]  }
 0x111   : > { %v764_v58 = vpop.f32.mrb[8].mxu0  ;;  %2239 = vmatprep.mubr.bf16.mxu1 %v1110_v40  ;;  %2548 = vmatprep.mubr.bf16.mxu0 %v1110_v40  ;;  %v1039_v38 = vmax.f32 %v861_v30, 0.0  ;;  %v863_v39 = vpop.f32.mrb[7].mxu1  ;;  %v4204_v40 = vld [vmem:[%s5594_s2 + $0x2e8] ss:$16 sps:$4 sm:$0xff]  }
 0x112   : > { %v1043_v60 = vmax.f32 %v764_v58, 0.0  ;;  %v766_v54 = vpop.f32.mrb[9].mxu0  ;;  %2240 = vmatmul.mubr.bf16.gmra.mrb[32].mxu1 %v1109_v52  ;;  %2549 = vmatmul.mubr.bf16.gmra.mrb[60].mxu0 %v1109_v52  ;;  %v1040_v43 = vmax.f32 %v863_v39, 0.0  ;;  %v4209_v58 = vld [vmem:[%s5594_s2 + $0x304] ss:$16 sps:$4 sm:$0xff]  }
 0x113   : > { %2305 = vmatpush1.bf16.msra.mxu1 %v4171_v42  ;;  %2614 = vmatpush1.bf16.msra.mxu0 %v4174_v55  ;;  %v1044_v62 = vmax.f32 %v766_v54, 0.0  ;;  %v768_v63 = vpop.f32.mrb[10].mxu0  ;;  %v4938_v47 = vpack.c.bf16 %v1039_v38, %v1033_v31  ;;  %v4222_v38 = vld [vmem:[%s5594_s2 + $0x348] ss:$16 sps:$4 sm:$0xff]  }
 0x114   : > { %2306 = vmatprep.subr.bf16.mxu1 %v4179_v56  ;;  %2615 = vmatprep.subr.bf16.mxu0 %v4182_v57  ;;  %v1049_v3 = vmax.f32 %v768_v63, 0.0  ;;  %v770_v4 = vpop.f32.mrb[11].mxu0  ;;  %v4946_v49 = vpack.c.bf16 %v1040_v43, %v1034_v36  ;;  %v4230_v43 = vld [vmem:[%s5594_s2 + $0x36c] ss:$16 sps:$4 sm:$0xff]  }
 0x115   : > { %v1050_v8 = vmax.f32 %v770_v4, 0.0 }
 0x116   : > { %v1115_v12 = vpack.c.bf16 %v1049_v3, %v1043_v60  ;;  %v867_v55 = vpop.f32.mrb[8].mxu1 }
 0x117   : > { %2307 = vmatpush1.bf16.msra.mxu1 %v4177_v59  ;;  %2616 = vmatpush1.bf16.msra.mxu0 %v4180_v53  ;;  %v1116_v14 = vpack.c.bf16 %v1050_v8, %v1044_v62  ;;  %v1045_v59 = vmax.f32 %v867_v55, 0.0  ;;  %v869_v60 = vpop.f32.mrb[9].mxu1 }
 0x118   : > { %2308 = vmatprep.subr.bf16.mxu1 %v4185_v0  ;;  %2617 = vmatprep.subr.bf16.mxu0 %v4188_v5  ;;  %v1046_v62 = vmax.f32 %v869_v60, 0.0  ;;  %v871_v63 = vpop.f32.mrb[10].mxu1 }
 0x119   : > { %v774_v21 = vpop.f32.mrb[12].mxu0  ;;  %2249 = vmatprep.mubr.bf16.mxu1 %v1116_v14  ;;  %2558 = vmatprep.mubr.bf16.mxu0 %v1116_v14  ;;  %v1051_v1 = vmax.f32 %v871_v63, 0.0  ;;  %v873_v2 = vpop.f32.mrb[11].mxu1  ;;  %v4213_v14 = vld [vmem:[%s5594_s2 + $0x320] ss:$16 sps:$4 sm:$0xff]  }
 0x11a   : > { %v1055_v23 = vmax.f32 %v774_v21, 0.0  ;;  %v776_v25 = vpop.f32.mrb[13].mxu0  ;;  %2250 = vmatmul.mubr.bf16.gmra.mrb[36].mxu1 %v1115_v12  ;;  %2559 = vmatmul.mubr.bf16.gmra.mrb[64].mxu0 %v1115_v12  ;;  %v1052_v4 = vmax.f32 %v873_v2, 0.0  ;;  %v4231_v2 = vld [vmem:[%s5594_s2 + $0x380] ss:$16 sps:$4 sm:$0xff]  }
 0x11b   : > { %2309 = vmatpush1.bf16.msra.mxu1 %v4183_v15  ;;  %2618 = vmatpush1.bf16.msra.mxu0 %v4186_v16  ;;  %v1056_v27 = vmax.f32 %v776_v25, 0.0  ;;  %v778_v28 = vpop.f32.mrb[14].mxu0  ;;  %v4966_v8 = vpack.c.bf16 %v1051_v1, %v1045_v59  ;;  %v4216_v16 = vld [vmem:[%s5594_s2 + $0x328] ss:$16 sps:$4 sm:$0xff]   ;;  %v4236_v59 = vld [vmem:[%s5594_s2 + $0x38c] ss:$16 sps:$4 sm:$0xff]  }
 0x11c   : > { %2310 = vmatprep.subr.bf16.mxu1 %v4191_v18  ;;  %2619 = vmatprep.subr.bf16.mxu0 %v4194_v19  ;;  %v1061_v33 = vmax.f32 %v778_v28, 0.0  ;;  %v780_v34 = vpop.f32.mrb[15].mxu0  ;;  %v4974_v12 = vpack.c.bf16 %v1052_v4, %v1046_v62  ;;  %v4224_v28 = vld [vmem:[%s5594_s2 + $0x34c] ss:$16 sps:$4 sm:$0xff]  }
 0x11d   : > { %v1062_v37 = vmax.f32 %v780_v34, 0.0 }
 0x11e   : > { %v1121_v41 = vpack.c.bf16 %v1061_v33, %v1055_v23  ;;  %v877_v19 = vpop.f32.mrb[12].mxu1  ;;  %v4221_v23 = vld [vmem:[%s5594_s2 + $0x344] ss:$16 sps:$4 sm:$0xff]  }
 0x11f   : > { %2311 = vmatpush1.bf16.msra.mxu1 %v4189_v22  ;;  %2620 = vmatpush1.bf16.msra.mxu0 %v4192_v24  ;;  %v1122_v44 = vpack.c.bf16 %v1062_v37, %v1056_v27  ;;  %v1057_v24 = vmax.f32 %v877_v19, 0.0  ;;  %v879_v25 = vpop.f32.mrb[13].mxu1  ;;  %v4219_v37 = vld [vmem:[%s5594_s2 + $0x340] ss:$16 sps:$4 sm:$0xff]  }
 0x120   : > { %2312 = vmatprep.subr.bf16.mxu1 %v4197_v29  ;;  %2621 = vmatprep.subr.bf16.mxu0 %v4200_v35  ;;  %v1058_v29 = vmax.f32 %v879_v25, 0.0  ;;  %v881_v31 = vpop.f32.mrb[14].mxu1 }
 0x121   : > { %v784_v50 = vpop.f32.mrb[16].mxu0  ;;  %2259 = vmatprep.mubr.bf16.mxu1 %v1122_v44  ;;  %2568 = vmatprep.mubr.bf16.mxu0 %v1122_v44  ;;  %v1063_v33 = vmax.f32 %v881_v31, 0.0  ;;  %v883_v34 = vpop.f32.mrb[15].mxu1 }
 0x122   : > { %v1067_v52 = vmax.f32 %v784_v50, 0.0  ;;  %v786_v42 = vpop.f32.mrb[17].mxu0  ;;  %2260 = vmatmul.mubr.bf16.gmra.mrb[40].mxu1 %v1121_v41  ;;  %2569 = vmatmul.mubr.bf16.gmra.mrb[68].mxu0 %v1121_v41  ;;  %v1064_v36 = vmax.f32 %v883_v34, 0.0  ;;  %v4227_v41 = vld [vmem:[%s5594_s2 + $0x364] ss:$16 sps:$4 sm:$0xff]  }
 0x123   : > { %2313 = vmatpush1.bf16.msra.mxu1 %v4195_v45  ;;  %2622 = vmatpush1.bf16.msra.mxu0 %v4198_v46  ;;  %v1068_v56 = vmax.f32 %v786_v42, 0.0  ;;  %v788_v57 = vpop.f32.mrb[18].mxu0  ;;  %v4994_v39 = vpack.c.bf16 %v1063_v33, %v1057_v24  ;;  %v4225_v46 = vld [vmem:[%s5594_s2 + $0x360] ss:$16 sps:$4 sm:$0xff]   ;;  %v4233_v42 = vld [vmem:[%s5594_s2 + $0x384] ss:$16 sps:$4 sm:$0xff]  }
 0x124   : > { %2314 = vmatprep.subr.bf16.mxu1 %v4203_v9  ;;  %2623 = vmatprep.subr.bf16.mxu0 %v4206_v48  ;;  %v1073_v53 = vmax.f32 %v788_v57, 0.0  ;;  %v790_v54 = vpop.f32.mrb[19].mxu0  ;;  %v5002_v44 = vpack.c.bf16 %v1064_v36, %v1058_v29  ;;  %v4228_v48 = vld [vmem:[%s5594_s2 + $0x368] ss:$16 sps:$4 sm:$0xff]   ;;  %v4248_v24 = vld [vmem:[%s5594_s2 + $0x3cc] ss:$16 sps:$4 sm:$0xff]  }
 0x125   : > { %v1074_v0 = vmax.f32 %v790_v54, 0.0  ;;  %v4246_v36 = vld [vmem:[%s5594_s2 + $0x3c8] ss:$16 sps:$4 sm:$0xff]  }
 0x126   : > { %v1127_v3 = vpack.c.bf16 %v1073_v53, %v1067_v52 }
 0x127   : > { %2315 = vmatpush1.bf16.msra.mxu1 %v4201_v51  ;;  %2624 = vmatpush1.bf16.msra.mxu0 %v4204_v40  ;;  %v1128_v5 = vpack.c.bf16 %v1074_v0, %v1068_v56  ;;  %v887_v51 = vpop.f32.mrb[16].mxu1 }
 0x128   : > { %2316 = vmatprep.subr.bf16.mxu1 %v4209_v58  ;;  %2625 = vmatprep.subr.bf16.mxu0 %v4212_v61  ;;  %v1069_v55 = vmax.f32 %v887_v51, 0.0  ;;  %v889_v56 = vpop.f32.mrb[17].mxu1  ;;  %v4257_v51 = vld [vmem:[%s5594_s2 + $0x404] ss:$16 sps:$4 sm:$0xff]  }
 0x129   : > { %v794_v13 = vpop.f32.mrb[20].mxu0  ;;  %2269 = vmatprep.mubr.bf16.mxu1 %v1128_v5  ;;  %2578 = vmatprep.mubr.bf16.mxu0 %v1128_v5  ;;  %v1070_v60 = vmax.f32 %v889_v56, 0.0  ;;  %v891_v53 = vpop.f32.mrb[18].mxu1  ;;  %v4239_v5 = vld [vmem:[%s5594_s2 + $0x3a4] ss:$16 sps:$4 sm:$0xff]  }
 0x12a   : > { %v1079_v15 = vmax.f32 %v794_v13, 0.0  ;;  %v796_v18 = vpop.f32.mrb[21].mxu0  ;;  %2270 = vmatmul.mubr.bf16.gmra.mrb[44].mxu1 %v1127_v3  ;;  %2579 = vmatmul.mubr.bf16.gmra.mrb[72].mxu0 %v1127_v3  ;;  %v1075_v61 = vmax.f32 %v891_v53, 0.0  ;;  %v893_v62 = vpop.f32.mrb[19].mxu1  ;;  %v4234_v3 = vld [vmem:[%s5594_s2 + $0x388] ss:$16 sps:$4 sm:$0xff]  }
 0x12b   : > { %2317 = vmatpush1.bf16.msra.mxu1 %v4207_v6  ;;  %2626 = vmatpush1.bf16.msra.mxu0 %v4210_v7  ;;  %v1080_v21 = vmax.f32 %v796_v18, 0.0  ;;  %v798_v22 = vpop.f32.mrb[22].mxu0  ;;  %v1076_v0 = vmax.f32 %v893_v62, 0.0  ;;  %v4242_v6 = vld [vmem:[%s5594_s2 + $0x3ac] ss:$16 sps:$4 sm:$0xff]  }
 0x12c   : > { %2318 = vmatprep.subr.bf16.mxu1 %v4215_v10  ;;  %2627 = vmatprep.subr.bf16.mxu0 %v4218_v11  ;;  %v1085_v26 = vmax.f32 %v798_v22, 0.0  ;;  %v800_v27 = vpop.f32.mrb[23].mxu0  ;;  %v5022_v4 = vpack.c.bf16 %v1075_v61, %v1069_v55  ;;  %v4237_v10 = vld [vmem:[%s5594_s2 + $0x3a0] ss:$16 sps:$4 sm:$0xff]   ;;  %v4240_v13 = vld [vmem:[%s5594_s2 + $0x3a8] ss:$16 sps:$4 sm:$0xff]  }
 0x12d   : > { %v1086_v32 = vmax.f32 %v800_v27, 0.0  ;;  %v5030_v7 = vpack.c.bf16 %v1076_v0, %v1070_v60  ;;  %v4245_v18 = vld [vmem:[%s5594_s2 + $0x3c4] ss:$16 sps:$4 sm:$0xff]   ;;  %v5078_v56 = vld [vmem:[%s5594_s2 + $0x40c] ss:$16 sps:$4 sm:$0xff]  }
 0x12e   : > { %v1133_v35 = vpack.c.bf16 %v1085_v26, %v1079_v15  ;;  %v4255_v0 = vld [vmem:[%s5594_s2 + $0x400] ss:$16 sps:$4 sm:$0xff]  }
 0x12f   : > { %2319 = vmatpush1.bf16.msra.mxu1 %v4213_v14  ;;  %2628 = vmatpush1.bf16.msra.mxu0 %v4216_v16  ;;  %v1134_v30 = vpack.c.bf16 %v1086_v32, %v1080_v21  ;;  %v897_v14 = vpop.f32.mrb[20].mxu1 }
 0x130   : > { %2320 = vmatprep.subr.bf16.mxu1 %v4221_v23  ;;  %2629 = vmatprep.subr.bf16.mxu0 %v4224_v28  ;;  %v1081_v19 = vmax.f32 %v897_v14, 0.0  ;;  %v899_v21 = vpop.f32.mrb[21].mxu1 }
 0x131   : > { %v804_v45 = vpop.f32.mrb[24].mxu0  ;;  %2279 = vmatprep.mubr.bf16.mxu1 %v1134_v30  ;;  %2588 = vmatprep.mubr.bf16.mxu0 %v1134_v30  ;;  %v1082_v25 = vmax.f32 %v899_v21, 0.0  ;;  %v901_v26 = vpop.f32.mrb[22].mxu1 }
 0x132   : > { %v1091_v9 = vmax.f32 %v804_v45, 0.0  ;;  %v806_v50 = vpop.f32.mrb[25].mxu0  ;;  %2280 = vmatmul.mubr.bf16.gmra.mrb[48].mxu1 %v1133_v35  ;;  %2589 = vmatmul.mubr.bf16.gmra.mrb[76].mxu0 %v1133_v35  ;;  %v1087_v29 = vmax.f32 %v901_v26, 0.0  ;;  %v903_v31 = vpop.f32.mrb[23].mxu1  ;;  %v4243_v35 = vld [vmem:[%s5594_s2 + $0x3c0] ss:$16 sps:$4 sm:$0xff]  }
 0x133   : > { %2321 = vmatpush1.bf16.msra.mxu1 %v4219_v37  ;;  %2630 = vmatpush1.bf16.msra.mxu0 %v4222_v38  ;;  %v1092_v52 = vmax.f32 %v806_v50, 0.0  ;;  %v808_v40 = vpop.f32.mrb[26].mxu0  ;;  %v1088_v33 = vmax.f32 %v903_v31, 0.0  ;;  %v4254_v38 = vld [vmem:[%s5594_s2 + $0x3ec] ss:$16 sps:$4 sm:$0xff]  }
 0x134   : > { %2322 = vmatprep.subr.bf16.mxu1 %v4227_v41  ;;  %2631 = vmatprep.subr.bf16.mxu0 %v4230_v43  ;;  %v1097_v57 = vmax.f32 %v808_v40, 0.0  ;;  %v810_v58 = vpop.f32.mrb[27].mxu0  ;;  %v5054_v30 = vpack.c.bf16 %v1087_v29, %v1081_v19  ;;  %v4249_v43 = vld [vmem:[%s5594_s2 + $0x3e0] ss:$16 sps:$4 sm:$0xff]   ;;  %v4269_v26 = vld [vmem:[%s5594_s2 + $0x464] ss:$16 sps:$4 sm:$0xff]  }
 0x135   : > { %v1098_v54 = vmax.f32 %v810_v58, 0.0  ;;  %v5064_v41 = vpack.c.bf16 %v1088_v33, %v1082_v25  ;;  %v5143_v29 = vld [vmem:[%s5594_s2 + $0x448] ss:$16 sps:$4 sm:$0xff]   ;;  %v4267_v33 = vld [vmem:[%s5594_s2 + $0x460] ss:$16 sps:$4 sm:$0xff]  }
 0x136   : > { %v1139_v63 = vpack.c.bf16 %v1097_v57, %v1091_v9  ;;  %v907_v9 = vpop.f32.mrb[24].mxu1 }
 0x137   : > { %2323 = vmatpush1.bf16.msra.mxu1 %v4225_v46  ;;  %2632 = vmatpush1.bf16.msra.mxu0 %v4228_v48  ;;  %v1140_v1 = vpack.c.bf16 %v1098_v54, %v1092_v52  ;;  %v4252_v46 = vld [vmem:[%s5594_s2 + $0x3e8] ss:$16 sps:$4 sm:$0xff]   ;;  %v1093_v52 = vmax.f32 %v907_v9, 0.0  ;;  %v909_v40 = vpop.f32.mrb[25].mxu1 }
 0x138   : > { %2324 = vmatprep.subr.bf16.mxu1 %v4233_v42  ;;  %2633 = vmatprep.subr.bf16.mxu0 %v4236_v59  ;;  %v1094_v57 = vmax.f32 %v909_v40, 0.0  ;;  %v911_v58 = vpop.f32.mrb[26].mxu1 }
 0x139   : > { %2289 = vmatprep.mubr.bf16.mxu1 %v1140_v1  ;;  %2598 = vmatprep.mubr.bf16.mxu0 %v1140_v1  ;;  %v950_v11 = vpop.f32.mrb[28].mxu0  ;;  %v1099_v53 = vmax.f32 %v911_v58, 0.0  ;;  %v913_v54 = vpop.f32.mrb[27].mxu1  ;;  %v4279_v58 = vld [vmem:[%s5594_s2 + $0x4a0] ss:$16 sps:$4 sm:$0xff]  }
 0x13a   : > { %2290 = vmatmul.mubr.bf16.gmra.mrb[52].mxu1 %v1139_v63  ;;  %2599 = vmatmul.mubr.bf16.gmra.mrb[80].mxu0 %v1139_v63  ;;  %v1023_v15 = vmax.f32 %v950_v11, 0.0  ;;  %v952_v16 = vpop.f32.mrb[29].mxu0  ;;  %v1100_v62 = vmax.f32 %v913_v54, 0.0  ;;  %v5105_v11 = vld [vmem:[%s5594_s2 + $0x42c] ss:$16 sps:$4 sm:$0xff]  }
 0x13b   : > { %2325 = vmatpush1.bf16.msra.mxu1 %v4231_v2  ;;  %2634 = vmatpush1.bf16.msra.mxu0 %v4234_v3  ;;  %v1024_v22 = vmax.f32 %v952_v16, 0.0  ;;  %v954_v23 = vpop.f32.mrb[30].mxu0  ;;  %v5085_v1 = vpack.c.bf16 %v1099_v53, %v1093_v52  ;;  %v4260_v3 = vld [vmem:[%s5594_s2 + $0x424] ss:$16 sps:$4 sm:$0xff]   ;;  %v5201_v53 = vld [vmem:[%s5594_s2 + $0x4ac] ss:$16 sps:$4 sm:$0xff]  }
 0x13c   : > { %2326 = vmatprep.subr.bf16.mxu1 %v4239_v5  ;;  %2635 = vmatprep.subr.bf16.mxu0 %v4242_v6  ;;  %v1029_v27 = vmax.f32 %v954_v23, 0.0  ;;  %v956_v28 = vpop.f32.mrb[31].mxu0  ;;  %v5093_v5 = vpack.c.bf16 %v1100_v62, %v1094_v57  ;;  %v5098_v6 = vld [vmem:[%s5594_s2 + $0x408] ss:$16 sps:$4 sm:$0xff]  }
 0x13d   : > { %2332 = vmatprep.mubr.bf16.mxu1 %v4918_v20  ;;  %2641 = vmatprep.mubr.bf16.mxu0 %v4918_v20  ;;  %v1030_v32 = vmax.f32 %v956_v28, 0.0  ;;  %v4251_v20 = vld [vmem:[%s5594_s2 + $0x3e4] ss:$16 sps:$4 sm:$0xff]  }
 0x13e   : > { %v5046_v34 = vpack.c.bf16 %v1029_v27, %v1023_v15  ;;  %v4258_v15 = vld [vmem:[%s5594_s2 + $0x420] ss:$16 sps:$4 sm:$0xff]   ;;  %v5136_v27 = vld [vmem:[%s5594_s2 + $0x44c] ss:$16 sps:$4 sm:$0xff]  }
 0x13f   : > { %2327 = vmatpush1.bf16.msra.mxu1 %v4237_v10  ;;  %2636 = vmatpush1.bf16.msra.mxu0 %v4240_v13  ;;  %v5056_v37 = vpack.c.bf16 %v1030_v32, %v1024_v22  ;;  %v5119_v22 = vld [vmem:[%s5594_s2 + $0x428] ss:$16 sps:$4 sm:$0xff]  }
 0x140   : > { %2328 = vmatprep.subr.bf16.mxu1 %v4245_v18  ;;  %2637 = vmatprep.subr.bf16.mxu0 %v4248_v24 }
 0x141   : > { %v960_v45 = vpop.f32.mrb[32].mxu0 }
 0x142   : > { %v1035_v48 = vmax.f32 %v960_v45, 0.0  ;;  %v962_v50 = vpop.f32.mrb[33].mxu0 }
 0x143   : > { %2329 = vmatpush1.bf16.msra.mxu1 %v4243_v35  ;;  %2638 = vmatpush1.bf16.msra.mxu0 %v4246_v36  ;;  %v1036_v42 = vmax.f32 %v962_v50, 0.0  ;;  %v964_v55 = vpop.f32.mrb[34].mxu0  ;;  %v5152_v35 = vld [vmem:[%s5594_s2 + $0x46c] ss:$16 sps:$4 sm:$0xff]   ;;  %v4281_v50 = vld [vmem:[%s5594_s2 + $0x4a4] ss:$16 sps:$4 sm:$0xff]  }
 0x144   : > { %2330 = vmatprep.subr.bf16.mxu1 %v4251_v20  ;;  %2639 = vmatprep.subr.bf16.mxu0 %v4254_v38  ;;  %v1041_v59 = vmax.f32 %v964_v55, 0.0  ;;  %v966_v60 = vpop.f32.mrb[35].mxu0  ;;  %v4275_v20 = vld [vmem:[%s5594_s2 + $0x484] ss:$16 sps:$4 sm:$0xff]  }
 0x145   : > { %v1042_v61 = vmax.f32 %v966_v60, 0.0 }
 0x146   : > { %v5080_v63 = vpack.c.bf16 %v1041_v59, %v1035_v48  ;;  %v5171_v48 = vld [vmem:[%s5594_s2 + $0x468] ss:$16 sps:$4 sm:$0xff]  }
 0x147   : > { %2331 = vmatpush1.bf16.msra.mxu1 %v4249_v43  ;;  %2640 = vmatpush1.bf16.msra.mxu0 %v4252_v46  ;;  %v5087_v2 = vpack.c.bf16 %v1042_v61, %v1036_v42  ;;  %v5192_v59 = vld [vmem:[%s5594_s2 + $0x488] ss:$16 sps:$4 sm:$0xff]  }
 0x148   : > { %2403 = vmatprep.subr.bf16.mxu1 %v4257_v51  ;;  %2712 = vmatprep.subr.bf16.mxu0 %v5078_v56  ;;  %v5179_v51 = vld [vmem:[%s5594_s2 + $0x48c] ss:$16 sps:$4 sm:$0xff]  }
 0x149   : > { %v970_v10 = vpop.f32.mrb[36].mxu0 }
 0x14a   : > { %2333 = vmatmul.mubr.bf16.vlgmr.msra.gmra.mrb[28].mxu1 %v4910_v17  ;;  %2642 = vmatmul.mubr.bf16.vlgmr.msra.gmra.mrb[56].mxu0 %v4910_v17  ;;  %v1047_v13 = vmax.f32 %v970_v10, 0.0  ;;  %v972_v14 = vpop.f32.mrb[37].mxu0  ;;  %v4263_v17 = vld [vmem:[%s5594_s2 + $0x444] ss:$16 sps:$4 sm:$0xff]  }
 0x14b   : > { %2404 = vmatpush1.bf16.msra.mxu1 %v4255_v0  ;;  %2342 = vmatprep.mubr.bf16.mxu1 %v4946_v49  ;;  %v1048_v16 = vmax.f32 %v972_v14, 0.0  ;;  %v974_v18 = vpop.f32.mrb[38].mxu0  ;;  %v4288_v0 = vld [vmem:[%s5594_s2 + $0x4c0] ss:$16 sps:$4 sm:$0xff]   ;;  %v4296_v10 = vld [vmem:[%s5594_s2 + $0x4e4] ss:$16 sps:$4 sm:$0xff]  }
 0x14c   : > { %2651 = vmatprep.mubr.bf16.mxu0 %v4946_v49  ;;  %2405 = vmatprep.subr.bf16.mxu1 %v4260_v3  ;;  %v1053_v19 = vmax.f32 %v974_v18, 0.0  ;;  %v976_v21 = vpop.f32.mrb[39].mxu0  ;;  %v4261_v49 = vld [vmem:[%s5594_s2 + $0x440] ss:$16 sps:$4 sm:$0xff]   ;;  %v5214_v3 = vld [vmem:[%s5594_s2 + $0x4a8] ss:$16 sps:$4 sm:$0xff]  }
 0x14d   : > { %2713 = vmatpush1.bf16.msra.mxu0 %v5098_v6  ;;  %v1054_v23 = vmax.f32 %v976_v21, 0.0  ;;  %v5236_v21 = vld [vmem:[%s5594_s2 + $0x4c8] ss:$16 sps:$4 sm:$0xff]  }
 0x14e   : > { %2714 = vmatprep.subr.bf16.mxu0 %v5105_v11  ;;  %v5122_v24 = vpack.c.bf16 %v1053_v19, %v1047_v13  ;;  %v5223_v13 = vld [vmem:[%s5594_s2 + $0x4cc] ss:$16 sps:$4 sm:$0xff]   ;;  %v4294_v19 = vld [vmem:[%s5594_s2 + $0x4e0] ss:$16 sps:$4 sm:$0xff]  }
 0x14f   : > { %2406 = vmatpush1.bf16.msra.mxu1 %v4258_v15  ;;  %v5127_v25 = vpack.c.bf16 %v1054_v23, %v1048_v16 }
 0x150   : > { %2407 = vmatprep.subr.bf16.mxu1 %v4263_v17 }
 0x151   : > { %2715 = vmatpush1.bf16.msra.mxu0 %v5119_v22  ;;  %v980_v28 = vpop.f32.mrb[40].mxu0 }
 0x152   : > { %2343 = vmatmul.mubr.bf16.gmra.mrb[32].mxu1 %v4938_v47  ;;  %2652 = vmatmul.mubr.bf16.gmra.mrb[60].mxu0 %v4938_v47  ;;  %v1059_v31 = vmax.f32 %v980_v28, 0.0  ;;  %v982_v32 = vpop.f32.mrb[41].mxu0 }
 0x153   : > { %2352 = vmatprep.mubr.bf16.mxu1 %v4974_v12  ;;  %2408 = vmatpush1.bf16.msra.mxu1 %v4261_v49  ;;  %v1060_v47 = vmax.f32 %v982_v32, 0.0  ;;  %v984_v36 = vpop.f32.mrb[42].mxu0  ;;  %v4305_v49 = vld [vmem:[%s5594_s2 + $0x504] ss:$16 sps:$4 sm:$0xff]   ;;  %v5255_v32 = vld [vmem:[%s5594_s2 + $0x4e8] ss:$16 sps:$4 sm:$0xff]  }
 0x154   : > { %2661 = vmatprep.mubr.bf16.mxu0 %v4974_v12  ;;  %2409 = vmatprep.subr.bf16.mxu1 %v4269_v26  ;;  %v1065_v38 = vmax.f32 %v984_v36, 0.0  ;;  %v986_v43 = vpop.f32.mrb[43].mxu0  ;;  %v4273_v12 = vld [vmem:[%s5594_s2 + $0x480] ss:$16 sps:$4 sm:$0xff]   ;;  %v4311_v36 = vld [vmem:[%s5594_s2 + $0x524] ss:$16 sps:$4 sm:$0xff]  }
 0x155   : > { %2716 = vmatprep.subr.bf16.mxu0 %v5136_v27  ;;  %v1066_v45 = vmax.f32 %v986_v43, 0.0 }
 0x156   : > { %2717 = vmatpush1.bf16.msra.mxu0 %v5143_v29  ;;  %v5160_v46 = vpack.c.bf16 %v1065_v38, %v1059_v31 }
 0x157   : > { %2410 = vmatpush1.bf16.msra.mxu1 %v4267_v33  ;;  %2718 = vmatprep.subr.bf16.mxu0 %v5152_v35  ;;  %v5163_v9 = vpack.c.bf16 %v1066_v45, %v1060_v47  ;;  %v4303_v33 = vld [vmem:[%s5594_s2 + $0x500] ss:$16 sps:$4 sm:$0xff]   ;;  %v5264_v47 = vld [vmem:[%s5594_s2 + $0x50c] ss:$16 sps:$4 sm:$0xff]  }
 0x158   : > { %2411 = vmatprep.subr.bf16.mxu1 %v4275_v20 }
 0x159   : > { %v990_v52 = vpop.f32.mrb[44].mxu0 }
 0x15a   : > { %2353 = vmatmul.mubr.bf16.gmra.mrb[36].mxu1 %v4966_v8  ;;  %2662 = vmatmul.mubr.bf16.gmra.mrb[64].mxu0 %v4966_v8  ;;  %v1071_v40 = vmax.f32 %v990_v52, 0.0  ;;  %v992_v42 = vpop.f32.mrb[45].mxu0  ;;  %v4309_v52 = vld [vmem:[%s5594_s2 + $0x520] ss:$16 sps:$4 sm:$0xff]  }
 0x15b   : > { %2362 = vmatprep.mubr.bf16.mxu1 %v5002_v44  ;;  %2671 = vmatprep.mubr.bf16.mxu0 %v5002_v44  ;;  %v1072_v55 = vmax.f32 %v992_v42, 0.0  ;;  %v994_v57 = vpop.f32.mrb[46].mxu0  ;;  %v4290_v44 = vld [vmem:[%s5594_s2 + $0x4c4] ss:$16 sps:$4 sm:$0xff]  }
 0x15c   : > { %2412 = vmatpush1.bf16.msra.mxu1 %v4273_v12  ;;  %2719 = vmatpush1.bf16.msra.mxu0 %v5171_v48  ;;  %v1077_v8 = vmax.f32 %v994_v57, 0.0  ;;  %v996_v60 = vpop.f32.mrb[47].mxu0 }
 0x15d   : > { %2413 = vmatprep.subr.bf16.mxu1 %v4281_v50  ;;  %2720 = vmatprep.subr.bf16.mxu0 %v5179_v51  ;;  %v1078_v54 = vmax.f32 %v996_v60, 0.0  ;;  %v4306_v50 = vld [vmem:[%s5594_s2 + $0x508] ss:$16 sps:$4 sm:$0xff]  }
 0x15e   : > { %v5203_v61 = vpack.c.bf16 %v1077_v8, %v1071_v40 }
 0x15f   : > { %v5205_v62 = vpack.c.bf16 %v1078_v54, %v1072_v55 }
 0x160   : > { %2414 = vmatpush1.bf16.msra.mxu1 %v4279_v58  ;;  %2721 = vmatpush1.bf16.msra.mxu0 %v5192_v59  ;;  %v4312_v58 = vld [vmem:[%s5594_s2 + $0x528] ss:$16 sps:$4 sm:$0xff]  }
 0x161   : > { %2415 = vmatprep.subr.bf16.mxu1 %v4290_v44  ;;  %2722 = vmatprep.subr.bf16.mxu0 %v5201_v53  ;;  %v1000_v14 = vpop.f32.mrb[48].mxu0 }
 0x162   : > { %2363 = vmatmul.mubr.bf16.gmra.mrb[40].mxu1 %v4994_v39  ;;  %2672 = vmatmul.mubr.bf16.gmra.mrb[68].mxu0 %v4994_v39  ;;  %v1083_v15 = vmax.f32 %v1000_v14, 0.0  ;;  %v1002_v16 = vpop.f32.mrb[49].mxu0 }
 0x163   : > { %2372 = vmatprep.mubr.bf16.mxu1 %v5030_v7  ;;  %2681 = vmatprep.mubr.bf16.mxu0 %v5030_v7  ;;  %v1084_v18 = vmax.f32 %v1002_v16, 0.0  ;;  %v1004_v17 = vpop.f32.mrb[50].mxu0  ;;  %v5242_v7 = vld [vmem:[%s5594_s2 + $0x4ec] ss:$16 sps:$4 sm:$0xff]  }
 0x164   : > { %2416 = vmatpush1.bf16.msra.mxu1 %v4288_v0  ;;  %2723 = vmatpush1.bf16.msra.mxu0 %v5214_v3  ;;  %v1089_v39 = vmax.f32 %v1004_v17, 0.0  ;;  %v1006_v23 = vpop.f32.mrb[51].mxu0 }
 0x165   : > { %2417 = vmatprep.subr.bf16.mxu1 %v4296_v10  ;;  %2724 = vmatprep.subr.bf16.mxu0 %v5223_v13  ;;  %v1090_v26 = vmax.f32 %v1006_v23, 0.0 }
 0x166   : > { %v5247_v28 = vpack.c.bf16 %v1089_v39, %v1083_v15 }
 0x167   : > { %v5249_v31 = vpack.c.bf16 %v1090_v26, %v1084_v18 }
 0x168   : > { %2418 = vmatpush1.bf16.msra.mxu1 %v4294_v19  ;;  %2725 = vmatpush1.bf16.msra.mxu0 %v5236_v21 }
 0x169   : > { %2726 = vmatprep.subr.bf16.mxu0 %v5242_v7  ;;  %2419 = vmatprep.subr.bf16.mxu1 %v4305_v49  ;;  %v1010_v20 = vpop.f32.mrb[52].mxu0 }
 0x16a   : > { %2373 = vmatmul.mubr.bf16.gmra.mrb[44].mxu1 %v5022_v4  ;;  %2682 = vmatmul.mubr.bf16.gmra.mrb[72].mxu0 %v5022_v4  ;;  %v1095_v38 = vmax.f32 %v1010_v20, 0.0  ;;  %v1012_v43 = vpop.f32.mrb[53].mxu0 }
 0x16b   : > { %2382 = vmatprep.mubr.bf16.mxu1 %v5064_v41  ;;  %2691 = vmatprep.mubr.bf16.mxu0 %v5064_v41  ;;  %v1096_v45 = vmax.f32 %v1012_v43, 0.0  ;;  %v1014_v12 = vpop.f32.mrb[54].mxu0  ;;  %v4314_v41 = vld [vmem:[%s5594_s2 + $0x52c] ss:$16 sps:$4 sm:$0xff]  }
 0x16c   : > { %2727 = vmatpush1.bf16.msra.mxu0 %v5255_v32  ;;  %2420 = vmatpush1.bf16.msra.mxu1 %v4303_v33  ;;  %v1101_v4 = vmax.f32 %v1014_v12, 0.0  ;;  %v1016_v40 = vpop.f32.mrb[55].mxu0 }
 0x16d   : > { %2728 = vmatprep.subr.bf16.mxu0 %v5264_v47  ;;  %2421 = vmatprep.subr.bf16.mxu1 %v4311_v36  ;;  %v1102_v42 = vmax.f32 %v1016_v40, 0.0 }
 0x16e   : > { %v1143_v55 = vpack.c.bf16 %v1101_v4, %v1095_v38 }
 0x16f   : > { %v1144_v57 = vpack.c.bf16 %v1102_v42, %v1096_v45 }
 0x170   : > { %2729 = vmatpush1.bf16.msra.mxu0 %v4306_v50  ;;  %2422 = vmatpush1.bf16.msra.mxu1 %v4309_v52 }
 0x171   : > { %2730 = vmatprep.subr.bf16.mxu0 %v4314_v41  ;;  %3757 = vmatprep.subr.bf16.mxu1 %v5078_v56 }
 0x172   : > { %2383 = vmatmul.mubr.bf16.gmra.mrb[48].mxu1 %v5054_v30  ;;  %2692 = vmatmul.mubr.bf16.gmra.mrb[76].mxu0 %v5054_v30 }
 0x173   : > { %2392 = vmatprep.mubr.bf16.mxu1 %v5093_v5  ;;  %2701 = vmatprep.mubr.bf16.mxu0 %v5093_v5  ;;  %v1313_v5 = vld [vmem:[%s5595_s3] sm:$0xf] }
 0x174   : > { %2731 = vmatpush1.bf16.msra.mxu0 %v4312_v58 }
 0x17a   : > { %2393 = vmatmul.mubr.bf16.gmra.mrb[52].mxu1 %v5085_v1  ;;  %2702 = vmatmul.mubr.bf16.gmra.mrb[80].mxu0 %v5085_v1 }
 0x17b   : > { %3681 = vmatprep.mubr.msk.bf16.mxu1 %vm2175_vm3, %v5056_v37  ;;  %3688 = vmatprep.mubr.msk.bf16.mxu0 %vm2175_vm3, %v5056_v37 }
 0x182   : > { %2436 = vmatmul.mubr.bf16.vlgmr.msra.gmra.mrb[28].mxu1 %v5046_v34  ;;  %2745 = vmatmul.mubr.bf16.vlgmr.msra.gmra.mrb[56].mxu0 %v5046_v34  ;;  %v1315_v34 = vlaneseq }
 0x183   : > { %3767 = vmatpush1.bf16.msra.mxu1 %v5098_v6  ;;  %3682 = vmatprep.mubr.msk.bf16.mxu1 %vm2175_vm3, %v5087_v2 }
 0x184   : > { %3689 = vmatprep.mubr.msk.bf16.mxu0 %vm2175_vm3, %v5087_v2  ;;  %3758 = vmatprep.subr.bf16.mxu1 %v5105_v11  ;;  %v5349_v30 = vshrl.u32 %v1315_v34, 7  ;;  %vm3136_vm8 = vcmp.lt.s32.totalorder %v1315_v34, 448 }
 0x186   : > { %v1325_v1 = vsub.s32 2, %v5349_v30  ;;  %v1329_v6 = vsub.s32 3, %v5349_v30  ;;  %v1317_v60 = vsub.s32 0, %v5349_v30  ;;  %v1321_v54 = vsub.s32 1, %v5349_v30 }
 0x187   : > { %3768 = vmatpush1.bf16.msra.mxu1 %v5119_v22 }
 0x188   : > { %3759 = vmatprep.subr.bf16.mxu1 %v5136_v27  ;;  %v5364_v11 = vrot.slane %v1313_v5, %v1325_v1  ;;  %v5366_v22 = vrot.slane %v1313_v5, %v1329_v6  ;;  %v5396_v10 = vrot.slane %v1313_v5, %v1321_v54 }
 0x18a   : > { %2446 = vmatmul.mubr.bf16.gmra.mrb[32].mxu1 %v5080_v63  ;;  %2755 = vmatmul.mubr.bf16.gmra.mrb[60].mxu0 %v5080_v63 }
 0x18b   : > { %3683 = vmatprep.mubr.msk.bf16.mxu1 %vm2175_vm3, %v5127_v25  ;;  %3769 = vmatpush1.bf16.msra.mxu1 %v5143_v29 }
 0x18c   : > { %3690 = vmatprep.mubr.msk.bf16.mxu0 %vm2175_vm3, %v5127_v25  ;;  %3760 = vmatprep.subr.bf16.mxu1 %v5152_v35 }
 0x18f   : > { %3770 = vmatpush1.bf16.msra.mxu1 %v5171_v48 }
 0x190   : > { %3761 = vmatprep.subr.bf16.mxu1 %v5179_v51 }
 0x192   : > { %2456 = vmatmul.mubr.bf16.gmra.mrb[36].mxu1 %v5122_v24  ;;  %2765 = vmatmul.mubr.bf16.gmra.mrb[64].mxu0 %v5122_v24 }
 0x193   : > { %3684 = vmatprep.mubr.msk.bf16.mxu1 %vm2175_vm3, %v5163_v9  ;;  %3691 = vmatprep.mubr.msk.bf16.mxu0 %vm2175_vm3, %v5163_v9 }
 0x194   : > { %3771 = vmatpush1.bf16.msra.mxu1 %v5192_v59 }
 0x195   : > { %3762 = vmatprep.subr.bf16.mxu1 %v5201_v53 }
 0x198   : > { %3772 = vmatpush1.bf16.msra.mxu1 %v5214_v3  ;;  %v5394_v3 = vrot.slane %v1313_v5, %v1317_v60 }
 0x199   : > { %3763 = vmatprep.subr.bf16.mxu1 %v5223_v13 }
 0x19a   : > { %2466 = vmatmul.mubr.bf16.gmra.mrb[40].mxu1 %v5160_v46  ;;  %2775 = vmatmul.mubr.bf16.gmra.mrb[68].mxu0 %v5160_v46 }
 0x19b   : > { %3685 = vmatprep.mubr.msk.bf16.mxu1 %vm2175_vm3, %v5205_v62 }
 0x19c   : > { %3773 = vmatpush1.bf16.msra.mxu1 %v5236_v21 }
 0x19d   : > { %3764 = vmatprep.subr.bf16.mxu1 %v5242_v7 }
 0x1a0   : > { %3774 = vmatpush1.bf16.msra.mxu1 %v5255_v32 }
 0x1a1   : > { %3765 = vmatprep.subr.bf16.mxu1 %v5264_v47 }
 0x1a2   : > { %2476 = vmatmul.mubr.bf16.gmra.mrb[44].mxu1 %v5203_v61 }
 0x1a3   : > { %3686 = vmatprep.mubr.msk.bf16.mxu1 %vm2175_vm3, %v5249_v31 }
 0x1a4   : > { %3775 = vmatpush1.bf16.msra.mxu1 %v4306_v50 }
 0x1a5   : > { %3766 = vmatprep.subr.bf16.mxu1 %v4314_v41 }
 0x1a8   : > { %3776 = vmatpush1.bf16.msra.mxu1 %v4312_v58 }
 0x1aa   : > { %2486 = vmatmul.mubr.bf16.gmra.mrb[48].mxu1 %v5247_v28 }
 0x1ab   : > { %3687 = vmatprep.mubr.msk.bf16.mxu1 %vm2175_vm3, %v1144_v57 }
 0x1b2   : > { %2496 = vmatmul.mubr.bf16.gmra.mrb[52].mxu1 %v1143_v55 }
 0x1b3   : > { %3692 = vmatprep.mubr.msk.bf16.mxu1 %vm2175_vm3, %v5205_v62 }
 0x1ba   : > { %2785 = vmatmul.mubr.bf16.vlgmr.msra.gmra.mrb[56].mxu1 %v5203_v61 }
 0x1bb   : > { %3693 = vmatprep.mubr.msk.bf16.mxu1 %vm2175_vm3, %v5249_v31 }
 0x1c2   : > { %2795 = vmatmul.mubr.bf16.gmra.mrb[60].mxu1 %v5247_v28 }
 0x1c3   : > { %3694 = vmatprep.mubr.msk.bf16.mxu1 %vm2175_vm3, %v1144_v57 }
 0x1ca   : > { %2805 = vmatmul.mubr.bf16.gmra.mrb[64].mxu1 %v1143_v55 }
 0x23d   : > { %v5351_v37 = vpop.f32.mrb[72].mxu0 }
 0x23e   : > { %v5353_v56 = vpop.f32.mrb[73].mxu0 }
 0x23f   : > { %v5355_v63 = vpop.f32.mrb[74].mxu0 }
 0x240   : > { %v5358_v2 = vpop.f32.mrb[75].mxu0 }
 0x245   : > { %v2693_v24 = vpop.f32.mrb[76].mxu0 }
 0x246   : > { %v5369_v25 = vadd.f32 %v2693_v24, %v5364_v11  ;;  %v2695_v27 = vpop.f32.mrb[77].mxu0 }
 0x247   : > { %v5372_v29 = vadd.f32 %v2695_v27, %v5366_v22  ;;  %v2697_v35 = vpop.f32.mrb[78].mxu0 }
 0x248   : > { %v5375_v46 = vadd.f32 %v2697_v35, %v5364_v11  ;;  %v2699_v9 = vpop.f32.mrb[79].mxu0 }
 0x249   : > { %v5378_v48 = vadd.f32 %v2699_v9, %v5366_v22 }
 0x24d   : > { %v2703_v51 = vpop.f32.mrb[80].mxu0 }
 0x24e   : > { %v5381_v59 = vadd.f32 %v2703_v51, %v5364_v11  ;;  %v2705_v8 = vpop.f32.mrb[81].mxu0 }
 0x24f   : > { %v5385_v44 = vadd.f32 %v2705_v8, %v5366_v22  ;;  %v2707_v53 = vpop.f32.mrb[82].mxu0 }
 0x250   : > { %v5389_v61 = vadd.f32 %v2707_v53, %v5364_v11  ;;  %v2709_v62 = vpop.f32.mrb[83].mxu0 }
 0x251   : > { %v5392_v0 = vadd.f32 %v2709_v62, %v5366_v22 }
 0x255   : > { %v2437_v13 = vpop.f32.mrb[28].mxu1  ;;  %v2746_v14 = vpop.f32.mrb[56].mxu0 }
 0x256   : > { %v3777_v15 = vadd.f32 %v2437_v13, %v5394_v3  ;;  %v3805_v16 = vadd.f32 %v2746_v14, %v5364_v11  ;;  %v2439_v18 = vpop.f32.mrb[29].mxu1  ;;  %v2748_v17 = vpop.f32.mrb[57].mxu0 }
 0x257   : > { %v3778_v19 = vadd.f32 %v2439_v18, %v5396_v10  ;;  %v3806_v21 = vadd.f32 %v2748_v17, %v5366_v22  ;;  %v2441_v39 = vpop.f32.mrb[30].mxu1  ;;  %v2750_v23 = vpop.f32.mrb[58].mxu0 }
 0x258   : > { %v3779_v49 = vadd.f32 %v2441_v39, %v5394_v3  ;;  %v3807_v26 = vadd.f32 %v2750_v23, %v5364_v11  ;;  %v2443_v28 = vpop.f32.mrb[31].mxu1  ;;  %v2752_v31 = vpop.f32.mrb[59].mxu0  ;;  %v3139_v32 = vmul.f32 %v3777_v15, %v3777_v15  ;;  %v3141_v45 = vmul.f32 %v3805_v16, %v3805_v16 }
 0x259   : > { %v3729_v33 = vpack.c.bf16 %v3778_v19, %v3777_v15  ;;  %v3730_v47 = vpack.c.bf16 %v3806_v21, %v3805_v16  ;;  %v3142_v36 = vmul.f32 %v3806_v21, %v3806_v21  ;;  %v3780_v50 = vadd.f32 %v2443_v28, %v5396_v10 }
 0x25a   : > { %v3014_v20 = vadd.f32 %v3779_v49, %v3777_v15  ;;  %v3143_v38 = vmul.f32 %v3779_v49, %v3779_v49  ;;  %v3052_v43 = vadd.f32 %v3807_v26, %v3805_v16  ;;  %v3145_v12 = vmul.f32 %v3807_v26, %v3807_v26 }
 0x25b   : > { %2983 = vst [vmem:[%s5406_s24] sm:$0xff] %v3729_v33  ;;  %2987 = vst.msk [vmem:[%s5406_s24 + $0x8] sm:$0xff] %vm5408_vm6, %v3730_v47  ;;  %v3808_v52 = vadd.f32 %v2752_v31, %v5366_v22  ;;  %v3140_v4 = vmul.f32 %v3778_v19, %v3778_v19  ;;  %v3072_v40 = vsel %vm3071_vm7, %v3806_v21, 0.0  ;;  %v3252_v41 = vsel %vm3071_vm7, %v3142_v36, 0.0 }
 0x25c   : > { %v3195_v42 = vadd.f32 %v3143_v38, %v3139_v32  ;;  %v3233_v55 = vadd.f32 %v3145_v12, %v3141_v45  ;;  %v3731_v57 = vpack.c.bf16 %v3780_v50, %v3779_v49  ;;  %v3033_v58 = vadd.f32 %v3780_v50, %v3778_v19 }
 0x25d   : > { %v3144_v1 = vmul.f32 %v3780_v50, %v3780_v50  ;;  %v2447_v5 = vpop.f32.mrb[32].mxu1  ;;  %v2756_v6 = vpop.f32.mrb[60].mxu0  ;;  %v3732_v24 = vpack.c.bf16 %v3808_v52, %v3807_v26  ;;  %v3073_v27 = vsel %vm3071_vm7, %v3808_v52, 0.0  ;;  %v3146_v35 = vmul.f32 %v3808_v52, %v3808_v52 }
 0x25e   : > { %v3781_v9 = vadd.f32 %v2447_v5, %v5394_v3  ;;  %v2449_v51 = vpop.f32.mrb[33].mxu1  ;;  %v2758_v8 = vpop.f32.mrb[61].mxu0  ;;  %2988 = vst [vmem:[%s5406_s24 + $0x10] sm:$0xff] %v3731_v57  ;;  %v3074_v53 = vadd.f32 %v3073_v27, %v3072_v40  ;;  %v3809_v54 = vadd.f32 %v2756_v6, %v5364_v11 }
 0x25f   : > { %v3214_v60 = vadd.f32 %v3144_v1, %v3140_v4  ;;  %v3782_v62 = vadd.f32 %v2449_v51, %v5396_v10  ;;  %v2451_v13 = vpop.f32.mrb[34].mxu1  ;;  %v2760_v14 = vpop.f32.mrb[62].mxu0  ;;  %2989 = vst.msk [vmem:[%s5406_s24 + $0x18] sm:$0xff] %vm5408_vm6, %v3732_v24  ;;  %v3253_v15 = vsel %vm3071_vm7, %v3146_v35, 0.0  ;;  %v3810_v17 = vadd.f32 %v2758_v8, %v5366_v22 }
 0x260   : > { %v3015_v16 = vadd.f32 %v3781_v9, %v3014_v20  ;;  %v3147_v18 = vmul.f32 %v3781_v9, %v3781_v9  ;;  %v2453_v19 = vpop.f32.mrb[35].mxu1  ;;  %v2762_v21 = vpop.f32.mrb[63].mxu0  ;;  %v3254_v39 = vadd.f32 %v3253_v15, %v3252_v41  ;;  %v3053_v23 = vadd.f32 %v3809_v54, %v3052_v43 }
 0x261   : > { %v3149_v49 = vmul.f32 %v3809_v54, %v3809_v54  ;;  %v3733_v26 = vpack.c.bf16 %v3782_v62, %v3781_v9  ;;  %v3034_v31 = vadd.f32 %v3782_v62, %v3033_v58  ;;  %v3148_v32 = vmul.f32 %v3782_v62, %v3782_v62 }
 0x262   : > { %v3196_v28 = vadd.f32 %v3195_v42, %v3147_v18  ;;  %v3734_v33 = vpack.c.bf16 %v3810_v17, %v3809_v54  ;;  %v3075_v36 = vsel %vm3071_vm7, %v3810_v17, 0.0  ;;  %v3150_v38 = vmul.f32 %v3810_v17, %v3810_v17 }
 0x263   : > { %v3234_v47 = vadd.f32 %v3233_v55, %v3149_v49  ;;  %2990 = vst [vmem:[%s5406_s24 + $0x20] sm:$0xff] %v3733_v26  ;;  %v3783_v20 = vadd.f32 %v2451_v13, %v5394_v3  ;;  %v3215_v45 = vadd.f32 %v3214_v60, %v3148_v32  ;;  %v3076_v12 = vadd.f32 %v3075_v36, %v3074_v53 }
 0x264   : > { %2991 = vst.msk [vmem:[%s5406_s24 + $0x28] sm:$0xff] %vm5408_vm6, %v3734_v33  ;;  %v3811_v43 = vadd.f32 %v2760_v14, %v5364_v11  ;;  %v3784_v50 = vadd.f32 %v2453_v19, %v5396_v10  ;;  %v3255_v52 = vsel %vm3071_vm7, %v3150_v38, 0.0  ;;  %v3812_v41 = vadd.f32 %v2762_v21, %v5366_v22 }
 0x265   : > { %v3016_v4 = vadd.f32 %v3783_v20, %v3015_v16  ;;  %v3151_v40 = vmul.f32 %v3783_v20, %v3783_v20  ;;  %v2457_v42 = vpop.f32.mrb[36].mxu1  ;;  %v2766_v55 = vpop.f32.mrb[64].mxu0  ;;  %v3256_v57 = vadd.f32 %v3255_v52, %v3254_v39 }
 0x266   : > { %v3054_v58 = vadd.f32 %v3811_v43, %v3053_v23  ;;  %v3153_v1 = vmul.f32 %v3811_v43, %v3811_v43  ;;  %v3735_v5 = vpack.c.bf16 %v3784_v50, %v3783_v20  ;;  %v2459_v6 = vpop.f32.mrb[37].mxu1  ;;  %v2768_v24 = vpop.f32.mrb[65].mxu0  ;;  %v3035_v35 = vadd.f32 %v3784_v50, %v3034_v31 }
 0x267   : > { %v3197_v27 = vadd.f32 %v3196_v28, %v3151_v40  ;;  %v3152_v9 = vmul.f32 %v3784_v50, %v3784_v50  ;;  %v3736_v51 = vpack.c.bf16 %v3812_v41, %v3811_v43  ;;  %v2461_v8 = vpop.f32.mrb[38].mxu1  ;;  %v2770_v60 = vpop.f32.mrb[66].mxu0  ;;  %v3077_v54 = vsel %vm3071_vm7, %v3812_v41, 0.0 }
 0x268   : > { %v3235_v53 = vadd.f32 %v3234_v47, %v3153_v1  ;;  %2992 = vst [vmem:[%s5406_s24 + $0x30] sm:$0xff] %v3735_v5  ;;  %v3154_v62 = vmul.f32 %v3812_v41, %v3812_v41  ;;  %v3785_v13 = vadd.f32 %v2457_v42, %v5394_v3  ;;  %v2463_v14 = vpop.f32.mrb[39].mxu1  ;;  %v2772_v15 = vpop.f32.mrb[67].mxu0  ;;  %v3078_v18 = vadd.f32 %v3077_v54, %v3076_v12 }
 0x269   : > { %v3216_v16 = vadd.f32 %v3215_v45, %v3152_v9  ;;  %2993 = vst.msk [vmem:[%s5406_s24 + $0x38] sm:$0xff] %vm5408_vm6, %v3736_v51  ;;  %v3813_v17 = vadd.f32 %v2766_v55, %v5364_v11  ;;  %v3786_v19 = vadd.f32 %v2459_v6, %v5396_v10  ;;  %v3814_v49 = vadd.f32 %v2768_v24, %v5366_v22 }
 0x26a   : > { %v3257_v21 = vsel %vm3071_vm7, %v3154_v62, 0.0  ;;  %v3017_v39 = vadd.f32 %v3785_v13, %v3016_v4  ;;  %v3155_v23 = vmul.f32 %v3785_v13, %v3785_v13  ;;  %v3787_v43 = vadd.f32 %v2461_v8, %v5394_v3 }
 0x26b   : > { %v3258_v26 = vadd.f32 %v3257_v21, %v3256_v57  ;;  %v3055_v28 = vadd.f32 %v3813_v17, %v3054_v58  ;;  %v3157_v31 = vmul.f32 %v3813_v17, %v3813_v17  ;;  %v3737_v32 = vpack.c.bf16 %v3786_v19, %v3785_v13 }
 0x26c   : > { %v3198_v33 = vadd.f32 %v3197_v27, %v3155_v23  ;;  %v3036_v47 = vadd.f32 %v3786_v19, %v3035_v35  ;;  %v3156_v36 = vmul.f32 %v3786_v19, %v3786_v19  ;;  %v3738_v38 = vpack.c.bf16 %v3814_v49, %v3813_v17 }
 0x26d   : > { %v3236_v20 = vadd.f32 %v3235_v53, %v3157_v31  ;;  %2994 = vst [vmem:[%s5406_s24 + $0x40] sm:$0xff] %v3737_v32  ;;  %v3079_v45 = vsel %vm3071_vm7, %v3814_v49, 0.0  ;;  %v3158_v12 = vmul.f32 %v3814_v49, %v3814_v49  ;;  %v2467_v50 = vpop.f32.mrb[40].mxu1  ;;  %v2776_v52 = vpop.f32.mrb[68].mxu0  ;;  %v3815_v41 = vadd.f32 %v2770_v60, %v5364_v11 }
 0x26e   : > { %v3217_v4 = vadd.f32 %v3216_v16, %v3156_v36  ;;  %2995 = vst.msk [vmem:[%s5406_s24 + $0x48] sm:$0xff] %vm5408_vm6, %v3738_v38  ;;  %v3080_v40 = vadd.f32 %v3079_v45, %v3078_v18  ;;  %v3788_v42 = vadd.f32 %v2463_v14, %v5396_v10  ;;  %v2469_v55 = vpop.f32.mrb[41].mxu1  ;;  %v2778_v57 = vpop.f32.mrb[69].mxu0  ;;  %v3018_v1 = vadd.f32 %v3787_v43, %v3017_v39 }
 0x26f   : > { %v3259_v58 = vsel %vm3071_vm7, %v3158_v12, 0.0  ;;  %v3159_v5 = vmul.f32 %v3787_v43, %v3787_v43  ;;  %v3816_v6 = vadd.f32 %v2772_v15, %v5366_v22  ;;  %v2471_v24 = vpop.f32.mrb[42].mxu1  ;;  %v2780_v27 = vpop.f32.mrb[70].mxu0  ;;  %v3056_v9 = vadd.f32 %v3815_v41, %v3055_v28 }
 0x270   : > { %v3260_v35 = vadd.f32 %v3259_v58, %v3258_v26  ;;  %v3161_v51 = vmul.f32 %v3815_v41, %v3815_v41  ;;  %v3739_v8 = vpack.c.bf16 %v3788_v42, %v3787_v43  ;;  %v2473_v53 = vpop.f32.mrb[43].mxu1  ;;  %v2782_v60 = vpop.f32.mrb[71].mxu0  ;;  %v3037_v62 = vadd.f32 %v3788_v42, %v3036_v47 }
 0x271   : > { %v3199_v54 = vadd.f32 %v3198_v33, %v3159_v5  ;;  %v3160_v13 = vmul.f32 %v3788_v42, %v3788_v42  ;;  %v3740_v14 = vpack.c.bf16 %v3816_v6, %v3815_v41  ;;  %v3081_v18 = vsel %vm3071_vm7, %v3816_v6, 0.0 }
 0x272   : > { %v3237_v16 = vadd.f32 %v3236_v20, %v3161_v51  ;;  %2996 = vst [vmem:[%s5406_s24 + $0x50] sm:$0xff] %v3739_v8  ;;  %v3162_v17 = vmul.f32 %v3816_v6, %v3816_v6  ;;  %v3789_v15 = vadd.f32 %v2467_v50, %v5394_v3  ;;  %v3082_v21 = vadd.f32 %v3081_v18, %v3080_v40 }
 0x273   : > { %v3218_v19 = vadd.f32 %v3217_v4, %v3160_v13  ;;  %2997 = vst.msk [vmem:[%s5406_s24 + $0x58] sm:$0xff] %vm5408_vm6, %v3740_v14  ;;  %v3817_v39 = vadd.f32 %v2776_v52, %v5364_v11  ;;  %v3790_v23 = vadd.f32 %v2469_v55, %v5396_v10  ;;  %v3818_v31 = vadd.f32 %v2778_v57, %v5366_v22 }
 0x274   : > { %v3261_v49 = vsel %vm3071_vm7, %v3162_v17, 0.0  ;;  %v3019_v26 = vadd.f32 %v3789_v15, %v3018_v1  ;;  %v3163_v28 = vmul.f32 %v3789_v15, %v3789_v15  ;;  %v3791_v41 = vadd.f32 %v2471_v24, %v5394_v3 }
 0x275   : > { %v3262_v32 = vadd.f32 %v3261_v49, %v3260_v35  ;;  %v3057_v33 = vadd.f32 %v3817_v39, %v3056_v9  ;;  %v3165_v47 = vmul.f32 %v3817_v39, %v3817_v39  ;;  %v3741_v36 = vpack.c.bf16 %v3790_v23, %v3789_v15  ;;  %v2477_v38 = vpop.f32.mrb[44].mxu1 }
 0x276   : > { %v3200_v20 = vadd.f32 %v3199_v54, %v3163_v28  ;;  %v3038_v45 = vadd.f32 %v3790_v23, %v3037_v62  ;;  %v3164_v12 = vmul.f32 %v3790_v23, %v3790_v23  ;;  %v3742_v43 = vpack.c.bf16 %v3818_v31, %v3817_v39  ;;  %v2479_v50 = vpop.f32.mrb[45].mxu1 }
 0x277   : > { %v3238_v52 = vadd.f32 %v3237_v16, %v3165_v47  ;;  %2998 = vst [vmem:[%s5406_s24 + $0x60] sm:$0xff] %v3741_v36  ;;  %v3083_v4 = vsel %vm3071_vm7, %v3818_v31, 0.0  ;;  %v3166_v40 = vmul.f32 %v3818_v31, %v3818_v31  ;;  %v2481_v42 = vpop.f32.mrb[46].mxu1  ;;  %v3819_v58 = vadd.f32 %v2780_v27, %v5364_v11 }
 0x278   : > { %v3219_v55 = vadd.f32 %v3218_v19, %v3164_v12  ;;  %2999 = vst.msk [vmem:[%s5406_s24 + $0x68] sm:$0xff] %vm5408_vm6, %v3742_v43  ;;  %v3084_v57 = vadd.f32 %v3083_v4, %v3082_v21  ;;  %v3792_v1 = vadd.f32 %v2473_v53, %v5396_v10  ;;  %v2483_v5 = vpop.f32.mrb[47].mxu1  ;;  %v3020_v35 = vadd.f32 %v3791_v41, %v3019_v26 }
 0x279   : > { %v3263_v6 = vsel %vm3071_vm7, %v3166_v40, 0.0  ;;  %v3167_v9 = vmul.f32 %v3791_v41, %v3791_v41  ;;  %v3820_v51 = vadd.f32 %v2782_v60, %v5366_v22  ;;  %v5482_v8 = vadd.f32 %v3819_v58, %v3057_v33 }
 0x27a   : > { %v3264_v24 = vadd.f32 %v3263_v6, %v3262_v32  ;;  %v3169_v54 = vmul.f32 %v3819_v58, %v3819_v58  ;;  %v3743_v62 = vpack.c.bf16 %v3792_v1, %v3791_v41  ;;  %v3039_v14 = vadd.f32 %v3792_v1, %v3038_v45 }
 0x27b   : > { %v3201_v13 = vadd.f32 %v3200_v20, %v3167_v9  ;;  %v3168_v16 = vmul.f32 %v3792_v1, %v3792_v1  ;;  %v3744_v27 = vpack.c.bf16 %v3820_v51, %v3819_v58  ;;  %v3085_v53 = vsel %vm3071_vm7, %v3820_v51, 0.0 }
 0x27c   : > { %v5484_v18 = vadd.f32 %v3238_v52, %v3169_v54  ;;  %3000 = vst [vmem:[%s5406_s24 + $0x70] sm:$0xff] %v3743_v62  ;;  %v3170_v17 = vmul.f32 %v3820_v51, %v3820_v51  ;;  %v3793_v15 = vadd.f32 %v2477_v38, %v5394_v3  ;;  %v5492_v60 = vadd.f32 %v3085_v53, %v3084_v57 }
 0x27d   : > { %v3220_v19 = vadd.f32 %v3219_v55, %v3168_v16  ;;  %3001 = vst.msk [vmem:[%s5406_s24 + $0x78] sm:$0xff] %vm5408_vm6, %v3744_v27  ;;  %v3794_v21 = vadd.f32 %v2479_v50, %v5396_v10  ;;  %v3795_v39 = vadd.f32 %v2481_v42, %v5394_v3  ;;  %v2487_v23 = vpop.f32.mrb[48].mxu1  ;;  %v3796_v31 = vadd.f32 %v2483_v5, %v5396_v10 }
 0x27e   : > { %v3265_v49 = vsel %vm3071_vm7, %v3170_v17, 0.0  ;;  %v3021_v26 = vadd.f32 %v3793_v15, %v3020_v35  ;;  %v3171_v28 = vmul.f32 %v3793_v15, %v3793_v15  ;;  %v2489_v32 = vpop.f32.mrb[49].mxu1  ;;  %v3797_v42 = vadd.f32 %v2487_v23, %v5394_v3 }
 0x27f   : > { %v5498_v33 = vadd.f32 %v3265_v49, %v3264_v24  ;;  %v3745_v47 = vpack.c.bf16 %v3794_v21, %v3793_v15  ;;  %v3040_v36 = vadd.f32 %v3794_v21, %v3039_v14  ;;  %v3172_v38 = vmul.f32 %v3794_v21, %v3794_v21  ;;  %v2491_v20 = vpop.f32.mrb[50].mxu1 }
 0x280   : > { %v3202_v45 = vadd.f32 %v3201_v13, %v3171_v28  ;;  %v3022_v12 = vadd.f32 %v3795_v39, %v3021_v26  ;;  %v3175_v43 = vmul.f32 %v3795_v39, %v3795_v39  ;;  %v3747_v50 = vpack.c.bf16 %v3796_v31, %v3795_v39  ;;  %v2493_v52 = vpop.f32.mrb[51].mxu1 }
 0x281   : > { %3002 = vst [vmem:[%s5406_s24 + $0x80] sm:$0xff] %v3745_v47  ;;  %v3221_v4 = vadd.f32 %v3220_v19, %v3172_v38  ;;  %v3041_v40 = vadd.f32 %v3796_v31, %v3040_v36  ;;  %v3176_v41 = vmul.f32 %v3796_v31, %v3796_v31  ;;  %v3798_v57 = vadd.f32 %v2489_v32, %v5396_v10 }
 0x282   : > { %v3203_v55 = vadd.f32 %v3202_v45, %v3175_v43  ;;  %3004 = vst [vmem:[%s5406_s24 + $0x90] sm:$0xff] %v3747_v50  ;;  %v3799_v58 = vadd.f32 %v2491_v20, %v5394_v3  ;;  %v3800_v1 = vadd.f32 %v2493_v52, %v5396_v10  ;;  %v3023_v6 = vadd.f32 %v3797_v42, %v3022_v12 }
 0x283   : > { %v3222_v5 = vadd.f32 %v3221_v4, %v3176_v41  ;;  %v3179_v35 = vmul.f32 %v3797_v42, %v3797_v42  ;;  %v3749_v9 = vpack.c.bf16 %v3798_v57, %v3797_v42  ;;  %v3042_v51 = vadd.f32 %v3798_v57, %v3041_v40 }
 0x284   : > { %v3180_v24 = vmul.f32 %v3798_v57, %v3798_v57  ;;  %v3183_v54 = vmul.f32 %v3799_v58, %v3799_v58  ;;  %v3024_v13 = vadd.f32 %v3799_v58, %v3023_v6  ;;  %v3751_v14 = vpack.c.bf16 %v3800_v1, %v3799_v58 }
 0x285   : > { %v3204_v62 = vadd.f32 %v3203_v55, %v3179_v35  ;;  %v3184_v16 = vmul.f32 %v3800_v1, %v3800_v1  ;;  %v2497_v27 = vpop.f32.mrb[52].mxu1  ;;  %3006 = vst [vmem:[%s5406_s24 + $0xa0] sm:$0xff] %v3749_v9  ;;  %v3043_v17 = vadd.f32 %v3800_v1, %v3042_v51  ;;  %v3821_v41 = vadd.f32 %v5351_v37, %v5364_v11 }
 0x286   : > { %v3223_v53 = vadd.f32 %v3222_v5, %v3180_v24  ;;  %v3801_v15 = vadd.f32 %v2497_v27, %v5394_v3  ;;  %v2499_v19 = vpop.f32.mrb[53].mxu1  ;;  %3008 = vst [vmem:[%s5406_s24 + $0xb0] sm:$0xff] %v3751_v14  ;;  %v3823_v55 = vadd.f32 %v5353_v56, %v5366_v22  ;;  %v3825_v1 = vadd.f32 %v5355_v63, %v5364_v11 }
 0x287   : > { %v3205_v21 = vadd.f32 %v3204_v62, %v3183_v54  ;;  %v3802_v39 = vadd.f32 %v2499_v19, %v5396_v10  ;;  %v2501_v23 = vpop.f32.mrb[54].mxu1  ;;  %v3827_v51 = vadd.f32 %v5358_v2, %v5366_v22 }
 0x288   : > { %v3224_v49 = vadd.f32 %v3223_v53, %v3184_v16  ;;  %v3025_v26 = vadd.f32 %v3801_v15, %v3024_v13  ;;  %v3187_v28 = vmul.f32 %v3801_v15, %v3801_v15  ;;  %v3803_v31 = vadd.f32 %v2501_v23, %v5394_v3  ;;  %v2503_v32 = vpop.f32.mrb[55].mxu1 }
 0x289   : > { %v3753_v47 = vpack.c.bf16 %v3802_v39, %v3801_v15  ;;  %v3044_v36 = vadd.f32 %v3802_v39, %v3043_v17  ;;  %v3188_v38 = vmul.f32 %v3802_v39, %v3802_v39  ;;  %v3804_v20 = vadd.f32 %v2503_v32, %v5396_v10 }
 0x28a   : > { %v3206_v45 = vadd.f32 %v3205_v21, %v3187_v28  ;;  %v3026_v12 = vadd.f32 %v3803_v31, %v3025_v26  ;;  %v3191_v43 = vmul.f32 %v3803_v31, %v3803_v31 }
 0x28b   : > { %3010 = vst [vmem:[%s5406_s24 + $0xc0] sm:$0xff] %v3753_v47  ;;  %v3225_v50 = vadd.f32 %v3224_v49, %v3188_v38  ;;  %v3755_v52 = vpack.c.bf16 %v3804_v20, %v3803_v31  ;;  %v3045_v4 = vadd.f32 %v3804_v20, %v3044_v36  ;;  %v3192_v40 = vmul.f32 %v3804_v20, %v3804_v20 }
 0x28c   : > { %v3027_v42 = vrot.slane %v3026_v12, 4  ;;  %v3207_v3 = vadd.f32 %v3206_v45, %v3191_v43 }
 0x28d   : > { %3012 = vst [vmem:[%s5406_s24 + $0xd0] sm:$0xff] %v3755_v52  ;;  %v3046_v57 = vrot.slane %v3045_v4, 4  ;;  %v3226_v58 = vadd.f32 %v3225_v50, %v3192_v40  ;;  %v2786_v10 = vpop.f32.mrb[56].mxu1 }
 0x28e   : > { %v3028_v5 = vadd.f32 %v3027_v42, %v3026_v12  ;;  %v3208_v6 = vrot.slane %v3207_v3, 4  ;;  %v3822_v35 = vadd.f32 %v3821_v41, %v2786_v10  ;;  %v2788_v9 = vpop.f32.mrb[57].mxu1 }
 0x28f   : > { %v3047_v37 = vadd.f32 %v3046_v57, %v3045_v4  ;;  %v3227_v24 = vrot.slane %v3226_v58, 4  ;;  %v3824_v54 = vadd.f32 %v3823_v55, %v2788_v9  ;;  %v2790_v62 = vpop.f32.mrb[58].mxu1 }
 0x290   : > { %v3029_v56 = vrot.slane %v3028_v5, 2  ;;  %v3209_v13 = vadd.f32 %v3208_v6, %v3207_v3  ;;  %v3059_v14 = vadd.f32 %v3822_v35, %v5482_v8  ;;  %v3173_v16 = vmul.f32 %v3822_v35, %v3822_v35  ;;  %v2792_v27 = vpop.f32.mrb[59].mxu1 }
 0x291   : > { %v3048_v53 = vrot.slane %v3047_v37, 2  ;;  %v3228_v63 = vadd.f32 %v3227_v24, %v3226_v58  ;;  %v3746_v11 = vpack.c.bf16 %v3824_v54, %v3822_v35  ;;  %v3087_v17 = vsel %vm3071_vm7, %v3824_v54, 0.0 }
 0x292   : > { %v3030_v15 = vadd.f32 %v3029_v56, %v3028_v5  ;;  %v3210_v19 = vrot.slane %v3209_v13, 2  ;;  %v3240_v2 = vadd.f32 %v5484_v18, %v3173_v16  ;;  %v3088_v22 = vadd.f32 %v3087_v17, %v5492_v60 }
 0x293   : > { %v3049_v21 = vadd.f32 %v3048_v53, %v3047_v37  ;;  %v3229_v39 = vrot.slane %v3228_v63, 2  ;;  %3003 = vst.msk [vmem:[%s5406_s24 + $0x88] sm:$0xff] %vm5408_vm6, %v3746_v11  ;;  %v3174_v23 = vmul.f32 %v3824_v54, %v3824_v54  ;;  %v3826_v8 = vadd.f32 %v3825_v1, %v2790_v62 }
 0x294   : > { %v3031_v49 = vrot.slane %v3030_v15, 1  ;;  %v3211_v26 = vadd.f32 %v3210_v19, %v3209_v13  ;;  %v3828_v28 = vadd.f32 %v3827_v51, %v2792_v27 }
 0x295   : > { %v3050_v31 = vrot.slane %v3049_v21, 1  ;;  %v3230_v32 = vadd.f32 %v3229_v39, %v3228_v63  ;;  %v3267_v47 = vsel %vm3071_vm7, %v3174_v23, 0.0  ;;  %v3060_v36 = vadd.f32 %v3826_v8, %v3059_v14  ;;  %v2796_v38 = vpop.f32.mrb[60].mxu1 }
 0x296   : > { %v5530_v20 = vadd.f32 %v3031_v49, %v3030_v15  ;;  %v3212_v18 = vrot.slane %v3211_v26, 1  ;;  %v3268_v60 = vadd.f32 %v3267_v47, %v5498_v33  ;;  %v3177_v45 = vmul.f32 %v3826_v8, %v3826_v8  ;;  %v2798_v12 = vpop.f32.mrb[61].mxu1 }
 0x297   : > { %v5533_v43 = vadd.f32 %v3050_v31, %v3049_v21  ;;  %v3231_v50 = vrot.slane %v3230_v32, 1  ;;  %v3748_v52 = vpack.c.bf16 %v3828_v28, %v3826_v8  ;;  %v3089_v4 = vsel %vm3071_vm7, %v3828_v28, 0.0  ;;  %v2800_v40 = vpop.f32.mrb[62].mxu1 }
 0x298   : > { %v5536_v41 = vadd.f32 %v3212_v18, %v3211_v26  ;;  %v3241_v42 = vadd.f32 %v3240_v2, %v3177_v45  ;;  %v3090_v3 = vadd.f32 %v3089_v4, %v3088_v22  ;;  %v3178_v55 = vmul.f32 %v3828_v28, %v3828_v28  ;;  %v2802_v57 = vpop.f32.mrb[63].mxu1 }
 0x299   : > { %v3109_v58 = vcombine.low %v5530_v20, %v5533_v43  ;;  %v5540_v10 = vadd.f32 %v3231_v50, %v3230_v32  ;;  %3005 = vst.msk [vmem:[%s5406_s24 + $0x98] sm:$0xff] %vm5408_vm6, %v3748_v52  ;;  %v3830_v33 = vadd.f32 %v5369_v25, %v2796_v38  ;;  %v3832_v1 = vadd.f32 %v5372_v29, %v2798_v12 }
 0x29a   : > { %v3269_v5 = vsel %vm3071_vm7, %v3178_v55, 0.0  ;;  %v3834_v6 = vadd.f32 %v5375_v46, %v2800_v40  ;;  %v3836_v35 = vadd.f32 %v5378_v48, %v2802_v57  ;;  %v4324_v57 = vmov 1966171168  }
 0x29b   : > { %v3289_v9 = vcombine.low %v5536_v41, %v5540_v10  ;;  %v3270_v51 = vadd.f32 %v3269_v5, %v3268_v60  ;;  %v3061_v37 = vadd.f32 %v3830_v33, %v3060_v36  ;;  %v3181_v24 = vmul.f32 %v3830_v33, %v3830_v33 }
 0x29c   : > { %v3750_v54 = vpack.c.bf16 %v3832_v1, %v3830_v33  ;;  %v3091_v62 = vsel %vm3071_vm7, %v3832_v1, 0.0  ;;  %v3182_v56 = vmul.f32 %v3832_v1, %v3832_v1  ;;  %v3185_v13 = vmul.f32 %v3834_v6, %v3834_v6 }
 0x29d   : > { %v3092_v25 = vadd.f32 %v3091_v62, %v3090_v3  ;;  %v3062_v29 = vadd.f32 %v3834_v6, %v3061_v37  ;;  %v2806_v14 = vpop.f32.mrb[64].mxu1  ;;  %v3242_v16 = vadd.f32 %v3241_v42, %v3181_v24  ;;  %v3752_v48 = vpack.c.bf16 %v3836_v35, %v3834_v6 }
 0x29e   : > { %3007 = vst.msk [vmem:[%s5406_s24 + $0xa8] sm:$0xff] %vm5408_vm6, %v3750_v54  ;;  %v3271_v46 = vsel %vm3071_vm7, %v3182_v56, 0.0  ;;  %v3093_v27 = vsel %vm3071_vm7, %v3836_v35, 0.0  ;;  %v2808_v53 = vpop.f32.mrb[65].mxu1  ;;  %v3186_v17 = vmul.f32 %v3836_v35, %v3836_v35  ;;  %v3838_v15 = vadd.f32 %v5381_v59, %v2806_v14 }
 0x29f   : > { %v3272_v63 = vadd.f32 %v3271_v46, %v3270_v51  ;;  %v3094_v11 = vadd.f32 %v3093_v27, %v3092_v25  ;;  %v2810_v19 = vpop.f32.mrb[66].mxu1  ;;  %v3243_v2 = vadd.f32 %v3242_v16, %v3185_v13  ;;  %3009 = vst.msk [vmem:[%s5406_s24 + $0xb8] sm:$0xff] %vm5408_vm6, %v3752_v48  ;;  %v3840_v22 = vadd.f32 %v5385_v44, %v2808_v53 }
 0x2a0   : > { %v3842_v21 = vadd.f32 %v5389_v61, %v2810_v19  ;;  %v2812_v39 = vpop.f32.mrb[67].mxu1  ;;  %v3273_v23 = vsel %vm3071_vm7, %v3186_v17, 0.0  ;;  %v3063_v8 = vadd.f32 %v3838_v15, %v3062_v29  ;;  %v3189_v49 = vmul.f32 %v3838_v15, %v3838_v15 }
 0x2a1   : > { %v3844_v26 = vadd.f32 %v5392_v0, %v2812_v39  ;;  %v3274_v28 = vadd.f32 %v3273_v23, %v3272_v63  ;;  %v3754_v31 = vpack.c.bf16 %v3840_v22, %v3838_v15  ;;  %v3095_v59 = vsel %vm3071_vm7, %v3840_v22, 0.0 }
 0x2a2   : > { %v3190_v32 = vmul.f32 %v3840_v22, %v3840_v22  ;;  %v3244_v47 = vadd.f32 %v3243_v2, %v3189_v49  ;;  %v3096_v36 = vadd.f32 %v3095_v59, %v3094_v11  ;;  %v3064_v38 = vadd.f32 %v3842_v21, %v3063_v8 }
 0x2a3   : > { %v3193_v18 = vmul.f32 %v3842_v21, %v3842_v21  ;;  %3011 = vst.msk [vmem:[%s5406_s24 + $0xc8] sm:$0xff] %vm5408_vm6, %v3754_v31  ;;  %v3756_v61 = vpack.c.bf16 %v3844_v26, %v3842_v21  ;;  %v3097_v60 = vsel %vm3071_vm7, %v3844_v26, 0.0  ;;  %v3194_v45 = vmul.f32 %v3844_v26, %v3844_v26 }
 0x2a4   : > { %v3275_v44 = vsel %vm3071_vm7, %v3190_v32, 0.0  ;;  %v3065_v12 = vrot.slane %v3064_v38, 4  ;;  %v3098_v52 = vadd.f32 %v3097_v60, %v3096_v36  ;;  %v3112_v33 = vunpack.c.l.s4 %v4324_v57 }
 0x2a5   : > { %v3276_v0 = vadd.f32 %v3275_v44, %v3274_v28  ;;  %v3245_v50 = vadd.f32 %v3244_v47, %v3193_v18  ;;  %3013 = vst.msk [vmem:[%s5406_s24 + $0xd8] sm:$0xff] %vm5408_vm6, %v3756_v61  ;;  %v3277_v4 = vsel %vm3071_vm7, %v3194_v45, 0.0 }
 0x2a6   : > { %v3066_v40 = vadd.f32 %v3065_v12, %v3064_v38  ;;  %v3099_v3 = vrot.slane %v3098_v52, 4  ;;  %v3113_v7 = vunpack.c.0.s8 %v3112_v33 }
 0x2a7   : > { %v3246_v42 = vrot.slane %v3245_v50, 4  ;;  %v3278_v55 = vadd.f32 %v3277_v4, %v3276_v0 }
 0x2a8   : > { %v3067_v1 = vrot.slane %v3066_v40, 2  ;;  %v3100_v6 = vadd.f32 %v3099_v3, %v3098_v52  ;;  %v3116_v46 = vsub.s32 %v3113_v7, %v5349_v30 }
 0x2a9   : > { %v3247_v5 = vadd.f32 %v3246_v42, %v3245_v50  ;;  %v3279_v35 = vrot.slane %v3278_v55, 4 }
 0x2aa   : > { %v3068_v51 = vadd.f32 %v3067_v1, %v3066_v40  ;;  %v3101_v24 = vrot.slane %v3100_v6, 2  ;;  %v3117_v15 = vrot.slane %v3109_v58, %v3116_v46  ;;  %v3297_v22 = vrot.slane %v3289_v9, %v3116_v46 }
 0x2ab   : > { %v3248_v37 = vrot.slane %v3247_v5, 2  ;;  %v3280_v54 = vadd.f32 %v3279_v35, %v3278_v55 }
 0x2ac   : > { %v3069_v62 = vrot.slane %v3068_v51, 1  ;;  %v3102_v25 = vadd.f32 %v3101_v24, %v3100_v6 }
 0x2ad   : > { %v3249_v56 = vadd.f32 %v3248_v37, %v3247_v5  ;;  %v3281_v29 = vrot.slane %v3280_v54, 2 }
 0x2ae   : > { %v3103_v14 = vrot.slane %v3102_v25, 1  ;;  %v3070_v48 = vadd.f32 %v3069_v62, %v3068_v51 }
 0x2af   : > { %v3250_v13 = vrot.slane %v3249_v56, 1  ;;  %v3282_v16 = vadd.f32 %v3281_v29, %v3280_v54 }
 0x2b0   : > { %v3104_v27 = vadd.f32 %v3103_v14, %v3102_v25 }
 0x2b1   : > { %v3283_v53 = vrot.slane %v3282_v16, 1  ;;  %v3251_v63 = vadd.f32 %v3250_v13, %v3249_v56 }
 0x2b2   : > { %v3110_v11 = vcombine.low %v3070_v48, %v3104_v27 }
 0x2b3   : > { %v3284_v17 = vadd.f32 %v3283_v53, %v3282_v16 }
 0x2b4   : > { %v3124_v19 = vrot.slane %v3110_v11, %v3116_v46 }
 0x2b5   : > { %v3290_v2 = vcombine.low %v3251_v63, %v3284_v17 }
 0x2b6   : > { %v3125_v21 = vcombine.low %v3117_v15, %v3124_v19 }
 0x2b7   : > { %v3304_v30 = vrot.slane %v3290_v2, %v3116_v46 }
 0x2b8   : > { %v3132_v39 = vrot.slane %v3125_v21, %v3116_v46 }
 0x2b9   : > { %v3305_v23 = vcombine.low %v3297_v22, %v3304_v30 }
 0x2ba   : > { %3138 = vst.msk [vmem:[%s245_s27] ss:$2 sm:$0xf] %vm3136_vm8, %v3132_v39 }
 0x2bb   : > { %v3312_v20 = vrot.slane %v3305_v23, %v3116_v46 }
 0x2bd   : > { %3723 = vst.msk [vmem:[%s245_s27 + $0x1] ss:$2 sm:$0xf] %vm3136_vm8, %v3312_v20 }
 0x2be PF: > { %s16_s18 = sadd.s32 1, %s4321_s18  }
 0x2bf   : > { %p13_p5 = scmp.ge.s32.totalorder %s16_s18, 4  }
 0x2c1   :  { %15 = sbr.rel (!%p13_p5) target bundleno = 1 (0x1), region = 79 }

// kernel: generator_forward.3
= control target key start
LH: loop header
LB: loop body
LE: loop exit
PB: predicated region body
PF: predicated region fallthrough
CT: control target
= control target key end

     0   :  { %s3341_s20 = smov 0   ;;  %s5024_s0 = inlined_call_operand.vmem [shape: bf16[448,224], index: 0, kind: input, shape index: {}]   ;;  %s5025_s1 = inlined_call_operand.vmem [shape: f32[1,224], index: 1, kind: input, shape index: {}]   ;;  %s5026_s2 = inlined_call_operand.vmem [shape: f32[1,224], index: 2, kind: input, shape index: {}]   ;;  %s5027_s3 = inlined_call_operand.vmem [shape: bf16[3,224,56], index: 3, kind: input, shape index: {}]   ;;  %s5028_s4 = inlined_call_operand.<no memory space> [shape: f32[1,1], index: 4, kind: input, shape index: {}]   ;;  %s5029_s5 = inlined_call_operand.vmem [shape: f32[448,56], index: 5, kind: output, shape index: {}]  }
   0x1   :  { %10 = sst [smem:[#allocation2]] %s5028_s4 }
   0x2 LB: > { %s2899_s21 = sadd.s32 4294967295, %s3304_s20   ;;  %p2903_p0 = scmp.ge.s32.totalorder %s3304_s20, 1  ;;  %s3304_s20 = sphi %s3341_s20, %s16_s20  }
   0x3   : > { %p190_p1 = scmp.lt.s32.totalorder %s3304_s20, 3 }
   0x5   : > { %p191_p2 = pnand %p2903_p0, %p190_p1 }
   0x7   : > { %194 = sbr.rel (%p191_p2) target bundleno = 596 (0x254), region = 40 }
   0xe   : > { %v3200_v0 = vld [vmem:[%s5027_s3] sm:$0xff]   ;;  %v5044_v1 = vmov 0   ;;  %s219_s4 = smul.u32 28, %s2899_s21  ;;  %v3201_v2 = vld [vmem:[%s5027_s3 + $0x8] sm:$0xff]   ;;  %v319_v3 = vlaneseq  ;;  %v3202_v4 = vld [vmem:[%s5027_s3 + $0x10] sm:$0xff]   ;;  %vm594_vm0 = vcmask 1040384  }
   0xf   : > { %1984 = vmatprep.subr.bf16.mxu0 %v5044_v1  ;;  %3106 = vmatprep.subr.bf16.mxu1 %v5044_v1  ;;  %v3203_v6 = vld [vmem:[%s5027_s3 + $0x18] sm:$0xff]   ;;  %v3204_v7 = vld [vmem:[%s5027_s3 + $0x20] sm:$0xff]   ;;  %vm1435_vm2 = vcmask 1046528   ;;  %v3205_v30 = vld [vmem:[%s5027_s3 + $0x28] sm:$0xff]   ;;  %vm1941_vm9 = vcmask 785408  }
  0x10   : > { %1985 = vmatpush1.bf16.msra.mxu0 %v3200_v0  ;;  %3120 = vmatpush1.bf16.msra.mxu1 %v3200_v0  ;;  %p220_p3 = scmp.lt.s32.totalorder %s219_s4, 55  ;;  %v3367_v5 = vshrl.u32 %v319_v3, 7  ;;  %v317_v21 = vld [vmem:[%s5025_s1] sm:$0x3]  ;;  %v3206_v42 = vld [vmem:[%s5027_s3 + $0x30] sm:$0xff]   ;;  %v3207_v55 = vld [vmem:[%s5027_s3 + $0x38] sm:$0xff]  }
  0x11   : > { %1986 = vmatprep.subr.bf16.mxu0 %v5044_v1  ;;  %3107 = vmatprep.subr.bf16.mxu1 %v5044_v1  ;;  %v385_v22 = vld [vmem:[%s5026_s2] sm:$0x3] }
  0x12   : > { %s5246_s4 = smov (!%p220_p3, %s219_s4), 55  ;;  %v321_v8 = vsub.s32 0, %v3367_v5  ;;  %v325_v9 = vsub.s32 1, %v3367_v5  ;;  %v3387_v10 = vadd.s32 8, %v3367_v5  ;;  %v3399_v16 = vadd.s32 112, %v3367_v5 }
  0x13   : > { %s3105_s28 = sshll.u32 %s5246_s4, 3  ;;  %v3395_v14 = vmul.u32.u64.low 2454267026, %v3367_v5  ;;  %v3396_v15 = vmul.u32.u64.high 2454267026, %v3367_v5, %v3395_v14 }
  0x14   : > { %1987 = vmatpush1.bf16.msra.mxu0 %v3201_v2  ;;  %3121 = vmatpush1.bf16.msra.mxu1 %v3201_v2  ;;  %s3379_s8 = scalar_lea.vmem %s5024_s0, %s3105_s28  ;;  %v3410_v24 = vrot.slane %v317_v21, %v321_v8  ;;  %v3412_v25 = vrot.slane %v317_v21, %v325_v9  ;;  %v3414_v26 = vrot.slane %v385_v22, %v321_v8  ;;  %s4914_s26 = scalar_lea.vmem %s5029_s5, %s3105_s28 }
  0x15   : > { %1988 = vmatprep.subr.bf16.mxu0 %v5044_v1  ;;  %3108 = vmatprep.subr.bf16.mxu1 %v5044_v1  ;;  %v233_v11 = vld [vmem:[%s3379_s8] sm:$0xff]  ;;  %v234_v12 = vld [vmem:[%s3379_s8 + $0x8] sm:$0xff]  ;;  %v3392_v13 = vld [vmem:[%s3379_s8 + $0x10] sm:$0xff]  ;;  %v3416_v27 = vrot.slane %v385_v22, %v325_v9  ;;  %vm769_vm1 = vc.u32 %v3395_v14, 2454267026 }
  0x16   : > { %v261_v17 = vunpack.c.l.bf16 %v233_v11  ;;  %v262_v18 = vunpack.c.h.bf16 %v233_v11  ;;  %v263_v19 = vunpack.c.l.bf16 %v234_v12  ;;  %v264_v20 = vunpack.c.h.bf16 %v234_v12  ;;  %v3451_v50 = vld [vmem:[%s3379_s8 + $0x68] sm:$0xff]  ;;  %v3470_v0 = vld [vmem:[%s3379_s8 + $0x70] sm:$0xff] }
  0x17   : > { %v265_v23 = vunpack.c.l.bf16 %v3392_v13  ;;  %v3419_v28 = vmul.u32.u64.low 2454267026, %v3387_v10  ;;  %v3420_v29 = vmul.u32.u64.high 2454267026, %v3387_v10, %v3419_v28  ;;  %v770_v34 = vsel %vm769_vm1, 1, %v5044_v1 }
  0x18   : > { %1989 = vmatpush1.bf16.msra.mxu0 %v3202_v4  ;;  %3122 = vmatpush1.bf16.msra.mxu1 %v3202_v4  ;;  %v329_v31 = vmul.f32 %v3410_v24, %v261_v17  ;;  %v330_v32 = vmul.f32 %v3412_v25, %v262_v18  ;;  %v331_v33 = vmul.f32 %v3410_v24, %v263_v19  ;;  %v3208_v18 = vld [vmem:[%s5027_s3 + $0x40] sm:$0xff]   ;;  %v290_v21 = vunpack.c.h.bf16 %v3470_v0 }
  0x19   : > { %1990 = vmatprep.subr.bf16.mxu0 %v5044_v1  ;;  %3109 = vmatprep.subr.bf16.mxu1 %v5044_v1  ;;  %v332_v35 = vmul.f32 %v3412_v25, %v264_v20  ;;  %v333_v36 = vmul.f32 %v3410_v24, %v265_v23  ;;  %v771_v37 = vadd.s32 %v3396_v15, %v770_v34  ;;  %vm783_vm3 = vc.u32 %v3419_v28, 2454267026 }
  0x1a   : > { %v397_v38 = vadd.f32 %v3414_v26, %v329_v31  ;;  %v398_v39 = vadd.f32 %v3416_v27, %v330_v32  ;;  %v399_v40 = vadd.f32 %v3414_v26, %v331_v33  ;;  %v784_v41 = vsel %vm783_vm3, 1, %v5044_v1 }
  0x1b   : > { %v400_v43 = vadd.f32 %v3416_v27, %v332_v35  ;;  %v401_v44 = vadd.f32 %v3414_v26, %v333_v36  ;;  %v772_v45 = vshrl.u32 %v771_v37, 3  ;;  %v785_v46 = vadd.s32 %v3420_v29, %v784_v41  ;;  %v3501_v29 = vld [vmem:[%s3379_s8 + $0x18] sm:$0xff]  ;;  %v3209_v37 = vld [vmem:[%s5027_s3 + $0x48] sm:$0xff]  }
  0x1c   : > { %1991 = vmatpush1.bf16.msra.mxu0 %v3203_v6  ;;  %3123 = vmatpush1.bf16.msra.mxu1 %v3203_v6  ;;  %v3444_v47 = vmax.f32 %v397_v38, 0.0  ;;  %v3446_v48 = vmax.f32 %v398_v39, 0.0  ;;  %v3448_v49 = vmax.f32 %v399_v40, 0.0  ;;  %v248_v6 = vld [vmem:[%s3379_s8 + $0x78] sm:$0xff]  ;;  %v289_v20 = vunpack.c.l.bf16 %v3470_v0 }
  0x1d   : > { %1992 = vmatprep.subr.bf16.mxu0 %v5044_v1  ;;  %3110 = vmatprep.subr.bf16.mxu1 %v5044_v1  ;;  %v3455_v51 = vmax.f32 %v400_v43, 0.0  ;;  %v3457_v52 = vmax.f32 %v401_v44, 0.0  ;;  %v773_v53 = vmul.u32 14, %v772_v45  ;;  %v786_v54 = vshrl.u32 %v785_v46, 3 }
  0x1e   : > { %v595_v56 = vrot.slane %v3444_v47, 7  ;;  %v596_v57 = vrot.slane %v3446_v48, 7  ;;  %v597_v58 = vrot.slane %v3448_v49, 7  ;;  %v1436_v59 = vrot.slane %v3444_v47, 1 }
  0x1f   : > { %v599_v60 = vrot.slane %v3455_v51, 7  ;;  %v774_v61 = vsub.s32 %v3367_v5, %v773_v53  ;;  %v787_v62 = vmul.u32 14, %v786_v54  ;;  %v1437_v63 = vrot.slane %v3448_v49, 1 }
  0x20   : > { %1993 = vmatpush1.bf16.msra.mxu0 %v3204_v7  ;;  %3124 = vmatpush1.bf16.msra.mxu1 %v3204_v7  ;;  %v761_v2 = vsel %vm594_vm0, 0.0, %v595_v56  ;;  %v762_v3 = vsel %vm594_vm0, 0.0, %v596_v57  ;;  %v5030_v4 = vrot.slane %v3457_v52, 1  ;;  %v287_v7 = vunpack.c.l.bf16 %v3451_v50 }
  0x21   : > { %1994 = vmatprep.subr.bf16.mxu0 %v5044_v1  ;;  %3111 = vmatprep.subr.bf16.mxu1 %v5044_v1  ;;  %v3482_v8 = vsel %vm594_vm0, %v595_v56, %v597_v58  ;;  %v788_v9 = vsub.s32 %v3387_v10, %v787_v62  ;;  %vm1155_vm4 = vcmp.ne.s32.totalorder %v774_v61, 0  ;;  %vm1183_vm5 = vcmp.lt.s32.totalorder %v774_v61, 0 }
  0x22   : > { %v600_v11 = vsel %vm594_vm0, %v596_v57, %v599_v60  ;;  %vm1211_vm6 = vmand %vm1183_vm5, %vm1155_vm4  ;;  %v1239_v12 = vadd.s32 14, %v774_v61  ;;  %v1438_v14 = vsel %vm1435_vm2, %v1436_v59, %v1437_v63  ;;  %v1443_v15 = vsel %vm1435_vm2, %v1437_v63, %v5030_v4  ;;  %v3210_v59 = vld [vmem:[%s5027_s3 + $0x50] sm:$0xff]  }
  0x23   : > { %vm1156_vm7 = vcmp.ne.s32.totalorder %v788_v9, 0  ;;  %vm1184_vm8 = vcmp.lt.s32.totalorder %v788_v9, 0  ;;  %v1240_v17 = vadd.s32 14, %v788_v9  ;;  %v288_v10 = vunpack.c.h.bf16 %v3451_v50 }
  0x24   : > { %1995 = vmatpush1.bf16.msra.mxu0 %v3205_v30  ;;  %3125 = vmatpush1.bf16.msra.mxu1 %v3205_v30  ;;  %vm1212_vm10 = vmand %vm1184_vm8, %vm1156_vm7  ;;  %v1267_v19 = vsel %vm1211_vm6, %v1239_v12, %v774_v61  ;;  %v291_v22 = vunpack.c.l.bf16 %v248_v6  ;;  %v292_v28 = vunpack.c.h.bf16 %v248_v6  ;;  %v5036_v30 = vmov 0.0  }
  0x25   : > { %1996 = vmatprep.subr.bf16.mxu0 %v5044_v1  ;;  %3112 = vmatprep.subr.bf16.mxu1 %v5044_v1  ;;  %v1268_v23 = vsel %vm1212_vm10, %v1240_v17, %v788_v9  ;;  %vm1295_vm11 = vcmp.ne.s32.totalorder %v1267_v19, 0  ;;  %vm1604_vm12 = vcmp.ne.s32.totalorder %v1267_v19, 13  ;;  %v355_v36 = vmul.f32 %v3410_v24, %v287_v7 }
  0x26   : > { %vm1296_vm13 = vcmp.ne.s32.totalorder %v1268_v23, 0  ;;  %v2907_v31 = vsel %vm1295_vm11, 1.0, %v5036_v30  ;;  %vm1605_vm14 = vcmp.ne.s32.totalorder %v1268_v23, 13  ;;  %v3505_v32 = vsel %vm1604_vm12, 1.0, %v5036_v30 }
  0x27   : > { %v2908_v33 = vsel %vm1296_vm13, 1.0, %v5036_v30  ;;  %v1380_v34 = vmul.f32 %v2907_v31, %v762_v3  ;;  %v3509_v35 = vsel %vm1605_vm14, 1.0, %v5036_v30  ;;  %v3515_v38 = vmul.f32 %v2907_v31, %v761_v2 }
  0x28   : > { %1997 = vmatpush1.bf16.msra.mxu0 %v3206_v42  ;;  %3126 = vmatpush1.bf16.msra.mxu1 %v3206_v42  ;;  %v1382_v39 = vmul.f32 %v2908_v33, %v600_v11  ;;  %v3518_v40 = vmul.f32 %v3505_v32, %v1438_v14  ;;  %v266_v41 = vunpack.c.h.bf16 %v3392_v13  ;;  %v3524_v42 = vmul.f32 %v3509_v35, %v1443_v15 }
  0x29   : > { %1998 = vmatprep.subr.bf16.mxu0 %v5044_v1  ;;  %3113 = vmatprep.subr.bf16.mxu1 %v5044_v1  ;;  %v356_v43 = vmul.f32 %v3412_v25, %v288_v10  ;;  %v357_v44 = vmul.f32 %v3410_v24, %v289_v20  ;;  %v268_v45 = vunpack.c.h.bf16 %v3501_v29  ;;  %v358_v50 = vmul.f32 %v3412_v25, %v290_v21  ;;  %v3575_v21 = vld [vmem:[%s3379_s8 + $0x80] sm:$0xff] }
  0x2a   : > { %v1802_v46 = vpack.c.bf16 %v1382_v39, %v1380_v34  ;;  %v359_v53 = vmul.f32 %v3410_v24, %v291_v22  ;;  %v360_v13 = vmul.f32 %v3412_v25, %v292_v28  ;;  %v3544_v0 = vadd.s32 120, %v3367_v5  ;;  %v3597_v39 = vld [vmem:[%s3379_s8 + $0x88] sm:$0xff] }
  0x2b   : > { %v424_v56 = vadd.f32 %v3416_v27, %v356_v43  ;;  %v425_v57 = vadd.f32 %v3414_v26, %v357_v44  ;;  %v426_v61 = vadd.f32 %v3416_v27, %v358_v50  ;;  %v3549_v2 = vmul.f32 %v2908_v33, %v3482_v8 }
  0x2c   : > { %1999 = vmatpush1.bf16.msra.mxu0 %v3207_v55  ;;  %3127 = vmatpush1.bf16.msra.mxu1 %v3207_v55  ;;  %v423_v55 = vadd.f32 %v3414_v26, %v355_v36  ;;  %v427_v62 = vadd.f32 %v3414_v26, %v359_v53  ;;  %v428_v63 = vadd.f32 %v3416_v27, %v360_v13  ;;  %v3585_v31 = vadd.s32 16, %v3367_v5 }
  0x2d   : > { %2000 = vmatprep.subr.bf16.mxu0 %v5044_v1  ;;  %3114 = vmatprep.subr.bf16.mxu1 %v5044_v1  ;;  %v3553_v6 = vmax.f32 %v424_v56, 0.0  ;;  %v3555_v7 = vmax.f32 %v425_v57, 0.0  ;;  %v3558_v9 = vmax.f32 %v426_v61, 0.0  ;;  %v334_v14 = vmul.f32 %v3412_v25, %v266_v41 }
  0x2e   : > { %v3551_v3 = vmax.f32 %v423_v55, 0.0  ;;  %3005 = vmatprep.mubr.msk.bf16.mxu0 %vm1941_vm9, %v1802_v46  ;;  %v3560_v11 = vmax.f32 %v427_v62, 0.0  ;;  %v3562_v12 = vmax.f32 %v428_v63, 0.0  ;;  %v336_v10 = vmul.f32 %v3412_v25, %v268_v45  ;;  %v3212_v45 = vld [vmem:[%s5027_s3 + $0x60] sm:$0xff]  }
  0x2f   : > { %5129 = vst [vmem:[#allocation3_spill] sm:$0xff] %v3555_v7  ;;  %5130 = vst [vmem:[#allocation4_spill] sm:$0xff] %v3558_v9  ;;  %v5032_v15 = vrot.slane %v3553_v6, 7  ;;  %v649_v17 = vrot.slane %v3555_v7, 7  ;;  %v651_v19 = vrot.slane %v3558_v9, 7  ;;  %v1801_v34 = vpack.c.bf16 %v3549_v2, %v3515_v38 }
  0x30   : > { %2001 = vmatpush1.bf16.msra.mxu0 %v3208_v18  ;;  %3128 = vmatpush1.bf16.msra.mxu1 %v3208_v18  ;;  %5131 = vst [vmem:[#allocation5_spill] sm:$0xff] %v3560_v11  ;;  %5132 = vst [vmem:[#allocation6_spill] sm:$0xff] %v3562_v12  ;;  %v5031_v8 = vrot.slane %v3551_v3, 7  ;;  %v3211_v18 = vld [vmem:[%s5027_s3 + $0x58] sm:$0xff]   ;;  %v653_v20 = vrot.slane %v3560_v11, 7  ;;  %v655_v22 = vrot.slane %v3562_v12, 7  ;;  %v402_v36 = vadd.f32 %v3416_v27, %v334_v14 }
  0x31   : > { %2002 = vmatprep.subr.bf16.mxu0 %v5044_v1  ;;  %3115 = vmatprep.subr.bf16.mxu1 %v5044_v1  ;;  %v3581_v23 = vmul.u32.u64.low 2454267026, %v3399_v16  ;;  %v3582_v28 = vmul.u32.u64.high 2454267026, %v3399_v16, %v3581_v23  ;;  %v3602_v41 = vsel %vm594_vm0, %v5032_v15, %v651_v19  ;;  %v3618_v53 = vadd.s32 24, %v3367_v5  ;;  %v4141_v12 = vld [vmem:[%s3379_s8 + $0x40] sm:$0xff] }
  0x32   : > { %v3590_v33 = vsel %vm594_vm0, %v5031_v8, %v649_v17  ;;  %v3605_v43 = vmul.u32.u64.low 2454267026, %v3544_v0  ;;  %v3606_v44 = vmul.u32.u64.high 2454267026, %v3544_v0, %v3605_v43  ;;  %v3614_v46 = vsel %vm594_vm0, %v649_v17, %v653_v20 }
  0x33   : > { %vm965_vm15 = vc.u32 %v3581_v23, 2454267026  ;;  %v294_v13 = vunpack.c.h.bf16 %v3575_v21  ;;  %v3626_v55 = vsel %vm594_vm0, %v651_v19, %v655_v22  ;;  %v296_v57 = vunpack.c.h.bf16 %v3597_v39  ;;  %v3213_v19 = vld [vmem:[%s5027_s3 + $0x68] sm:$0xff]  }
  0x34   : > { %2003 = vmatpush1.bf16.msra.mxu0 %v3209_v37  ;;  %3129 = vmatpush1.bf16.msra.mxu1 %v3209_v37  ;;  %v404_v37 = vadd.f32 %v3416_v27, %v336_v10  ;;  %v966_v50 = vsel %vm965_vm15, 1, %v5044_v1  ;;  %vm979_vm1 = vc.u32 %v3605_v43, 2454267026  ;;  %v3631_v61 = vmax.f32 %v402_v36, 0.0 }
  0x35   : > { %2004 = vmatprep.subr.bf16.mxu0 %v5044_v1  ;;  %3116 = vmatprep.subr.bf16.mxu1 %v5044_v1  ;;  %v967_v56 = vadd.s32 %v3582_v28, %v966_v50  ;;  %v3634_v62 = vmul.u32.u64.low 2454267026, %v3585_v31  ;;  %v3635_v63 = vmul.u32.u64.high 2454267026, %v3585_v31, %v3634_v62  ;;  %v364_v36 = vmul.f32 %v3412_v25, %v296_v57 }
  0x36   : > { %v3638_v10 = vmax.f32 %v404_v37, 0.0  ;;  %v3645_v23 = vmul.u32.u64.low 2454267026, %v3618_v53  ;;  %v3646_v28 = vmul.u32.u64.high 2454267026, %v3618_v53, %v3645_v23  ;;  %v603_v50 = vrot.slane %v3631_v61, 7 }
  0x37   : > { %v968_v14 = vshrl.u32 %v967_v56, 3  ;;  %vm797_vm3 = vc.u32 %v3634_v62, 2454267026  ;;  %v432_v56 = vadd.f32 %v3416_v27, %v364_v36  ;;  %v278_v9 = vunpack.c.h.bf16 %v4141_v12 }
  0x38   : > { %2005 = vmatpush1.bf16.msra.mxu0 %v3210_v59  ;;  %3130 = vmatpush1.bf16.msra.mxu1 %v3210_v59  ;;  %v980_v59 = vsel %vm979_vm1, 1, %v5044_v1  ;;  %vm811_vm4 = vc.u32 %v3645_v23, 2454267026 }
  0x39   : > { %2006 = vmatprep.subr.bf16.mxu0 %v5044_v1  ;;  %3117 = vmatprep.subr.bf16.mxu1 %v5044_v1  ;;  %v981_v17 = vadd.s32 %v3606_v44, %v980_v59  ;;  %v969_v37 = vmul.u32 14, %v968_v14  ;;  %v798_v44 = vsel %vm797_vm3, 1, %v5044_v1  ;;  %v812_v62 = vsel %vm811_vm4, 1, %v5044_v1  ;;  %v3215_v14 = vld [vmem:[%s5027_s3 + $0xe0] sm:$0xff]  }
  0x3a   : > { %v3665_v23 = vmax.f32 %v432_v56, 0.0  ;;  %v3685_v56 = vadd.s32 128, %v3367_v5 }
  0x3b   : > { %v982_v43 = vshrl.u32 %v981_v17, 3  ;;  %v970_v59 = vsub.s32 %v3399_v16, %v969_v37  ;;  %v607_v17 = vrot.slane %v3638_v10, 7 }
  0x3c   : > { %2007 = vmatpush1.bf16.msra.mxu0 %v3211_v18  ;;  %3131 = vmatpush1.bf16.msra.mxu1 %v3211_v18  ;;  %v362_v18 = vmul.f32 %v3412_v25, %v294_v13  ;;  %v799_v13 = vadd.s32 %v3635_v63, %v798_v44  ;;  %v813_v63 = vadd.s32 %v3646_v28, %v812_v62  ;;  %v663_v2 = vrot.slane %v3665_v23, 7 }
  0x3d   : > { %2008 = vmatprep.subr.bf16.mxu0 %v5044_v1  ;;  %3118 = vmatprep.subr.bf16.mxu1 %v5044_v1  ;;  %v983_v57 = vmul.u32 14, %v982_v43  ;;  %5134 = vst [vmem:[#allocation8_spill] sm:$0xff] %v3665_v23  ;;  %vm1169_vm5 = vcmp.ne.s32.totalorder %v970_v59, 0  ;;  %vm1197_vm6 = vcmp.lt.s32.totalorder %v970_v59, 0  ;;  %v1253_v36 = vadd.s32 14, %v970_v59 }
  0x3e   : > { %vm1225_vm7 = vmand %vm1197_vm6, %vm1169_vm5  ;;  %v814_v43 = vshrl.u32 %v813_v63, 3  ;;  %v608_v38 = vsel %vm594_vm0, %v603_v50, %v607_v17  ;;  %v3699_v62 = vadd.s32 136, %v3367_v5  ;;  %v3219_v63 = vld [vmem:[%s5027_s3 + $0xf0] sm:$0xff]  }
  0x3f   : > { %v984_v16 = vsub.s32 %v3544_v0, %v983_v57  ;;  %v3674_v0 = vsel %vm1225_vm7, %v1253_v36, %v970_v59 }
  0x40   : > { %2009 = vmatpush1.bf16.msra.mxu0 %v3212_v45  ;;  %3132 = vmatpush1.bf16.msra.mxu1 %v3212_v45  ;;  %v430_v45 = vadd.f32 %v3416_v27, %v362_v18  ;;  %v800_v18 = vshrl.u32 %v799_v13, 3  ;;  %5135 = vst [vmem:[#allocation9_spill] sm:$0xff] %v3674_v0  ;;  %vm1309_vm12 = vcmp.ne.s32.totalorder %v3674_v0, 0  ;;  %v815_v13 = vmul.u32 14, %v814_v43 }
  0x41   : > { %2010 = vmatprep.subr.bf16.mxu0 %v5044_v1  ;;  %3119 = vmatprep.subr.bf16.mxu1 %v5044_v1  ;;  %vm1170_vm8 = vcmp.ne.s32.totalorder %v984_v16, 0  ;;  %vm1198_vm10 = vcmp.lt.s32.totalorder %v984_v16, 0  ;;  %v1254_v44 = vadd.s32 14, %v984_v16  ;;  %v2921_v57 = vsel %vm1309_vm12, 1.0, %v5036_v30 }
  0x42   : > { %v3658_v4 = vmax.f32 %v430_v45, 0.0  ;;  %v801_v37 = vmul.u32 14, %v800_v18  ;;  %vm1226_vm11 = vmand %vm1198_vm10, %vm1170_vm8  ;;  %v816_v18 = vsub.s32 %v3618_v53, %v815_v13  ;;  %v3214_v53 = vld [vmem:[%s5027_s3 + $0x70] sm:$0xff]   ;;  %v267_v43 = vunpack.c.l.bf16 %v3501_v29  ;;  %v3221_v29 = vld [vmem:[%s5027_s3 + $0xf8] sm:$0xff]  }
  0x43   : > { %v3687_v59 = vsel %vm1226_vm11, %v1254_v44, %v984_v16 }
  0x44   : > { %5133 = vst [vmem:[#allocation7_spill] sm:$0xff] %v3658_v4  ;;  %2011 = vmatpush1.bf16.msra.mxu0 %v3213_v19  ;;  %3133 = vmatpush1.bf16.msra.mxu1 %v3213_v19  ;;  %v604_v19 = vsel %vm594_vm0, %v599_v60, %v603_v50  ;;  %v659_v28 = vrot.slane %v3658_v4, 7  ;;  %v3217_v60 = vld [vmem:[%s5027_s3 + $0xe8] sm:$0xff]   ;;  %v802_v45 = vsub.s32 %v3585_v31, %v801_v37  ;;  %5136 = vst [vmem:[#allocation10_spill] sm:$0xff] %v3687_v59 }
  0x45   : > { %2255 = vmatprep.subr.bf16.mxu1 %v5044_v1  ;;  %2583 = vmatprep.subr.bf16.mxu0 %v5044_v1  ;;  %vm1310_vm13 = vcmp.ne.s32.totalorder %v3687_v59, 0  ;;  %v1407_v31 = vmul.f32 %v2921_v57, %v3590_v33  ;;  %vm1158_vm1 = vcmp.ne.s32.totalorder %v816_v18, 0  ;;  %vm1186_vm3 = vcmp.lt.s32.totalorder %v816_v18, 0 }
  0x46   : > { %vm1157_vm14 = vcmp.ne.s32.totalorder %v802_v45, 0  ;;  %v3706_v50 = vsel %vm594_vm0, %v655_v22, %v659_v28  ;;  %vm1185_vm15 = vcmp.lt.s32.totalorder %v802_v45, 0  ;;  %v1241_v16 = vadd.s32 14, %v802_v45  ;;  %vm1214_vm5 = vmand %vm1186_vm3, %vm1158_vm1 }
  0x47   : > { %2017 = vmatmul.mubr.bf16.vlgmr.msra.gmra.mrb[0].mxu0 %v1801_v34  ;;  %v1408_v34 = vmul.f32 %v2921_v57, %v3602_v41  ;;  %vm1213_vm4 = vmand %vm1185_vm15, %vm1157_vm14  ;;  %v1242_v22 = vadd.s32 14, %v816_v18  ;;  %v3719_v36 = vsel %vm594_vm0, %v659_v28, %v663_v2 }
  0x48   : > { %2584 = vmatpush1.bf16.msra.mxu0 %v3215_v14  ;;  %v2922_v14 = vsel %vm1310_vm13, 1.0, %v5036_v30  ;;  %v3722_v37 = vsel %vm1213_vm4, %v1241_v16, %v802_v45  ;;  %v3736_v57 = vmul.u32.u64.low 2454267026, %v3699_v62  ;;  %v3737_v45 = vmul.u32.u64.high 2454267026, %v3699_v62, %v3736_v57 }
  0x49   : > { %2585 = vmatprep.subr.bf16.mxu0 %v5044_v1  ;;  %v1409_v33 = vmul.f32 %v2922_v14, %v3614_v46  ;;  %v1410_v41 = vmul.f32 %v2922_v14, %v3626_v55  ;;  %v3725_v44 = vsel %vm1214_vm5, %v1242_v22, %v816_v18  ;;  %vm1297_vm6 = vcmp.ne.s32.totalorder %v3722_v37, 0  ;;  %v3216_v18 = vld [vmem:[%s5027_s3 + $0x78] sm:$0xff]  }
  0x4a   : > { %vm1298_vm7 = vcmp.ne.s32.totalorder %v3725_v44, 0  ;;  %v2909_v28 = vsel %vm1297_vm6, 1.0, %v5036_v30  ;;  %v335_v14 = vmul.f32 %v3410_v24, %v267_v43  ;;  %vm1007_vm10 = vc.u32 %v3736_v57, 2454267026 }
  0x4b   : > { %v1816_v46 = vpack.c.bf16 %v1410_v41, %v1408_v34  ;;  %v1815_v55 = vpack.c.bf16 %v1409_v33, %v1407_v31  ;;  %v2910_v31 = vsel %vm1298_vm7, 1.0, %v5036_v30  ;;  %v1384_v34 = vmul.f32 %v2909_v28, %v604_v19 }
  0x4c   : > { %2586 = vmatpush1.bf16.msra.mxu0 %v3217_v60  ;;  %v3729_v60 = vmul.u32.u64.low 2454267026, %v3685_v56  ;;  %v3730_v13 = vmul.u32.u64.high 2454267026, %v3685_v56, %v3729_v60  ;;  %v601_v41 = vrot.slane %v3457_v52, 7  ;;  %v1008_v16 = vsel %vm1007_vm10, 1, %v5044_v1 }
  0x4d   : > { %2587 = vmatprep.subr.bf16.mxu0 %v5044_v1  ;;  %3012 = vmatprep.mubr.msk.bf16.mxu1 %vm1941_vm9, %v1816_v46  ;;  %v403_v22 = vadd.f32 %v3414_v26, %v335_v14  ;;  %v3756_v46 = vld [vmem:[%s3379_s8 + $0x20] sm:$0xff]  ;;  %v1009_v43 = vadd.s32 %v3737_v45, %v1008_v16  ;;  %v295_v57 = vunpack.c.l.bf16 %v3597_v39 }
  0x4e   : > { %2073 = vmatmul.mubr.bf16.vlgmr.msra.gmra.mrb[0].mxu1 %v1815_v55  ;;  %vm993_vm8 = vc.u32 %v3729_v60, 2454267026  ;;  %v3759_v55 = vld [vmem:[%s3379_s8 + $0x28] sm:$0xff]  ;;  %v602_v60 = vsel %vm594_vm0, %v597_v58, %v601_v41  ;;  %v3218_v39 = vld [vmem:[%s5027_s3 + $0x80] sm:$0xff]  }
  0x4f   : > { %2256 = vmatpush1.bf16.msra.mxu1 %v3214_v53  ;;  %v994_v33 = vsel %vm993_vm8, 1, %v5044_v1  ;;  %v293_v53 = vunpack.c.l.bf16 %v3575_v21  ;;  %v3769_v21 = vmax.f32 %v403_v22, 0.0  ;;  %v1010_v45 = vshrl.u32 %v1009_v43, 3  ;;  %v3225_v43 = vld [vmem:[%s5027_s3 + $0x108] sm:$0xff]  }
  0x50   : > { %2588 = vmatpush1.bf16.msra.mxu0 %v3219_v63  ;;  %v1386_v63 = vmul.f32 %v2910_v31, %v608_v38  ;;  %2257 = vmatprep.subr.bf16.mxu1 %v5044_v1  ;;  %v995_v19 = vadd.s32 %v3730_v13, %v994_v33  ;;  %v3223_v13 = vld [vmem:[%s5027_s3 + $0x100] sm:$0xff]   ;;  %v1383_v33 = vmul.f32 %v2909_v28, %v602_v60 }
  0x51   : > { %2589 = vmatprep.subr.bf16.mxu0 %v5044_v1  ;;  %v361_v54 = vmul.f32 %v3410_v24, %v293_v53  ;;  %v363_v58 = vmul.f32 %v3410_v24, %v295_v57  ;;  %v5034_v28 = vrot.slane %v3769_v21, 7  ;;  %v1011_v16 = vmul.u32 14, %v1010_v45 }
  0x52   : > { %v1804_v38 = vpack.c.bf16 %v1386_v63, %v1384_v34  ;;  %v996_v14 = vshrl.u32 %v995_v19, 3  ;;  %v272_v34 = vunpack.c.h.bf16 %v3759_v55 }
  0x53   : > { %2258 = vmatpush1.bf16.msra.mxu1 %v3216_v18  ;;  %v429_v19 = vadd.f32 %v3414_v26, %v361_v54  ;;  %v3784_v18 = vadd.s32 32, %v3367_v5  ;;  %v431_v22 = vadd.f32 %v3414_v26, %v363_v58  ;;  %v606_v54 = vsel %vm594_vm0, %v601_v41, %v5034_v28 }
  0x54   : > { %2590 = vmatpush1.bf16.msra.mxu0 %v3221_v29  ;;  %3006 = vmatprep.mubr.msk.bf16.mxu0 %vm1941_vm9, %v1804_v38  ;;  %v270_v29 = vunpack.c.h.bf16 %v3756_v46  ;;  %v997_v63 = vmul.u32 14, %v996_v14  ;;  %v340_v38 = vmul.f32 %v3412_v25, %v272_v34  ;;  %v3799_v14 = vadd.s32 40, %v3367_v5 }
  0x55   : > { %2591 = vmatprep.subr.bf16.mxu0 %v5044_v1  ;;  %2259 = vmatprep.subr.bf16.mxu1 %v5044_v1  ;;  %v3796_v57 = vmax.f32 %v429_v19, 0.0  ;;  %v1385_v45 = vmul.f32 %v2910_v31, %v606_v54  ;;  %v3803_v58 = vmax.f32 %v431_v22, 0.0 }
  0x56   : > { %v338_v53 = vmul.f32 %v3412_v25, %v270_v29  ;;  %v998_v60 = vsub.s32 %v3685_v56, %v997_v63  ;;  %v3220_v56 = vld [vmem:[%s5027_s3 + $0x88] sm:$0xff]   ;;  %v3812_v63 = vld [vmem:[%s3379_s8 + $0x90] sm:$0xff] }
  0x57   : > { %5137 = vst [vmem:[#allocation11_spill] sm:$0xff] %v3796_v57  ;;  %5138 = vst [vmem:[#allocation12_spill] sm:$0xff] %v3803_v58  ;;  %2260 = vmatpush1.bf16.msra.mxu1 %v3218_v39  ;;  %v657_v34 = vrot.slane %v3796_v57, 7  ;;  %v1803_v31 = vpack.c.bf16 %v1385_v45, %v1383_v33  ;;  %v3227_v39 = vld [vmem:[%s5027_s3 + $0x110] sm:$0xff]   ;;  %v5033_v22 = vrot.slane %v3803_v58, 7 }
  0x58   : > { %2592 = vmatpush1.bf16.msra.mxu0 %v3223_v13  ;;  %v1012_v13 = vsub.s32 %v3699_v62, %v1011_v16  ;;  %v406_v29 = vadd.f32 %v3416_v27, %v338_v53  ;;  %vm1171_vm11 = vcmp.ne.s32.totalorder %v998_v60, 0  ;;  %vm1199_vm12 = vcmp.lt.s32.totalorder %v998_v60, 0  ;;  %2261 = vmatprep.subr.bf16.mxu1 %v5044_v1 }
  0x59   : > { %2593 = vmatprep.subr.bf16.mxu0 %v5044_v1  ;;  %v1255_v41 = vadd.s32 14, %v998_v60  ;;  %vm1227_vm15 = vmand %vm1199_vm12, %vm1171_vm11  ;;  %v658_v16 = vsel %vm594_vm0, %v653_v20, %v657_v34  ;;  %v408_v53 = vadd.f32 %v3416_v27, %v340_v38  ;;  %2025 = vmatmul.mubr.bf16.gmra.mrb[4].mxu0 %v1803_v31  ;;  %v3222_v20 = vld [vmem:[%s5027_s3 + $0x90] sm:$0xff]   ;;  %v3229_v31 = vld [vmem:[%s5027_s3 + $0x118] sm:$0xff]  }
  0x5a   : > { %vm1172_vm13 = vcmp.ne.s32.totalorder %v1012_v13, 0  ;;  %vm1200_vm14 = vcmp.lt.s32.totalorder %v1012_v13, 0  ;;  %v1256_v62 = vadd.s32 14, %v1012_v13  ;;  %v3828_v33 = vmax.f32 %v406_v29, 0.0 }
  0x5b   : > { %vm1228_vm1 = vmand %vm1200_vm14, %vm1172_vm13  ;;  %v3817_v19 = vsel %vm1227_vm15, %v1255_v41, %v998_v60  ;;  %2262 = vmatpush1.bf16.msra.mxu1 %v3220_v56  ;;  %v298_v60 = vunpack.c.h.bf16 %v3812_v63  ;;  %v3842_v45 = vmax.f32 %v408_v53, 0.0 }
  0x5c   : > { %2594 = vmatpush1.bf16.msra.mxu0 %v3225_v43  ;;  %5139 = vst [vmem:[#allocation13_spill] sm:$0xff] %v3817_v19  ;;  %v3825_v54 = vsel %vm1228_vm1, %v1256_v62, %v1012_v13  ;;  %vm1311_vm3 = vcmp.ne.s32.totalorder %v3817_v19, 0  ;;  %v3831_v43 = vld [vmem:[%s3379_s8 + $0x98] sm:$0xff]  ;;  %v662_v13 = vsel %vm594_vm0, %v657_v34, %v5033_v22  ;;  %2263 = vmatprep.subr.bf16.mxu1 %v5044_v1  ;;  %v611_v62 = vrot.slane %v3828_v33, 7 }
  0x5d   : > { %2595 = vmatprep.subr.bf16.mxu0 %v5044_v1  ;;  %5140 = vst [vmem:[#allocation14_spill] sm:$0xff] %v3825_v54  ;;  %vm1312_vm4 = vcmp.ne.s32.totalorder %v3825_v54, 0  ;;  %v2923_v38 = vsel %vm1311_vm3, 1.0, %v5036_v30  ;;  %v5035_v34 = vrot.slane %v3842_v45, 7  ;;  %v300_v53 = vunpack.c.h.bf16 %v3831_v43 }
  0x5e   : > { %v2924_v56 = vsel %vm1312_vm4, 1.0, %v5036_v30  ;;  %v1412_v29 = vmul.f32 %v2923_v38, %v3706_v50  ;;  %v1411_v41 = vmul.f32 %v2923_v38, %v658_v16  ;;  %v3858_v50 = vsel %vm594_vm0, %v607_v17, %v611_v62  ;;  %v3224_v17 = vld [vmem:[%s5027_s3 + $0x98] sm:$0xff]  }
  0x5f   : > { %v1414_v8 = vmul.f32 %v2924_v56, %v3719_v36  ;;  %v1413_v15 = vmul.f32 %v2924_v56, %v662_v13  ;;  %v366_v38 = vmul.f32 %v3412_v25, %v298_v60  ;;  %2264 = vmatpush1.bf16.msra.mxu1 %v3222_v20  ;;  %v3868_v56 = vsel %vm594_vm0, %v611_v62, %v5035_v34 }
  0x60   : > { %2596 = vmatpush1.bf16.msra.mxu0 %v3227_v39  ;;  %v3861_v39 = vmul.u32.u64.low 2454267026, %v3784_v18  ;;  %v3862_v16 = vmul.u32.u64.high 2454267026, %v3784_v18, %v3861_v39  ;;  %v368_v22 = vmul.f32 %v3412_v25, %v300_v53  ;;  %2265 = vmatprep.subr.bf16.mxu1 %v5044_v1  ;;  %v3890_v62 = vadd.s32 152, %v3367_v5 }
  0x61   : > { %2597 = vmatprep.subr.bf16.mxu0 %v5044_v1  ;;  %v1818_v36 = vpack.c.bf16 %v1414_v8, %v1412_v29  ;;  %v1817_v13 = vpack.c.bf16 %v1413_v15, %v1411_v41  ;;  %v3876_v28 = vmul.u32.u64.low 2454267026, %v3799_v14  ;;  %v3877_v60 = vmul.u32.u64.high 2454267026, %v3799_v14, %v3876_v28  ;;  %v3231_v15 = vld [vmem:[%s5027_s3 + $0x120] sm:$0xff]  }
  0x62   : > { %vm825_vm5 = vc.u32 %v3861_v39, 2454267026  ;;  %v434_v8 = vadd.f32 %v3416_v27, %v366_v38  ;;  %v436_v29 = vadd.f32 %v3416_v27, %v368_v22  ;;  %v3887_v41 = vadd.s32 144, %v3367_v5 }
  0x63   : > { %3013 = vmatprep.mubr.msk.bf16.mxu1 %vm1941_vm9, %v1818_v36  ;;  %v826_v20 = vsel %vm825_vm5, 1, %v5044_v1  ;;  %vm839_vm6 = vc.u32 %v3876_v28, 2454267026  ;;  %v269_v39 = vunpack.c.l.bf16 %v3756_v46  ;;  %2266 = vmatpush1.bf16.msra.mxu1 %v3224_v17  ;;  %v271_v46 = vunpack.c.l.bf16 %v3759_v55 }
  0x64   : > { %2598 = vmatpush1.bf16.msra.mxu0 %v3229_v31  ;;  %2081 = vmatmul.mubr.bf16.gmra.mrb[4].mxu1 %v1817_v13  ;;  %v827_v31 = vadd.s32 %v3862_v16, %v826_v20  ;;  %v3894_v53 = vmax.f32 %v434_v8, 0.0  ;;  %v840_v38 = vsel %vm839_vm6, 1, %v5044_v1  ;;  %v3898_v36 = vmax.f32 %v436_v29, 0.0  ;;  %v3226_v13 = vld [vmem:[%s5027_s3 + $0xa0] sm:$0xff]   ;;  %v3233_v8 = vld [vmem:[%s5027_s3 + $0x128] sm:$0xff]  }
  0x65   : > { %2599 = vmatprep.subr.bf16.mxu0 %v5044_v1  ;;  %v3901_v22 = vmul.u32.u64.low 2454267026, %v3887_v41  ;;  %v3902_v34 = vmul.u32.u64.high 2454267026, %v3887_v41, %v3901_v22  ;;  %v841_v28 = vadd.s32 %v3877_v60, %v840_v38  ;;  %2267 = vmatprep.subr.bf16.mxu1 %v5044_v1  ;;  %v337_v54 = vmul.f32 %v3410_v24, %v269_v39 }
  0x66   : > { %5141 = vst [vmem:[#allocation15_spill] sm:$0xff] %v3894_v53  ;;  %5142 = vst [vmem:[#allocation16_spill] sm:$0xff] %v3898_v36  ;;  %v828_v30 = vshrl.u32 %v827_v31, 3  ;;  %v667_v16 = vrot.slane %v3894_v53, 7  ;;  %v5042_v17 = vrot.slane %v3898_v36, 7  ;;  %v339_v53 = vmul.f32 %v3410_v24, %v271_v46 }
  0x67   : > { %vm1021_vm7 = vc.u32 %v3901_v22, 2454267026  ;;  %v3916_v20 = vmul.u32.u64.low 2454267026, %v3890_v62  ;;  %v3917_v29 = vmul.u32.u64.high 2454267026, %v3890_v62, %v3916_v20  ;;  %v842_v31 = vshrl.u32 %v841_v28, 3  ;;  %2268 = vmatpush1.bf16.msra.mxu1 %v3226_v13 }
  0x68   : > { %2600 = vmatpush1.bf16.msra.mxu0 %v3231_v15  ;;  %v829_v60 = vmul.u32 14, %v828_v30  ;;  %v3923_v55 = vsel %vm594_vm0, %v663_v2, %v667_v16  ;;  %v1022_v15 = vsel %vm1021_vm7, 1, %v5044_v1  ;;  %v3929_v38 = vsel %vm594_vm0, %v667_v16, %v5042_v17  ;;  %v3228_v30 = vld [vmem:[%s5027_s3 + $0xa8] sm:$0xff]   ;;  %2269 = vmatprep.subr.bf16.mxu1 %v5044_v1  ;;  %v3995_v17 = vld [vmem:[%s3379_s8 + $0x38] sm:$0xff] }
  0x69   : > { %2601 = vmatprep.subr.bf16.mxu0 %v5044_v1  ;;  %v1023_v22 = vadd.s32 %v3902_v34, %v1022_v15  ;;  %vm1035_vm8 = vc.u32 %v3916_v20, 2454267026  ;;  %v843_v28 = vmul.u32 14, %v842_v31  ;;  %v3235_v34 = vld [vmem:[%s5027_s3 + $0x130] sm:$0xff]   ;;  %v405_v16 = vadd.f32 %v3414_v26, %v337_v54 }
  0x6a   : > { %v830_v2 = vsub.s32 %v3784_v18, %v829_v60  ;;  %v1036_v19 = vsel %vm1035_vm8, 1, %v5044_v1  ;;  %v297_v20 = vunpack.c.l.bf16 %v3812_v63  ;;  %v407_v31 = vadd.f32 %v3414_v26, %v339_v53 }
  0x6b   : > { %v1024_v39 = vshrl.u32 %v1023_v22, 3  ;;  %v1037_v13 = vadd.s32 %v3917_v29, %v1036_v19  ;;  %v844_v18 = vsub.s32 %v3799_v14, %v843_v28  ;;  %v3949_v15 = vmax.f32 %v405_v16, 0.0  ;;  %2270 = vmatpush1.bf16.msra.mxu1 %v3228_v30  ;;  %v3230_v19 = vld [vmem:[%s5027_s3 + $0xb0] sm:$0xff]   ;;  %v3237_v14 = vld [vmem:[%s5027_s3 + $0x138] sm:$0xff]  }
  0x6c   : > { %2602 = vmatpush1.bf16.msra.mxu0 %v3233_v8  ;;  %vm1159_vm10 = vcmp.ne.s32.totalorder %v830_v2, 0  ;;  %vm1187_vm11 = vcmp.lt.s32.totalorder %v830_v2, 0  ;;  %v1243_v46 = vadd.s32 14, %v830_v2  ;;  %2271 = vmatprep.subr.bf16.mxu1 %v5044_v1  ;;  %v3962_v22 = vmax.f32 %v407_v31, 0.0 }
  0x6d   : > { %2603 = vmatprep.subr.bf16.mxu0 %v5044_v1  ;;  %vm1215_vm12 = vmand %vm1187_vm11, %vm1159_vm10  ;;  %v1025_v8 = vmul.u32 14, %v1024_v39  ;;  %v1038_v60 = vshrl.u32 %v1037_v13, 3  ;;  %vm1160_vm13 = vcmp.ne.s32.totalorder %v844_v18, 0  ;;  %vm1188_vm14 = vcmp.lt.s32.totalorder %v844_v18, 0 }
  0x6e   : > { %v1244_v63 = vadd.s32 14, %v844_v18  ;;  %v3954_v54 = vsel %vm1215_vm12, %v1243_v46, %v830_v2  ;;  %vm1216_vm15 = vmand %vm1188_vm14, %vm1160_vm13  ;;  %v5143_v2 = vmov 0.0   ;;  %v299_v39 = vunpack.c.l.bf16 %v3831_v43 }
  0x6f   : > { %vm1299_vm1 = vcmp.ne.s32.totalorder %v3954_v54, 0  ;;  %v1026_v53 = vsub.s32 %v3887_v41, %v1025_v8  ;;  %v1039_v29 = vmul.u32 14, %v1038_v60  ;;  %2272 = vmatpush1.bf16.msra.mxu1 %v3230_v19  ;;  %v3232_v41 = vld [vmem:[%s5027_s3 + $0xb8] sm:$0xff]   ;;  %v5144_v8 = vrot.slane %v3769_v21, 7 }
  0x70   : > { %2604 = vmatpush1.bf16.msra.mxu0 %v3235_v34  ;;  %v3965_v30 = vsel %vm1216_vm15, %v1244_v63, %v844_v18  ;;  %v2911_v28 = vsel %vm1299_vm1, 1.0, %v5143_v2  ;;  %v609_v34 = vrot.slane %v3949_v15, 7  ;;  %2273 = vmatprep.subr.bf16.mxu1 %v5044_v1  ;;  %v5043_v31 = vrot.slane %v3962_v22, 7 }
  0x71   : > { %2605 = vmatprep.subr.bf16.mxu0 %v5044_v1  ;;  %vm1300_vm3 = vcmp.ne.s32.totalorder %v3965_v30, 0  ;;  %v1388_v13 = vmul.f32 %v2911_v28, %v3858_v50  ;;  %v1040_v16 = vsub.s32 %v3890_v62, %v1039_v29  ;;  %vm1173_vm4 = vcmp.ne.s32.totalorder %v1026_v53, 0 }
  0x72   : > { %v2912_v18 = vsel %vm1300_vm3, 1.0, %v5143_v2  ;;  %vm1201_vm5 = vcmp.lt.s32.totalorder %v1026_v53, 0  ;;  %v1257_v46 = vadd.s32 14, %v1026_v53  ;;  %v610_v43 = vsel %vm594_vm0, %v5144_v8, %v609_v34  ;;  %v3992_v8 = vld [vmem:[%s3379_s8 + $0x30] sm:$0xff] }
  0x73   : > { %v1390_v50 = vmul.f32 %v2912_v18, %v3868_v56  ;;  %vm1174_vm6 = vcmp.ne.s32.totalorder %v1040_v16, 0  ;;  %vm1202_vm7 = vcmp.lt.s32.totalorder %v1040_v16, 0  ;;  %vm1229_vm8 = vmand %vm1201_vm5, %vm1173_vm4  ;;  %v1258_v62 = vadd.s32 14, %v1040_v16  ;;  %2274 = vmatpush1.bf16.msra.mxu1 %v3232_v41 }
  0x74   : > { %2606 = vmatpush1.bf16.msra.mxu0 %v3237_v14  ;;  %vm1230_vm10 = vmand %vm1202_vm7, %vm1174_vm6  ;;  %v3983_v60 = vsel %vm1229_vm8, %v1257_v46, %v1026_v53  ;;  %v1387_v19 = vmul.f32 %v2911_v28, %v610_v43  ;;  %v365_v63 = vmul.f32 %v3410_v24, %v297_v20  ;;  %v367_v56 = vmul.f32 %v3410_v24, %v299_v39  ;;  %v3234_v53 = vld [vmem:[%s5027_s3 + $0xc0] sm:$0xff]  }
  0x75   : > { %2607 = vmatprep.subr.bf16.mxu0 %v5044_v1  ;;  %5145 = vst [vmem:[#allocation17_spill] sm:$0xff] %v3983_v60  ;;  %v1806_v29 = vpack.c.bf16 %v1390_v50, %v1388_v13  ;;  %v3987_v14 = vsel %vm1230_vm10, %v1258_v62, %v1040_v16  ;;  %vm1313_vm11 = vcmp.ne.s32.totalorder %v3983_v60, 0  ;;  %v614_v28 = vsel %vm594_vm0, %v609_v34, %v5043_v31  ;;  %v3239_v13 = vld [vmem:[%s5027_s3 + $0x140] sm:$0xff]  }
  0x76   : > { %5146 = vst [vmem:[#allocation18_spill] sm:$0xff] %v3987_v14  ;;  %vm1314_vm12 = vcmp.ne.s32.totalorder %v3987_v14, 0  ;;  %v2925_v20 = vsel %vm1313_vm11, 1.0, %v5143_v2  ;;  %v433_v39 = vadd.f32 %v3414_v26, %v365_v63  ;;  %2275 = vmatprep.subr.bf16.mxu1 %v5044_v1  ;;  %v1389_v46 = vmul.f32 %v2912_v18, %v614_v28  ;;  %v4020_v31 = vld [vmem:[%s3379_s8 + $0xa0] sm:$0xff]  ;;  %v3236_v28 = vld [vmem:[%s5027_s3 + $0xc8] sm:$0xff]  }
  0x77   : > { %3007 = vmatprep.mubr.msk.bf16.mxu0 %vm1941_vm9, %v1806_v29  ;;  %v2926_v16 = vsel %vm1314_vm12, 1.0, %v5143_v2  ;;  %v1416_v41 = vmul.f32 %v2925_v20, %v3923_v55  ;;  %v435_v43 = vadd.f32 %v3414_v26, %v367_v56  ;;  %v274_v62 = vunpack.c.h.bf16 %v3992_v8  ;;  %v3241_v29 = vld [vmem:[%s5027_s3 + $0x148] sm:$0xff]   ;;  %2276 = vmatpush1.bf16.msra.mxu1 %v3234_v53 }
  0x78   : > { %v1418_v34 = vmul.f32 %v2926_v16, %v3929_v38  ;;  %v4015_v50 = vmax.f32 %v433_v39, 0.0  ;;  %v276_v63 = vunpack.c.h.bf16 %v3995_v17  ;;  %2608 = vmatpush1.bf16.msra.mxu0 %v3239_v13  ;;  %v1805_v1 = vpack.c.bf16 %v1389_v46, %v1387_v19  ;;  %v4032_v56 = vld [vmem:[%s3379_s8 + $0xa8] sm:$0xff] }
  0x79   : > { %v4025_v55 = vmax.f32 %v435_v43, 0.0  ;;  %v516_v18 = vadd.s32 48, %v3367_v5  ;;  %v4029_v38 = vadd.s32 56, %v3367_v5  ;;  %v5149_v39 = vmov 0  }
  0x7a   : > { %5147 = vst [vmem:[#allocation19_spill] sm:$0xff] %v4015_v50  ;;  %2609 = vmatprep.subr.bf16.mxu0 %v5149_v39  ;;  %v1820_v13 = vpack.c.bf16 %v1418_v34, %v1416_v41  ;;  %v665_v14 = vrot.slane %v4015_v50, 7  ;;  %v342_v19 = vmul.f32 %v3412_v25, %v274_v62  ;;  %v344_v46 = vmul.f32 %v3412_v25, %v276_v63 }
  0x7b   : > { %5148 = vst [vmem:[#allocation20_spill] sm:$0xff] %v4025_v55  ;;  %2277 = vmatprep.subr.bf16.mxu1 %v5149_v39  ;;  %2033 = vmatmul.mubr.bf16.gmra.mrb[8].mxu0 %v1805_v1  ;;  %v5056_v43 = vrot.slane %v4025_v55, 7  ;;  %v4043_v60 = vmul.u32.u64.low 2454267026, %v516_v18  ;;  %v4044_v53 = vmul.u32.u64.high 2454267026, %v516_v18, %v4043_v60  ;;  %v302_v23 = vunpack.c.h.bf16 %v4020_v31 }
  0x7c   : > { %3014 = vmatprep.mubr.msk.bf16.mxu1 %vm1941_vm9, %v1820_v13  ;;  %v5150_v41 = vrot.slane %v3803_v58, 7  ;;  %v410_v62 = vadd.f32 %v3416_v27, %v342_v19  ;;  %v412_v63 = vadd.f32 %v3416_v27, %v344_v46  ;;  %v304_v50 = vunpack.c.h.bf16 %v4032_v56  ;;  %2610 = vmatpush1.bf16.msra.mxu0 %v3241_v29  ;;  %v3238_v13 = vld [vmem:[%s5027_s3 + $0xd0] sm:$0xff]  }
  0x7d   : > { %v670_v1 = vsel %vm594_vm0, %v665_v14, %v5056_v43  ;;  %vm853_vm13 = vc.u32 %v4043_v60, 2454267026  ;;  %v370_v11 = vmul.f32 %v3412_v25, %v302_v23  ;;  %2278 = vmatpush1.bf16.msra.mxu1 %v3236_v28  ;;  %v4078_v43 = vadd.s32 160, %v3367_v5 }
  0x7e   : > { %v666_v34 = vsel %vm594_vm0, %v5150_v41, %v665_v14  ;;  %v1417_v41 = vmul.f32 %v2926_v16, %v670_v1  ;;  %v4061_v19 = vmax.f32 %v410_v62, 0.0  ;;  %v4063_v46 = vmax.f32 %v412_v63, 0.0  ;;  %2279 = vmatprep.subr.bf16.mxu1 %v5149_v39 }
  0x7f   : > { %v1415_v57 = vmul.f32 %v2925_v20, %v666_v34  ;;  %v854_v29 = vsel %vm853_vm13, 1, %v5149_v39  ;;  %v4069_v60 = vmul.u32.u64.low 2454267026, %v4029_v38  ;;  %v4070_v20 = vmul.u32.u64.high 2454267026, %v4029_v38, %v4069_v60 }
  0x80   : > { %5151 = vst [vmem:[#allocation21_spill] sm:$0xff] %v4063_v46  ;;  %v855_v14 = vadd.s32 %v4044_v53, %v854_v29  ;;  %v372_v23 = vmul.f32 %v3412_v25, %v304_v50  ;;  %v619_v34 = vrot.slane %v4061_v19, 7  ;;  %v5059_v16 = vrot.slane %v4063_v46, 7  ;;  %v3240_v53 = vld [vmem:[%s5027_s3 + $0xd8] sm:$0xff]  }
  0x81   : > { %v1819_v28 = vpack.c.bf16 %v1417_v41, %v1415_v57  ;;  %v438_v62 = vadd.f32 %v3416_v27, %v370_v11  ;;  %vm867_vm14 = vc.u32 %v4069_v60, 2454267026  ;;  %2280 = vmatpush1.bf16.msra.mxu1 %v3238_v13  ;;  %v5152_v57 = vrot.slane %v3842_v45, 7 }
  0x82   : > { %v856_v63 = vshrl.u32 %v855_v14, 3  ;;  %v440_v1 = vadd.f32 %v3416_v27, %v372_v23  ;;  %v624_v11 = vsel %vm594_vm0, %v619_v34, %v5059_v16  ;;  %v868_v41 = vsel %vm867_vm14, 1, %v5149_v39  ;;  %2281 = vmatprep.subr.bf16.mxu1 %v5149_v39 }
  0x83   : > { %2089 = vmatmul.mubr.bf16.gmra.mrb[8].mxu1 %v1819_v28  ;;  %v620_v50 = vsel %vm594_vm0, %v5152_v57, %v619_v34  ;;  %v4090_v29 = vmax.f32 %v438_v62, 0.0  ;;  %v869_v14 = vadd.s32 %v4070_v20, %v868_v41  ;;  %v531_v23 = vadd.s32 168, %v3367_v5 }
  0x84   : > { %v857_v13 = vmul.u32 14, %v856_v63  ;;  %v4094_v60 = vmax.f32 %v440_v1, 0.0  ;;  %v4099_v57 = vmul.u32.u64.low 2454267026, %v4078_v43  ;;  %v4100_v58 = vmul.u32.u64.high 2454267026, %v4078_v43, %v4099_v57 }
  0x85   : > { %5153 = vst [vmem:[#allocation22_spill] sm:$0xff] %v4090_v29  ;;  %v675_v28 = vrot.slane %v4090_v29, 7  ;;  %v273_v34 = vunpack.c.l.bf16 %v3992_v8  ;;  %v870_v62 = vshrl.u32 %v869_v14, 3  ;;  %v275_v63 = vunpack.c.l.bf16 %v3995_v17  ;;  %2282 = vmatpush1.bf16.msra.mxu1 %v3240_v53 }
  0x86   : > { %5154 = vst [vmem:[#allocation23_spill] sm:$0xff] %v4094_v60  ;;  %v858_v16 = vsub.s32 %v516_v18, %v857_v13  ;;  %v5066_v7 = vrot.slane %v4094_v60, 7  ;;  %v5155_v20 = vrot.slane %v3898_v36, 7  ;;  %vm1049_vm15 = vc.u32 %v4099_v57, 2454267026 }
  0x87   : > { %v4110_v41 = vmul.u32.u64.low 2454267026, %v531_v23  ;;  %v4111_v29 = vmul.u32.u64.high 2454267026, %v531_v23, %v4110_v41  ;;  %v871_v4 = vmul.u32 14, %v870_v62  ;;  %v1050_v17 = vsel %vm1049_vm15, 1, %v5149_v39 }
  0x88   : > { %v4108_v1 = vsel %vm594_vm0, %v5155_v20, %v675_v28  ;;  %vm1161_vm1 = vcmp.ne.s32.totalorder %v858_v16, 0  ;;  %vm1189_vm3 = vcmp.lt.s32.totalorder %v858_v16, 0  ;;  %v1245_v8 = vadd.s32 14, %v858_v16 }
  0x89   : > { %vm1217_vm4 = vmand %vm1189_vm3, %vm1161_vm1  ;;  %v4116_v18 = vsel %vm594_vm0, %v675_v28, %v5066_v7  ;;  %vm1063_vm5 = vc.u32 %v4110_v41, 2454267026  ;;  %v341_v53 = vmul.f32 %v3410_v24, %v273_v34  ;;  %v872_v13 = vsub.s32 %v4029_v38, %v871_v4 }
  0x8a   : > { %v4121_v14 = vsel %vm1217_vm4, %v1245_v8, %v858_v16  ;;  %v1051_v57 = vadd.s32 %v4100_v58, %v1050_v17  ;;  %v1064_v62 = vsel %vm1063_vm5, 1, %v5149_v39  ;;  %v343_v28 = vmul.f32 %v3410_v24, %v275_v63 }
  0x8b   : > { %5156 = vst [vmem:[#allocation24_spill] sm:$0xff] %v4121_v14  ;;  %vm1301_vm6 = vcmp.ne.s32.totalorder %v4121_v14, 0  ;;  %v1065_v20 = vadd.s32 %v4111_v29, %v1064_v62  ;;  %v409_v7 = vadd.f32 %v3414_v26, %v341_v53  ;;  %vm1162_vm7 = vcmp.ne.s32.totalorder %v872_v13, 0 }
  0x8c   : > { %vm1190_vm8 = vcmp.lt.s32.totalorder %v872_v13, 0  ;;  %v1246_v34 = vadd.s32 14, %v872_v13  ;;  %v2913_v4 = vsel %vm1301_vm6, 1.0, %v5143_v2  ;;  %v1052_v16 = vshrl.u32 %v1051_v57, 3 }
  0x8d   : > { %vm1218_vm10 = vmand %vm1190_vm8, %vm1162_vm7  ;;  %v1392_v38 = vmul.f32 %v2913_v4, %v620_v50  ;;  %v1066_v58 = vshrl.u32 %v1065_v20, 3  ;;  %v411_v41 = vadd.f32 %v3414_v26, %v343_v28  ;;  %v4133_v17 = vmax.f32 %v409_v7, 0.0 }
  0x8e   : > { %v4131_v8 = vsel %vm1218_vm10, %v1246_v34, %v872_v13  ;;  %v301_v29 = vunpack.c.l.bf16 %v4020_v31  ;;  %v303_v63 = vunpack.c.l.bf16 %v4032_v56  ;;  %v1053_v53 = vmul.u32 14, %v1052_v16 }
  0x8f   : > { %5157 = vst [vmem:[#allocation25_spill] sm:$0xff] %v4131_v8  ;;  %vm1302_vm11 = vcmp.ne.s32.totalorder %v4131_v8, 0  ;;  %v1067_v62 = vmul.u32 14, %v1066_v58  ;;  %v4138_v36 = vmax.f32 %v411_v41, 0.0  ;;  %v617_v13 = vrot.slane %v4133_v17, 7 }
  0x90   : > { %v2914_v50 = vsel %vm1302_vm11, 1.0, %v5143_v2  ;;  %v369_v7 = vmul.f32 %v3410_v24, %v301_v29  ;;  %v371_v57 = vmul.f32 %v3410_v24, %v303_v63  ;;  %v1054_v56 = vsub.s32 %v4078_v43, %v1053_v53 }
  0x91   : > { %v1394_v31 = vmul.f32 %v2914_v50, %v624_v11  ;;  %v1068_v20 = vsub.s32 %v531_v23, %v1067_v62  ;;  %v5074_v28 = vrot.slane %v4138_v36, 7  ;;  %v5158_v34 = vrot.slane %v3962_v22, 7  ;;  %v4156_v11 = vld [vmem:[%s3379_s8 + $0x48] sm:$0xff] }
  0x92   : > { %v437_v58 = vadd.f32 %v3414_v26, %v369_v7  ;;  %v439_v41 = vadd.f32 %v3414_v26, %v371_v57  ;;  %vm1175_vm12 = vcmp.ne.s32.totalorder %v1054_v56, 0  ;;  %vm1203_vm14 = vcmp.lt.s32.totalorder %v1054_v56, 0 }
  0x93   : > { %v618_v16 = vsel %vm594_vm0, %v5158_v34, %v617_v13  ;;  %v1808_v59 = vpack.c.bf16 %v1394_v31, %v1392_v38  ;;  %vm1176_vm13 = vcmp.ne.s32.totalorder %v1068_v20, 0  ;;  %vm1204_vm15 = vcmp.lt.s32.totalorder %v1068_v20, 0  ;;  %vm1231_vm1 = vmand %vm1203_vm14, %vm1175_vm12 }
  0x94   : > { %v1259_v43 = vadd.s32 14, %v1054_v56  ;;  %v1260_v23 = vadd.s32 14, %v1068_v20  ;;  %v622_v29 = vsel %vm594_vm0, %v617_v13, %v5074_v28  ;;  %vm1232_vm3 = vmand %vm1204_vm15, %vm1176_vm13  ;;  %v1391_v63 = vmul.f32 %v2913_v4, %v618_v16 }
  0x95   : > { %3008 = vmatprep.mubr.msk.bf16.mxu0 %vm1941_vm9, %v1808_v59  ;;  %v1393_v53 = vmul.f32 %v2914_v50, %v622_v29  ;;  %v4162_v62 = vmax.f32 %v437_v58, 0.0  ;;  %v4164_v38 = vmax.f32 %v439_v41, 0.0  ;;  %v280_v31 = vunpack.c.h.bf16 %v4156_v11 }
  0x96   : > { %v4166_v7 = vsel %vm1231_vm1, %v1259_v43, %v1054_v56  ;;  %v4168_v57 = vsel %vm1232_vm3, %v1260_v23, %v1068_v20  ;;  %v346_v34 = vmul.f32 %v3412_v25, %v278_v9  ;;  %v5163_v58 = vrot.slane %v4025_v55, 7  ;;  %v4186_v23 = vld [vmem:[%s3379_s8 + $0xb0] sm:$0xff] }
  0x97   : > { %5159 = vst [vmem:[#allocation26_spill] sm:$0xff] %v4162_v62  ;;  %5160 = vst [vmem:[#allocation27_spill] sm:$0xff] %v4164_v38  ;;  %vm1315_vm4 = vcmp.ne.s32.totalorder %v4166_v7, 0  ;;  %vm1316_vm5 = vcmp.ne.s32.totalorder %v4168_v57, 0  ;;  %v1807_v59 = vpack.c.bf16 %v1393_v53, %v1391_v63  ;;  %v673_v4 = vrot.slane %v4162_v62, 7 }
  0x98   : > { %5161 = vst [vmem:[#allocation28_spill] sm:$0xff] %v4166_v7  ;;  %5162 = vst [vmem:[#allocation29_spill] sm:$0xff] %v4168_v57  ;;  %v2927_v50 = vsel %vm1315_vm4, 1.0, %v5143_v2  ;;  %v2928_v13 = vsel %vm1316_vm5, 1.0, %v5143_v2  ;;  %v5077_v56 = vrot.slane %v4164_v38, 7  ;;  %v348_v20 = vmul.f32 %v3412_v25, %v280_v31 }
  0x99   : > { %v1420_v16 = vmul.f32 %v2927_v50, %v4108_v1  ;;  %v1422_v9 = vmul.f32 %v2928_v13, %v4116_v18  ;;  %2041 = vmatmul.mubr.bf16.gmra.mrb[12].mxu0 %v1807_v59  ;;  %v674_v41 = vsel %vm594_vm0, %v5163_v58, %v673_v4  ;;  %v414_v43 = vadd.f32 %v3416_v27, %v346_v34  ;;  %v4197_v58 = vld [vmem:[%s3379_s8 + $0xb8] sm:$0xff] }
  0x9a   : > { %v678_v29 = vsel %vm594_vm0, %v673_v4, %v5077_v56  ;;  %v1419_v63 = vmul.f32 %v2927_v50, %v674_v41  ;;  %v416_v53 = vadd.f32 %v3416_v27, %v348_v20  ;;  %v518_v1 = vadd.s32 64, %v3367_v5 }
  0x9b   : > { %v1822_v31 = vpack.c.bf16 %v1422_v9, %v1420_v16  ;;  %v1421_v18 = vmul.f32 %v2928_v13, %v678_v29  ;;  %v4193_v59 = vmax.f32 %v414_v43, 0.0  ;;  %v519_v28 = vadd.s32 72, %v3367_v5 }
  0x9c   : > { %v4199_v34 = vmax.f32 %v416_v53, 0.0  ;;  %v4201_v57 = vmul.u32.u64.low 2454267026, %v518_v1  ;;  %v4202_v7 = vmul.u32.u64.high 2454267026, %v518_v1, %v4201_v57  ;;  %v306_v4 = vunpack.c.h.bf16 %v4186_v23 }
  0x9d   : > { %5164 = vst [vmem:[#allocation30_spill] sm:$0xff] %v4193_v59  ;;  %3015 = vmatprep.mubr.msk.bf16.mxu1 %vm1941_vm9, %v1822_v31  ;;  %v1821_v50 = vpack.c.bf16 %v1421_v18, %v1419_v63  ;;  %v627_v20 = vrot.slane %v4193_v59, 7  ;;  %v4207_v16 = vmul.u32.u64.low 2454267026, %v519_v28  ;;  %v4208_v13 = vmul.u32.u64.high 2454267026, %v519_v28, %v4207_v16 }
  0x9e   : > { %v5085_v9 = vrot.slane %v4199_v34, 7  ;;  %vm881_vm6 = vc.u32 %v4201_v57, 2454267026  ;;  %v308_v41 = vunpack.c.h.bf16 %v4197_v58  ;;  %v374_v43 = vmul.f32 %v3412_v25, %v306_v4 }
  0x9f   : > { %2097 = vmatmul.mubr.bf16.gmra.mrb[12].mxu1 %v1821_v50  ;;  %v5165_v29 = vrot.slane %v4063_v46, 7  ;;  %v882_v31 = vsel %vm881_vm6, 1, %v5149_v39  ;;  %vm895_vm7 = vc.u32 %v4207_v16, 2454267026  ;;  %v532_v63 = vadd.s32 176, %v3367_v5 }
  0xa0   : > { %v632_v18 = vsel %vm594_vm0, %v627_v20, %v5085_v9  ;;  %v883_v57 = vadd.s32 %v4202_v7, %v882_v31  ;;  %v896_v56 = vsel %vm895_vm7, 1, %v5149_v39  ;;  %v376_v4 = vmul.f32 %v3412_v25, %v308_v41 }
  0xa1   : > { %v628_v53 = vsel %vm594_vm0, %v5165_v29, %v627_v20  ;;  %v897_v50 = vadd.s32 %v4208_v13, %v896_v56  ;;  %v442_v62 = vadd.f32 %v3416_v27, %v374_v43  ;;  %v533_v29 = vadd.s32 184, %v3367_v5 }
  0xa2   : > { %v277_v16 = vunpack.c.l.bf16 %v4141_v12  ;;  %v884_v55 = vshrl.u32 %v883_v57, 3  ;;  %v444_v0 = vadd.f32 %v3416_v27, %v376_v4  ;;  %v279_v13 = vunpack.c.l.bf16 %v4156_v11 }
  0xa3   : > { %v4229_v8 = vmul.u32.u64.low 2454267026, %v532_v63  ;;  %v4230_v14 = vmul.u32.u64.high 2454267026, %v532_v63, %v4229_v8  ;;  %v898_v20 = vshrl.u32 %v897_v50, 3  ;;  %v4232_v7 = vmax.f32 %v442_v62, 0.0 }
  0xa4   : > { %v4234_v31 = vmul.u32.u64.low 2454267026, %v533_v29  ;;  %v4235_v9 = vmul.u32.u64.high 2454267026, %v533_v29, %v4234_v31  ;;  %v885_v41 = vmul.u32 14, %v884_v55  ;;  %v4237_v56 = vmax.f32 %v444_v0, 0.0 }
  0xa5   : > { %5166 = vst [vmem:[#allocation31_spill] sm:$0xff] %v4232_v7  ;;  %vm1077_vm8 = vc.u32 %v4229_v8, 2454267026  ;;  %v899_v43 = vmul.u32 14, %v898_v20  ;;  %v683_v12 = vrot.slane %v4232_v7, 7  ;;  %v5168_v0 = vrot.slane %v4094_v60, 7 }
  0xa6   : > { %5167 = vst [vmem:[#allocation32_spill] sm:$0xff] %v4237_v56  ;;  %v1078_v57 = vsel %vm1077_vm8, 1, %v5149_v39  ;;  %vm1091_vm10 = vc.u32 %v4234_v31, 2454267026  ;;  %v886_v4 = vsub.s32 %v518_v1, %v885_v41  ;;  %v5090_v50 = vrot.slane %v4237_v56, 7 }
  0xa7   : > { %v1079_v62 = vadd.s32 %v4230_v14, %v1078_v57  ;;  %v1092_v59 = vsel %vm1091_vm10, 1, %v5149_v39  ;;  %v900_v46 = vsub.s32 %v519_v28, %v899_v43  ;;  %v684_v55 = vsel %vm594_vm0, %v5168_v0, %v683_v12 }
  0xa8   : > { %v1093_v8 = vadd.s32 %v4235_v9, %v1092_v59  ;;  %v345_v11 = vmul.f32 %v3410_v24, %v277_v16  ;;  %vm1163_vm11 = vcmp.ne.s32.totalorder %v886_v4, 0  ;;  %vm1191_vm12 = vcmp.lt.s32.totalorder %v886_v4, 0 }
  0xa9   : > { %v1247_v20 = vadd.s32 14, %v886_v4  ;;  %v688_v1 = vsel %vm594_vm0, %v683_v12, %v5090_v50  ;;  %vm1164_vm13 = vcmp.ne.s32.totalorder %v900_v46, 0  ;;  %vm1192_vm14 = vcmp.lt.s32.totalorder %v900_v46, 0  ;;  %vm1219_vm15 = vmand %vm1191_vm12, %vm1163_vm11 }
  0xaa   : > { %v1248_v14 = vadd.s32 14, %v900_v46  ;;  %v1080_v28 = vshrl.u32 %v1079_v62, 3  ;;  %vm1220_vm1 = vmand %vm1192_vm14, %vm1164_vm13  ;;  %v1094_v41 = vshrl.u32 %v1093_v8, 3  ;;  %v347_v59 = vmul.f32 %v3410_v24, %v279_v13 }
  0xab   : > { %v4253_v31 = vsel %vm1219_vm15, %v1247_v20, %v886_v4  ;;  %v413_v9 = vadd.f32 %v3414_v26, %v345_v11  ;;  %v305_v12 = vunpack.c.l.bf16 %v4186_v23 }
  0xac   : > { %5169 = vst [vmem:[#allocation33_spill] sm:$0xff] %v4253_v31  ;;  %v4257_v16 = vsel %vm1220_vm1, %v1248_v14, %v900_v46  ;;  %vm1303_vm3 = vcmp.ne.s32.totalorder %v4253_v31, 0  ;;  %v1081_v43 = vmul.u32 14, %v1080_v28  ;;  %v1095_v62 = vmul.u32 14, %v1094_v41 }
  0xad   : > { %5170 = vst [vmem:[#allocation34_spill] sm:$0xff] %v4257_v16  ;;  %vm1304_vm4 = vcmp.ne.s32.totalorder %v4257_v16, 0  ;;  %v2915_v57 = vsel %vm1303_vm3, 1.0, %v5143_v2  ;;  %v415_v4 = vadd.f32 %v3414_v26, %v347_v59  ;;  %v4265_v20 = vmax.f32 %v413_v9, 0.0 }
  0xae   : > { %v2916_v0 = vsel %vm1304_vm4, 1.0, %v5143_v2  ;;  %v1396_v8 = vmul.f32 %v2915_v57, %v628_v53  ;;  %v1082_v13 = vsub.s32 %v532_v63, %v1081_v43  ;;  %v1096_v11 = vsub.s32 %v533_v29, %v1095_v62 }
  0xaf   : > { %5171 = vst [vmem:[#allocation35_spill] sm:$0xff] %v4265_v20  ;;  %v1398_v46 = vmul.f32 %v2916_v0, %v632_v18  ;;  %v4267_v14 = vmax.f32 %v415_v4, 0.0  ;;  %v307_v28 = vunpack.c.l.bf16 %v4197_v58  ;;  %v625_v50 = vrot.slane %v4265_v20, 7  ;;  %v4284_v4 = vld [vmem:[%s3379_s8 + $0x50] sm:$0xff] }
  0xb0   : > { %vm1177_vm5 = vcmp.ne.s32.totalorder %v1082_v13, 0  ;;  %vm1205_vm6 = vcmp.lt.s32.totalorder %v1082_v13, 0  ;;  %v1261_v23 = vadd.s32 14, %v1082_v13  ;;  %vm1178_vm7 = vcmp.ne.s32.totalorder %v1096_v11, 0 }
  0xb1   : > { %v1810_v41 = vpack.c.bf16 %v1398_v46, %v1396_v8  ;;  %vm1206_vm8 = vcmp.lt.s32.totalorder %v1096_v11, 0  ;;  %vm1233_vm10 = vmand %vm1205_vm6, %vm1177_vm5  ;;  %v1262_v53 = vadd.s32 14, %v1096_v11  ;;  %v5173_v18 = vrot.slane %v4138_v36, 7  ;;  %v4287_v8 = vld [vmem:[%s3379_s8 + $0x58] sm:$0xff] }
  0xb2   : > { %vm1234_vm11 = vmand %vm1206_vm8, %vm1178_vm7  ;;  %v4271_v63 = vsel %vm1233_vm10, %v1261_v23, %v1082_v13  ;;  %v5095_v58 = vrot.slane %v4267_v14, 7  ;;  %v373_v59 = vmul.f32 %v3410_v24, %v305_v12  ;;  %v375_v62 = vmul.f32 %v3410_v24, %v307_v28 }
  0xb3   : > { %5172 = vst [vmem:[#allocation36_spill] sm:$0xff] %v4271_v63  ;;  %v626_v29 = vsel %vm594_vm0, %v5173_v18, %v625_v50  ;;  %3009 = vmatprep.mubr.msk.bf16.mxu0 %vm1941_vm9, %v1810_v41  ;;  %v4279_v9 = vsel %vm1234_vm11, %v1262_v53, %v1096_v11  ;;  %vm1317_vm12 = vcmp.ne.s32.totalorder %v4271_v63, 0  ;;  %v282_v18 = vunpack.c.h.bf16 %v4284_v4 }
  0xb4   : > { %5174 = vst [vmem:[#allocation37_spill] sm:$0xff] %v4279_v9  ;;  %v1395_v43 = vmul.f32 %v2915_v57, %v626_v29  ;;  %vm1318_vm13 = vcmp.ne.s32.totalorder %v4279_v9, 0  ;;  %v2929_v13 = vsel %vm1317_vm12, 1.0, %v5143_v2  ;;  %v630_v12 = vsel %vm594_vm0, %v625_v50, %v5095_v58  ;;  %v4302_v9 = vld [vmem:[%s3379_s8 + $0xc0] sm:$0xff] }
  0xb5   : > { %v441_v46 = vadd.f32 %v3414_v26, %v373_v59  ;;  %v2930_v57 = vsel %vm1318_vm13, 1.0, %v5143_v2  ;;  %v1424_v11 = vmul.f32 %v2929_v13, %v684_v55  ;;  %v1397_v23 = vmul.f32 %v2916_v0, %v630_v12  ;;  %v4311_v55 = vld [vmem:[%s3379_s8 + $0xc8] sm:$0xff] }
  0xb6   : > { %v443_v28 = vadd.f32 %v3414_v26, %v375_v62  ;;  %v1426_v41 = vmul.f32 %v2930_v57, %v688_v1  ;;  %v284_v29 = vunpack.c.h.bf16 %v4287_v8  ;;  %v520_v50 = vadd.s32 80, %v3367_v5 }
  0xb7   : > { %v4297_v53 = vmax.f32 %v441_v46, 0.0  ;;  %v1809_v63 = vpack.c.bf16 %v1397_v23, %v1395_v43  ;;  %v4308_v59 = vadd.s32 88, %v3367_v5  ;;  %v350_v62 = vmul.f32 %v3412_v25, %v282_v18 }
  0xb8   : > { %v4304_v7 = vmax.f32 %v443_v28, 0.0  ;;  %v1824_v0 = vpack.c.bf16 %v1426_v41, %v1424_v11  ;;  %v352_v12 = vmul.f32 %v3412_v25, %v284_v29  ;;  %v310_v28 = vunpack.c.h.bf16 %v4302_v9 }
  0xb9   : > { %5175 = vst [vmem:[#allocation38_spill] sm:$0xff] %v4297_v53  ;;  %v681_v1 = vrot.slane %v4297_v53, 7  ;;  %2049 = vmatmul.mubr.bf16.gmra.mrb[16].mxu0 %v1809_v63  ;;  %v4317_v43 = vmul.u32.u64.low 2454267026, %v520_v50  ;;  %v4318_v23 = vmul.u32.u64.high 2454267026, %v520_v50, %v4317_v43  ;;  %v5177_v58 = vrot.slane %v4164_v38, 7 }
  0xba   : > { %5176 = vst [vmem:[#allocation39_spill] sm:$0xff] %v4304_v7  ;;  %v5106_v46 = vrot.slane %v4304_v7, 7  ;;  %3016 = vmatprep.mubr.msk.bf16.mxu1 %vm1941_vm9, %v1824_v0  ;;  %v418_v41 = vadd.f32 %v3416_v27, %v350_v62  ;;  %v420_v18 = vadd.f32 %v3416_v27, %v352_v12  ;;  %v312_v29 = vunpack.c.h.bf16 %v4311_v55 }
  0xbb   : > { %v682_v11 = vsel %vm594_vm0, %v5177_v58, %v681_v1  ;;  %vm909_vm14 = vc.u32 %v4317_v43, 2454267026  ;;  %v378_v60 = vmul.f32 %v3412_v25, %v310_v28 }
  0xbc   : > { %v686_v63 = vsel %vm594_vm0, %v681_v1, %v5106_v46  ;;  %v1423_v53 = vmul.f32 %v2929_v13, %v682_v11  ;;  %v4332_v0 = vmax.f32 %v418_v41, 0.0  ;;  %v4334_v38 = vmax.f32 %v420_v18, 0.0 }
  0xbd   : > { %v1425_v16 = vmul.f32 %v2930_v57, %v686_v63  ;;  %v910_v58 = vsel %vm909_vm14, 1, %v5149_v39  ;;  %v4339_v12 = vmul.u32.u64.low 2454267026, %v4308_v59  ;;  %v4340_v31 = vmul.u32.u64.high 2454267026, %v4308_v59, %v4339_v12 }
  0xbe   : > { %5178 = vst [vmem:[#allocation40_spill] sm:$0xff] %v4332_v0  ;;  %v911_v62 = vadd.s32 %v4318_v23, %v910_v58  ;;  %v380_v20 = vmul.f32 %v3412_v25, %v312_v29  ;;  %v635_v13 = vrot.slane %v4332_v0, 7  ;;  %v5107_v43 = vrot.slane %v4334_v38, 7 }
  0xbf   : > { %v1823_v1 = vpack.c.bf16 %v1425_v16, %v1423_v53  ;;  %v446_v57 = vadd.f32 %v3416_v27, %v378_v60  ;;  %vm923_vm15 = vc.u32 %v4339_v12, 2454267026  ;;  %v534_v41 = vadd.s32 192, %v3367_v5 }
  0xc0   : > { %v912_v28 = vshrl.u32 %v911_v62, 3  ;;  %v448_v11 = vadd.f32 %v3416_v27, %v380_v20  ;;  %v5179_v23 = vrot.slane %v4199_v34, 7  ;;  %v640_v16 = vsel %vm594_vm0, %v635_v13, %v5107_v43 }
  0xc1   : > { %2105 = vmatmul.mubr.bf16.gmra.mrb[16].mxu1 %v1823_v1  ;;  %v924_v53 = vsel %vm923_vm15, 1, %v5149_v39  ;;  %v4355_v29 = vmax.f32 %v446_v57, 0.0  ;;  %v535_v20 = vadd.s32 200, %v3367_v5  ;;  %v283_v57 = vunpack.c.l.bf16 %v4287_v8 }
  0xc2   : > { %v636_v18 = vsel %vm594_vm0, %v5179_v23, %v635_v13  ;;  %v913_v60 = vmul.u32 14, %v912_v28  ;;  %v925_v63 = vadd.s32 %v4340_v31, %v924_v53  ;;  %v4358_v58 = vmax.f32 %v448_v11, 0.0 }
  0xc3   : > { %5180 = vst [vmem:[#allocation41_spill] sm:$0xff] %v4355_v29  ;;  %v691_v62 = vrot.slane %v4355_v29, 7  ;;  %v4362_v12 = vmul.u32.u64.low 2454267026, %v534_v41  ;;  %v4363_v1 = vmul.u32.u64.high 2454267026, %v534_v41, %v4362_v12  ;;  %v281_v23 = vunpack.c.l.bf16 %v4284_v4 }
  0xc4   : > { %v914_v46 = vsub.s32 %v520_v50, %v913_v60  ;;  %v926_v13 = vshrl.u32 %v925_v63, 3  ;;  %v5112_v43 = vrot.slane %v4358_v58, 7  ;;  %v5181_v28 = vrot.slane %v4237_v56, 7 }
  0xc5   : > { %vm1105_vm1 = vc.u32 %v4362_v12, 2454267026  ;;  %v4373_v11 = vmul.u32.u64.low 2454267026, %v535_v20  ;;  %v4374_v53 = vmul.u32.u64.high 2454267026, %v535_v20, %v4373_v11  ;;  %v349_v50 = vmul.f32 %v3410_v24, %v281_v23 }
  0xc6   : > { %v4371_v31 = vsel %vm594_vm0, %v5181_v28, %v691_v62  ;;  %v927_v29 = vmul.u32 14, %v926_v13  ;;  %vm1165_vm3 = vcmp.ne.s32.totalorder %v914_v46, 0  ;;  %vm1193_vm4 = vcmp.lt.s32.totalorder %v914_v46, 0 }
  0xc7   : > { %v1249_v0 = vadd.s32 14, %v914_v46  ;;  %vm1221_vm5 = vmand %vm1193_vm4, %vm1165_vm3  ;;  %v4379_v4 = vsel %vm594_vm0, %v691_v62, %v5112_v43  ;;  %v1106_v8 = vsel %vm1105_vm1, 1, %v5149_v39  ;;  %vm1119_vm6 = vc.u32 %v4373_v11, 2454267026 }
  0xc8   : > { %v928_v60 = vsub.s32 %v4308_v59, %v927_v29  ;;  %v1107_v12 = vadd.s32 %v4363_v1, %v1106_v8  ;;  %v1120_v13 = vsel %vm1119_vm6, 1, %v5149_v39  ;;  %v351_v62 = vmul.f32 %v3410_v24, %v283_v57 }
  0xc9   : > { %v4384_v63 = vsel %vm1221_vm5, %v1249_v0, %v914_v46  ;;  %v1121_v28 = vadd.s32 %v4374_v53, %v1120_v13  ;;  %v417_v43 = vadd.f32 %v3414_v26, %v349_v50  ;;  %v309_v57 = vunpack.c.l.bf16 %v4302_v9 }
  0xca   : > { %5182 = vst [vmem:[#allocation42_spill] sm:$0xff] %v4384_v63  ;;  %vm1305_vm7 = vcmp.ne.s32.totalorder %v4384_v63, 0  ;;  %vm1166_vm8 = vcmp.ne.s32.totalorder %v928_v60, 0  ;;  %vm1194_vm10 = vcmp.lt.s32.totalorder %v928_v60, 0  ;;  %v1250_v23 = vadd.s32 14, %v928_v60  ;;  %v4404_v63 = vld [vmem:[%s3379_s8 + $0x60] sm:$0xff] }
  0xcb   : > { %v2917_v59 = vsel %vm1305_vm7, 1.0, %v5143_v2  ;;  %vm1222_vm11 = vmand %vm1194_vm10, %vm1166_vm8  ;;  %v1108_v0 = vshrl.u32 %v1107_v12, 3  ;;  %v1122_v29 = vshrl.u32 %v1121_v28, 3  ;;  %v419_v1 = vadd.f32 %v3414_v26, %v351_v62 }
  0xcc   : > { %v1400_v46 = vmul.f32 %v2917_v59, %v636_v18  ;;  %v4394_v11 = vsel %vm1222_vm11, %v1250_v23, %v928_v60  ;;  %v4396_v8 = vmax.f32 %v417_v43, 0.0  ;;  %v311_v53 = vunpack.c.l.bf16 %v4311_v55 }
  0xcd   : > { %5183 = vst [vmem:[#allocation43_spill] sm:$0xff] %v4394_v11  ;;  %vm1306_vm12 = vcmp.ne.s32.totalorder %v4394_v11, 0  ;;  %v1109_v50 = vmul.u32 14, %v1108_v0  ;;  %v1123_v13 = vmul.u32 14, %v1122_v29  ;;  %v4401_v56 = vmax.f32 %v419_v1, 0.0 }
  0xce   : > { %5184 = vst [vmem:[#allocation44_spill] sm:$0xff] %v4396_v8  ;;  %v2918_v18 = vsel %vm1306_vm12, 1.0, %v5143_v2  ;;  %v633_v12 = vrot.slane %v4396_v8, 7  ;;  %v377_v60 = vmul.f32 %v3410_v24, %v309_v57  ;;  %v379_v43 = vmul.f32 %v3410_v24, %v311_v53 }
  0xcf   : > { %v1402_v28 = vmul.f32 %v2918_v18, %v640_v16  ;;  %v1110_v9 = vsub.s32 %v534_v41, %v1109_v50  ;;  %v1124_v62 = vsub.s32 %v535_v20, %v1123_v13  ;;  %v5119_v55 = vrot.slane %v4401_v56, 7 }
  0xd0   : > { %v5185_v23 = vrot.slane %v4267_v14, 7  ;;  %v445_v29 = vadd.f32 %v3414_v26, %v377_v60  ;;  %v447_v1 = vadd.f32 %v3414_v26, %v379_v43  ;;  %v286_v11 = vunpack.c.h.bf16 %v4404_v63 }
  0xd1   : > { %v1812_v8 = vpack.c.bf16 %v1402_v28, %v1400_v46  ;;  %vm1179_vm13 = vcmp.ne.s32.totalorder %v1110_v9, 0  ;;  %vm1180_vm14 = vcmp.ne.s32.totalorder %v1124_v62, 0  ;;  %vm1207_vm15 = vcmp.lt.s32.totalorder %v1110_v9, 0 }
  0xd2   : > { %v634_v0 = vsel %vm594_vm0, %v5185_v23, %v633_v12  ;;  %vm1208_vm1 = vcmp.lt.s32.totalorder %v1124_v62, 0  ;;  %vm1235_vm3 = vmand %vm1207_vm15, %vm1179_vm13  ;;  %v1263_v41 = vadd.s32 14, %v1110_v9  ;;  %v1264_v16 = vadd.s32 14, %v1124_v62 }
  0xd3   : > { %v638_v20 = vsel %vm594_vm0, %v633_v12, %v5119_v55  ;;  %3010 = vmatprep.mubr.msk.bf16.mxu0 %vm1941_vm9, %v1812_v8  ;;  %vm1236_vm4 = vmand %vm1208_vm1, %vm1180_vm14  ;;  %v1399_v57 = vmul.f32 %v2917_v59, %v634_v0  ;;  %v4421_v50 = vmax.f32 %v445_v29, 0.0  ;;  %v4423_v46 = vmax.f32 %v447_v1, 0.0 }
  0xd4   : > { %v1401_v53 = vmul.f32 %v2918_v18, %v638_v20  ;;  %v4425_v13 = vsel %vm1235_vm3, %v1263_v41, %v1110_v9  ;;  %v4427_v60 = vsel %vm1236_vm4, %v1264_v16, %v1124_v62  ;;  %v354_v43 = vmul.f32 %v3412_v25, %v286_v11  ;;  %v4437_v18 = vld [vmem:[%s3379_s8 + $0xd0] sm:$0xff]  ;;  %v4450_v16 = vld [vmem:[%s3379_s8 + $0xd8] sm:$0xff]  ;;  %s2756_s8 = sld [smem:[#allocation2]] }
  0xd5   : > { %5186 = vst [vmem:[#allocation45_spill] sm:$0xff] %v4421_v50  ;;  %5187 = vst [vmem:[#allocation46_spill] sm:$0xff] %v4425_v13  ;;  %v4431_v28 = vadd.s32 96, %v3367_v5  ;;  %vm1319_vm5 = vcmp.ne.s32.totalorder %v4425_v13, 0  ;;  %vm1320_vm6 = vcmp.ne.s32.totalorder %v4427_v60, 0  ;;  %v689_v8 = vrot.slane %v4421_v50, 7 }
  0xd6   : > { %5188 = vst [vmem:[#allocation47_spill] sm:$0xff] %v4427_v60  ;;  %v1811_v59 = vpack.c.bf16 %v1401_v53, %v1399_v57  ;;  %v2931_v12 = vsel %vm1319_vm5, 1.0, %v5143_v2  ;;  %v2932_v9 = vsel %vm1320_vm6, 1.0, %v5143_v2  ;;  %v5124_v62 = vrot.slane %v4423_v46, 7 }
  0xd7   : > { %v422_v11 = vadd.f32 %v3416_v27, %v354_v43  ;;  %v1428_v23 = vmul.f32 %v2931_v12, %v4371_v31  ;;  %v1430_v0 = vmul.f32 %v2932_v9, %v4379_v4  ;;  %v5189_v29 = vrot.slane %v4304_v7, 7 }
  0xd8   : > { %2057 = vmatmul.mubr.bf16.gmra.mrb[20].mxu0 %v1811_v59  ;;  %v523_v41 = vadd.s32 104, %v3367_v5  ;;  %v694_v20 = vsel %vm594_vm0, %v689_v8, %v5124_v62  ;;  %v314_v31 = vunpack.c.h.bf16 %v4437_v18  ;;  %v316_v50 = vunpack.c.h.bf16 %v4450_v16 }
  0xd9   : > { %v690_v1 = vsel %vm594_vm0, %v5189_v29, %v689_v8  ;;  %v4455_v53 = vmax.f32 %v422_v11, 0.0  ;;  %v1826_v43 = vpack.c.bf16 %v1430_v0, %v1428_v23  ;;  %v1429_v4 = vmul.f32 %v2932_v9, %v694_v20 }
  0xda   : > { %v1427_v57 = vmul.f32 %v2931_v12, %v690_v1  ;;  %v4459_v59 = vmul.u32.u64.low 2454267026, %v4431_v28  ;;  %v4460_v55 = vmul.u32.u64.high 2454267026, %v4431_v28, %v4459_v59  ;;  %v382_v12 = vmul.f32 %v3412_v25, %v314_v31 }
  0xdb   : > { %v643_v29 = vrot.slane %v4455_v53, 7  ;;  %v4463_v60 = vmul.u32.u64.low 2454267026, %v523_v41  ;;  %v4464_v13 = vmul.u32.u64.high 2454267026, %v523_v41, %v4463_v60  ;;  %3017 = vmatprep.mubr.msk.bf16.mxu1 %vm1941_vm9, %v1826_v43  ;;  %v536_v11 = vadd.s32 208, %v3367_v5 }
  0xdc   : > { %v1825_v8 = vpack.c.bf16 %v1429_v4, %v1427_v57  ;;  %vm937_vm7 = vc.u32 %v4459_v59, 2454267026  ;;  %v5190_v9 = vrot.slane %v4334_v38, 7  ;;  %v384_v43 = vmul.f32 %v3412_v25, %v316_v50 }
  0xdd   : > { %v938_v0 = vsel %vm937_vm7, 1, %v5149_v39  ;;  %vm951_vm8 = vc.u32 %v4463_v60, 2454267026  ;;  %v450_v57 = vadd.f32 %v3416_v27, %v382_v12  ;;  %v537_v4 = vadd.s32 216, %v3367_v5 }
  0xde   : > { %v644_v23 = vsel %vm594_vm0, %v5190_v9, %v643_v29  ;;  %2113 = vmatmul.mubr.bf16.gmra.mrb[20].mxu1 %v1825_v8  ;;  %v939_v1 = vadd.s32 %v4460_v55, %v938_v0  ;;  %v952_v20 = vsel %vm951_vm8, 1, %v5149_v39  ;;  %v452_v7 = vadd.f32 %v3416_v27, %v384_v43 }
  0xdf   : > { %v953_v31 = vadd.s32 %v4464_v13, %v952_v20  ;;  %v4480_v59 = vmul.u32.u64.low 2454267026, %v536_v11  ;;  %v4481_v62 = vmul.u32.u64.high 2454267026, %v536_v11, %v4480_v59  ;;  %v4484_v60 = vmax.f32 %v450_v57, 0.0 }
  0xe0   : > { %v940_v9 = vshrl.u32 %v939_v1, 3  ;;  %v285_v55 = vunpack.c.l.bf16 %v4404_v63  ;;  %v4487_v0 = vmul.u32.u64.low 2454267026, %v537_v4  ;;  %v4488_v25 = vmul.u32.u64.high 2454267026, %v537_v4, %v4487_v0 }
  0xe1   : > { %5191 = vst [vmem:[#allocation48_spill] sm:$0xff] %v4484_v60  ;;  %v954_v8 = vshrl.u32 %v953_v31, 3  ;;  %vm1133_vm10 = vc.u32 %v4480_v59, 2454267026  ;;  %v4490_v12 = vmax.f32 %v452_v7, 0.0  ;;  %v699_v5 = vrot.slane %v4484_v60, 7 }
  0xe2   : > { %v941_v50 = vmul.u32 14, %v940_v9  ;;  %v1134_v13 = vsel %vm1133_vm10, 1, %v5149_v39  ;;  %vm1147_vm11 = vc.u32 %v4487_v0, 2454267026  ;;  %v353_v27 = vmul.f32 %v3410_v24, %v285_v55 }
  0xe3   : > { %v955_v20 = vmul.u32 14, %v954_v8  ;;  %v1135_v1 = vadd.s32 %v4481_v62, %v1134_v13  ;;  %v5192_v63 = vrot.slane %v3553_v6, 7  ;;  %v5193_v31 = vrot.slane %v4358_v58, 7 }
  0xe4   : > { %v942_v57 = vsub.s32 %v4431_v28, %v941_v50  ;;  %v1148_v59 = vsel %vm1147_vm11, 1, %v5149_v39  ;;  %v421_v62 = vadd.f32 %v3414_v26, %v353_v27  ;;  %v703_v0 = vrot.slane %v4490_v12, 7 }
  0xe5   : > { %v648_v43 = vsel %vm594_vm0, %v643_v29, %v5192_v63  ;;  %v700_v7 = vsel %vm594_vm0, %v5193_v31, %v699_v5  ;;  %v956_v9 = vsub.s32 %v523_v41, %v955_v20  ;;  %v1136_v60 = vshrl.u32 %v1135_v1, 3 }
  0xe6   : > { %v1149_v8 = vadd.s32 %v4488_v25, %v1148_v59  ;;  %vm1167_vm12 = vcmp.ne.s32.totalorder %v942_v57, 0  ;;  %vm1195_vm13 = vcmp.lt.s32.totalorder %v942_v57, 0  ;;  %v1251_v55 = vadd.s32 14, %v942_v57 }
  0xe7   : > { %vm1168_vm14 = vcmp.ne.s32.totalorder %v956_v9, 0  ;;  %vm1196_vm15 = vcmp.lt.s32.totalorder %v956_v9, 0  ;;  %vm1223_vm1 = vmand %vm1195_vm13, %vm1167_vm12  ;;  %v1252_v28 = vadd.s32 14, %v956_v9  ;;  %v1137_v29 = vmul.u32 14, %v1136_v60 }
  0xe8   : > { %vm1224_vm3 = vmand %vm1196_vm15, %vm1168_vm14  ;;  %v4507_v50 = vsel %vm1223_vm1, %v1251_v55, %v942_v57  ;;  %v1150_v39 = vshrl.u32 %v1149_v8, 3  ;;  %v4509_v41 = vmax.f32 %v421_v62, 0.0  ;;  %v313_v25 = vunpack.c.l.bf16 %v4437_v18 }
  0xe9   : > { %v4512_v13 = vsel %vm1224_vm3, %v1252_v28, %v956_v9  ;;  %vm1307_vm4 = vcmp.ne.s32.totalorder %v4507_v50, 0  ;;  %v1138_v20 = vsub.s32 %v536_v11, %v1137_v29  ;;  %v315_v1 = vunpack.c.l.bf16 %v4450_v16 }
  0xea   : > { %vm1308_vm5 = vcmp.ne.s32.totalorder %v4512_v13, 0  ;;  %v2919_v27 = vsel %vm1307_vm4, 1.0, %v5143_v2  ;;  %v1151_v60 = vmul.u32 14, %v1150_v39  ;;  %v641_v63 = vrot.slane %v4509_v41, 7 }
  0xeb   : > { %v2920_v57 = vsel %vm1308_vm5, 1.0, %v5143_v2  ;;  %v1404_v31 = vmul.f32 %v2919_v27, %v644_v23  ;;  %vm1181_vm6 = vcmp.ne.s32.totalorder %v1138_v20, 0  ;;  %vm1209_vm7 = vcmp.lt.s32.totalorder %v1138_v20, 0 }
  0xec   : > { %v1406_v18 = vmul.f32 %v2920_v57, %v648_v43  ;;  %v1152_v59 = vsub.s32 %v537_v4, %v1151_v60  ;;  %vm1237_vm8 = vmand %vm1209_vm7, %vm1181_vm6  ;;  %v1265_v9 = vadd.s32 14, %v1138_v20  ;;  %v5194_v11 = vrot.slane %v4401_v56, 7 }
  0xed   : > { %v5195_v8 = vrot.slane %v3551_v3, 7  ;;  %v381_v28 = vmul.f32 %v3410_v24, %v313_v25  ;;  %v383_v29 = vmul.f32 %v3410_v24, %v315_v1  ;;  %v1439_v24 = vrot.slane %v3446_v48, 1 }
  0xee   : > { %v642_v16 = vsel %vm594_vm0, %v5194_v11, %v641_v63  ;;  %v1814_v23 = vpack.c.bf16 %v1406_v18, %v1404_v31  ;;  %vm1182_vm10 = vcmp.ne.s32.totalorder %v1152_v59, 0  ;;  %vm1210_vm11 = vcmp.lt.s32.totalorder %v1152_v59, 0 }
  0xef   : > { %v646_v62 = vsel %vm594_vm0, %v641_v63, %v5195_v8  ;;  %v1403_v55 = vmul.f32 %v2919_v27, %v642_v16  ;;  %v1266_v43 = vadd.s32 14, %v1152_v59  ;;  %vm1238_vm12 = vmand %vm1210_vm11, %vm1182_vm10  ;;  %v4528_v4 = vsel %vm1237_vm8, %v1265_v9, %v1138_v20 }
  0xf0   : > { %v1405_v39 = vmul.f32 %v2920_v57, %v646_v62  ;;  %v449_v60 = vadd.f32 %v3414_v26, %v381_v28  ;;  %v451_v11 = vadd.f32 %v3414_v26, %v383_v29  ;;  %3011 = vmatprep.mubr.msk.bf16.mxu0 %vm1941_vm9, %v1814_v23  ;;  %v704_v27 = vsel %vm594_vm0, %v699_v5, %v703_v0 }
  0xf1   : > { %v4534_v63 = vsel %vm1238_vm12, %v1266_v43, %v1152_v59  ;;  %vm1321_vm13 = vcmp.ne.s32.totalorder %v4528_v4, 0  ;;  %v1440_v5 = vrot.slane %v3455_v51, 1  ;;  %v1444_v59 = vrot.slane %v3631_v61, 1 }
  0xf2   : > { %vm1322_vm14 = vcmp.ne.s32.totalorder %v4534_v63, 0  ;;  %v2933_v25 = vsel %vm1321_vm13, 1.0, %v5143_v2  ;;  %v1813_v20 = vpack.c.bf16 %v1405_v39, %v1403_v55  ;;  %v4540_v1 = vmax.f32 %v449_v60, 0.0 }
  0xf3   : > { %v2934_v57 = vsel %vm1322_vm14, 1.0, %v5143_v2  ;;  %v1432_v26 = vmul.f32 %v2933_v25, %v700_v7  ;;  %v4543_v31 = vmax.f32 %v451_v11, 0.0  ;;  %v1441_v16 = vsel %vm1435_vm2, %v1439_v24, %v1440_v5 }
  0xf4   : > { %v1434_v0 = vmul.f32 %v2934_v57, %v704_v27  ;;  %2065 = vmatmul.mubr.bf16.gmra.mrb[24].mxu0 %v1813_v20  ;;  %v697_v18 = vrot.slane %v4540_v1, 7  ;;  %v1448_v8 = vrot.slane %v3638_v10, 1  ;;  %v5196_v55 = vrot.slane %v4423_v46, 7 }
  0xf5   : > { %v701_v9 = vrot.slane %v4543_v31, 7  ;;  %v1445_v28 = vsel %vm1435_vm2, %v1440_v5, %v1444_v59  ;;  %v1689_v29 = vmul.f32 %v3505_v32, %v1441_v16  ;;  %v1452_v27 = vrot.slane %v3828_v33, 1 }
  0xf6   : > { %v1828_v62 = vpack.c.bf16 %v1434_v0, %v1432_v26  ;;  %v698_v7 = vsel %vm594_vm0, %v5196_v55, %v697_v18  ;;  %v1691_v39 = vmul.f32 %v3509_v35, %v1445_v28  ;;  %v1449_v60 = vsel %vm1435_vm2, %v1444_v59, %v1448_v8 }
  0xf7   : > { %v702_v23 = vsel %vm594_vm0, %v697_v18, %v701_v9  ;;  %v1431_v43 = vmul.f32 %v2933_v25, %v698_v7  ;;  %vm1606_vm15 = vcmp.ne.s32.totalorder %v3722_v37, 13  ;;  %vm1607_vm1 = vcmp.ne.s32.totalorder %v3725_v44, 13 }
  0xf8   : > { %3018 = vmatprep.mubr.msk.bf16.mxu1 %vm1941_vm9, %v1828_v62  ;;  %v1433_v11 = vmul.f32 %v2934_v57, %v702_v23  ;;  %v1745_v24 = vpack.c.bf16 %v3455_v51, %v3446_v48  ;;  %v2401_v32 = vpack.c.bf16 %v1691_v39, %v1689_v29  ;;  %v2937_v20 = vsel %vm1606_vm15, 1.0, %v5143_v2 }
  0xf9   : > { %v2938_v25 = vsel %vm1607_vm1, 1.0, %v5143_v2  ;;  %v1453_v26 = vsel %vm1435_vm2, %v1448_v8, %v1452_v27  ;;  %v1693_v5 = vmul.f32 %v2937_v20, %v1449_v60  ;;  %v1446_v57 = vrot.slane %v3769_v21, 1  ;;  %v5199_v60 = vld [vmem:[#allocation21_spill] sm:$0xff] }
  0xfa   : > { %v1827_v35 = vpack.c.bf16 %v1433_v11, %v1431_v43  ;;  %3089 = vmatprep.mubr.msk.bf16.mxu0 %vm1941_vm9, %v2401_v32  ;;  %v1695_v0 = vmul.f32 %v2938_v25, %v1453_v26  ;;  %v1450_v37 = vrot.slane %v3949_v15, 1  ;;  %v1456_v44 = vrot.slane %v3842_v45, 1  ;;  %v5200_v32 = vld [vmem:[#allocation30_spill] sm:$0xff] }
  0xfb   : > { %v5197_v48 = vpack.c.bf16 %v3524_v42, %v3518_v40  ;;  %v5198_v51 = vrot.slane %v3457_v52, 1  ;;  %v1460_v59 = vrot.slane %v4061_v19, 1  ;;  %vm1608_vm0 = vcmp.ne.s32.totalorder %v3954_v54, 13 }
  0xfc   : > { %2121 = vmatmul.mubr.bf16.gmra.mrb[24].mxu1 %v1827_v35  ;;  %vm1609_vm3 = vcmp.ne.s32.totalorder %v3965_v30, 13  ;;  %v2403_v9 = vpack.c.bf16 %v1695_v0, %v1693_v5  ;;  %v1451_v16 = vsel %vm1435_vm2, %v1446_v57, %v1450_v37  ;;  %v1457_v62 = vsel %vm1435_vm2, %v1452_v27, %v1456_v44  ;;  %v5202_v35 = vld [vmem:[#allocation25_spill] sm:$0xff] }
  0xfd   : > { %2616 = vmatmul.mubr.bf16.vlgmr.msra.gmra.mrb[28].mxu0 %v5197_v48  ;;  %v1447_v18 = vsel %vm1435_vm2, %v5198_v51, %v1446_v57  ;;  %3033 = vmatprep.mubr.msk.bf16.mxu1 %vm1941_vm9, %v1745_v24  ;;  %v1694_v40 = vmul.f32 %v2938_v25, %v1451_v16  ;;  %v1461_v42 = vsel %vm1435_vm2, %v1456_v44, %v1460_v59  ;;  %v2939_v55 = vsel %vm1608_vm0, 1.0, %v5143_v2  ;;  %v5203_v48 = vld [vmem:[#allocation35_spill] sm:$0xff]  ;;  %v5205_v16 = vld [vmem:[#allocation33_spill] sm:$0xff] }
  0xfe   : > { %v1692_v8 = vmul.f32 %v2937_v20, %v1447_v18  ;;  %v2940_v7 = vsel %vm1609_vm3, 1.0, %v5143_v2  ;;  %v1744_v54 = vpack.c.bf16 %v3448_v49, %v3444_v47  ;;  %3090 = vmatprep.mubr.msk.bf16.mxu0 %vm1941_vm9, %v2403_v9  ;;  %v1697_v30 = vmul.f32 %v2939_v55, %v1457_v62  ;;  %v5201_v47 = vld [vmem:[#allocation24_spill] sm:$0xff] }
  0xff   : > { %v1699_v28 = vmul.f32 %v2940_v7, %v1461_v42  ;;  %v1454_v29 = vrot.slane %v3962_v22, 1  ;;  %v1747_v23 = vpack.c.bf16 %v3638_v10, %v3631_v61  ;;  %v1458_v39 = vrot.slane %v4133_v17, 1 }
 0x100   : > { %v2402_v43 = vpack.c.bf16 %v1694_v40, %v1692_v8  ;;  %v1464_v11 = vrot.slane %v5199_v60, 1  ;;  %v1468_v20 = vrot.slane %v5200_v32, 1  ;;  %vm1610_vm4 = vcmp.ne.s32.totalorder %v5201_v47, 13  ;;  %v5206_v40 = vld [vmem:[#allocation34_spill] sm:$0xff]  ;;  %v5209_v47 = vld [vmem:[#allocation44_spill] sm:$0xff] }
 0x101   : > { %v2405_v27 = vpack.c.bf16 %v1699_v28, %v1697_v30  ;;  %v1455_v24 = vsel %vm1435_vm2, %v1450_v37, %v1454_v29  ;;  %v1459_v49 = vsel %vm1435_vm2, %v1454_v29, %v1458_v39  ;;  %vm1611_vm5 = vcmp.ne.s32.totalorder %v5202_v35, 13 }
 0x102   : > { %v1465_v25 = vsel %vm1435_vm2, %v1460_v59, %v1464_v11  ;;  %v1469_v61 = vsel %vm1435_vm2, %v1464_v11, %v1468_v20  ;;  %v2941_v10 = vsel %vm1610_vm4, 1.0, %v5143_v2  ;;  %v2942_v26 = vsel %vm1611_vm5, 1.0, %v5143_v2  ;;  %v5204_v59 = vld [vmem:[#allocation40_spill] sm:$0xff] }
 0x103   : > { %v1696_v5 = vmul.f32 %v2939_v55, %v1455_v24  ;;  %v1698_v57 = vmul.f32 %v2940_v7, %v1459_v49  ;;  %v1462_v0 = vrot.slane %v4138_v36, 1  ;;  %v1701_v37 = vmul.f32 %v2941_v10, %v1465_v25 }
 0x104   : > { %2288 = vmatmul.mubr.bf16.vlgmr.msra.gmra.mrb[28].mxu1 %v1744_v54  ;;  %v1703_v44 = vmul.f32 %v2942_v26, %v1469_v61  ;;  %v1466_v51 = vrot.slane %v5203_v48, 1  ;;  %v1472_v18 = vrot.slane %v4199_v34, 1  ;;  %v1476_v9 = vrot.slane %v5204_v59, 1 }
 0x105   : > { %2624 = vmatmul.mubr.bf16.gmra.mrb[32].mxu0 %v2402_v43  ;;  %3034 = vmatprep.mubr.msk.bf16.mxu1 %vm1941_vm9, %v1747_v23  ;;  %vm1612_vm6 = vcmp.ne.s32.totalorder %v5205_v16, 13  ;;  %v1746_v8 = vpack.c.bf16 %v3769_v21, %v3457_v52  ;;  %v1463_v62 = vsel %vm1435_vm2, %v1458_v39, %v1462_v0  ;;  %vm1613_vm7 = vcmp.ne.s32.totalorder %v5206_v40, 13 }
 0x106   : > { %3091 = vmatprep.mubr.msk.bf16.mxu0 %vm1941_vm9, %v2405_v27  ;;  %v2404_v42 = vpack.c.bf16 %v1698_v57, %v1696_v5  ;;  %v1467_v55 = vsel %vm1435_vm2, %v1462_v0, %v1466_v51  ;;  %v1473_v7 = vsel %vm1435_vm2, %v1468_v20, %v1472_v18  ;;  %v2943_v54 = vsel %vm1612_vm6, 1.0, %v5143_v2  ;;  %v5207_v27 = vld [vmem:[#allocation42_spill] sm:$0xff]  ;;  %v5210_v0 = vld [vmem:[#allocation9_spill] sm:$0xff] }
 0x107   : > { %v1749_v30 = vpack.c.bf16 %v3842_v45, %v3828_v33  ;;  %v2407_v28 = vpack.c.bf16 %v1703_v44, %v1701_v37  ;;  %v1477_v29 = vsel %vm1435_vm2, %v1472_v18, %v1476_v9  ;;  %v2944_v23 = vsel %vm1613_vm7, 1.0, %v5143_v2  ;;  %v5208_v45 = vld [vmem:[#allocation43_spill] sm:$0xff] }
 0x108   : > { %v1700_v52 = vmul.f32 %v2941_v10, %v1463_v62  ;;  %v1480_v21 = vrot.slane %v4334_v38, 1  ;;  %v1702_v43 = vmul.f32 %v2942_v26, %v1467_v55  ;;  %v1705_v39 = vmul.f32 %v2943_v54, %v1473_v7 }
 0x109   : > { %v1484_v11 = vrot.slane %v4455_v53, 1  ;;  %vm1614_vm8 = vcmp.ne.s32.totalorder %v5207_v27, 13  ;;  %v1707_v24 = vmul.f32 %v2944_v23, %v1477_v29  ;;  %v1470_v20 = vrot.slane %v4267_v14, 1 }
 0x10a   : > { %v1481_v33 = vsel %vm1435_vm2, %v1476_v9, %v1480_v21  ;;  %vm1615_vm10 = vcmp.ne.s32.totalorder %v5208_v45, 13  ;;  %v1474_v49 = vrot.slane %v5209_v47, 1  ;;  %v2945_v35 = vsel %vm1614_vm8, 1.0, %v5143_v2  ;;  %v5216_v45 = vld [vmem:[#allocation5_spill] sm:$0xff] }
 0x10b   : > { %v1485_v25 = vsel %vm1435_vm2, %v1480_v21, %v1484_v11  ;;  %v2946_v61 = vsel %vm1615_vm10, 1.0, %v5143_v2  ;;  %v1709_v10 = vmul.f32 %v2945_v35, %v1481_v33  ;;  %v1754_v5 = vpack.c.bf16 %v4401_v56, %v5209_v47 }
 0x10c   : > { %2296 = vmatmul.mubr.bf16.gmra.mrb[32].mxu1 %v1746_v8  ;;  %v1711_v26 = vmul.f32 %v2946_v61, %v1485_v25  ;;  %v1478_v57 = vrot.slane %v4401_v56, 1  ;;  %vm1618_vm11 = vcmp.ne.s32.totalorder %v5210_v0, 13  ;;  %v1748_v37 = vpack.c.bf16 %v3962_v22, %v3949_v15 }
 0x10d   : > { %2632 = vmatmul.mubr.bf16.gmra.mrb[36].mxu0 %v2404_v42  ;;  %3035 = vmatprep.mubr.msk.bf16.mxu1 %vm1941_vm9, %v1749_v30  ;;  %v1751_v44 = vpack.c.bf16 %v5199_v60, %v4061_v19  ;;  %v1482_v18 = vrot.slane %v4509_v41, 1  ;;  %v2406_v9 = vpack.c.bf16 %v1702_v43, %v1700_v52  ;;  %v1471_v16 = vsel %vm1435_vm2, %v1466_v51, %v1470_v20  ;;  %v5211_v30 = vld [vmem:[#allocation10_spill] sm:$0xff]  ;;  %v5212_v51 = vld [vmem:[#allocation4_spill] sm:$0xff] }
 0x10e   : > { %3092 = vmatprep.mubr.msk.bf16.mxu0 %vm1941_vm9, %v2407_v28  ;;  %v2411_v8 = vpack.c.bf16 %v1711_v26, %v1709_v10  ;;  %v1479_v62 = vsel %vm1435_vm2, %v1474_v49, %v1478_v57  ;;  %v2409_v40 = vpack.c.bf16 %v1707_v24, %v1705_v39  ;;  %v1475_v42 = vsel %vm1435_vm2, %v1470_v20, %v1474_v49  ;;  %v5213_v52 = vld [vmem:[#allocation6_spill] sm:$0xff] }
 0x10f   : > { %v1483_v55 = vsel %vm1435_vm2, %v1478_v57, %v1482_v18  ;;  %v1708_v7 = vmul.f32 %v2945_v35, %v1479_v62  ;;  %vm1619_vm12 = vcmp.ne.s32.totalorder %v5211_v30, 13  ;;  %v2949_v22 = vsel %vm1618_vm11, 1.0, %v5143_v2 }
 0x110   : > { %v1710_v15 = vmul.f32 %v2946_v61, %v1483_v55  ;;  %v1704_v19 = vmul.f32 %v2943_v54, %v1471_v16  ;;  %v1706_v60 = vmul.f32 %v2944_v23, %v1475_v42  ;;  %v1492_v29 = vrot.slane %v5212_v51, 1  ;;  %v5214_v54 = vld [vmem:[#allocation7_spill] sm:$0xff] }
 0x111   : > { %v1496_v21 = vrot.slane %v5213_v52, 1  ;;  %v2950_v43 = vsel %vm1619_vm12, 1.0, %v5143_v2  ;;  %v1750_v39 = vpack.c.bf16 %v4138_v36, %v4133_v17  ;;  %v1488_v27 = vrot.slane %v3553_v6, 1  ;;  %v5215_v23 = vld [vmem:[#allocation3_spill] sm:$0xff] }
 0x112   : > { %v2410_v28 = vpack.c.bf16 %v1710_v15, %v1708_v7  ;;  %v1500_v24 = vrot.slane %v5214_v54, 1  ;;  %vm1616_vm13 = vcmp.ne.s32.totalorder %v4507_v50, 13  ;;  %v1490_v20 = vrot.slane %v5215_v23, 1  ;;  %v5217_v36 = vld [vmem:[#allocation11_spill] sm:$0xff] }
 0x113   : > { %v1497_v33 = vsel %vm1435_vm2, %v1492_v29, %v1496_v21  ;;  %v1494_v49 = vrot.slane %v5216_v45, 1  ;;  %vm1617_vm14 = vcmp.ne.s32.totalorder %v4512_v13, 13  ;;  %v1498_v17 = vrot.slane %v5217_v36, 1 }
 0x114   : > { %2304 = vmatmul.mubr.bf16.gmra.mrb[36].mxu1 %v1748_v37  ;;  %v1501_v25 = vsel %vm1435_vm2, %v1496_v21, %v1500_v24  ;;  %v1717_v35 = vmul.f32 %v2949_v22, %v1497_v33  ;;  %v1753_v61 = vpack.c.bf16 %v4199_v34, %v5200_v32  ;;  %v2408_v10 = vpack.c.bf16 %v1706_v60, %v1704_v19 }
 0x115   : > { %2640 = vmatmul.mubr.bf16.gmra.mrb[40].mxu0 %v2406_v9  ;;  %3036 = vmatprep.mubr.msk.bf16.mxu1 %vm1941_vm9, %v1751_v44  ;;  %v1719_v26 = vmul.f32 %v2950_v43, %v1501_v25  ;;  %v1495_v57 = vsel %vm1435_vm2, %v1490_v20, %v1494_v49  ;;  %v1489_v0 = vsel %vm1435_vm2, %v1484_v11, %v1488_v27  ;;  %v2947_v9 = vsel %vm1616_vm13, 1.0, %v5143_v2 }
 0x116   : > { %3093 = vmatprep.mubr.msk.bf16.mxu0 %vm1941_vm9, %v2409_v40  ;;  %v1493_v37 = vsel %vm1435_vm2, %v1488_v27, %v1492_v29  ;;  %v1499_v13 = vsel %vm1435_vm2, %v1494_v49, %v1498_v17  ;;  %v4673_v44 = vmul.f32 %v2949_v22, %v1495_v57  ;;  %v2948_v34 = vsel %vm1617_vm14, 1.0, %v5143_v2  ;;  %v5220_v27 = vld [vmem:[#allocation13_spill] sm:$0xff] }
 0x117   : > { %v2415_v32 = vpack.c.bf16 %v1719_v26, %v1717_v35  ;;  %v4679_v16 = vmul.f32 %v2950_v43, %v1499_v13  ;;  %v1713_v62 = vmul.f32 %v2947_v9, %v1489_v0  ;;  %v1715_v40 = vmul.f32 %v2948_v34, %v1493_v37  ;;  %v5218_v43 = vld [vmem:[#allocation8_spill] sm:$0xff]  ;;  %v5223_v0 = vld [vmem:[#allocation19_spill] sm:$0xff]  ;;  %v5225_v13 = vld [vmem:[#allocation22_spill] sm:$0xff] }
 0x118   : > { %v1486_v42 = vrot.slane %v3551_v3, 1  ;;  %v1752_v30 = vpack.c.bf16 %v4267_v14, %v5203_v48  ;;  %v1755_v22 = vpack.c.bf16 %v4334_v38, %v5204_v59  ;;  %v5219_v14 = vld [vmem:[#allocation15_spill] sm:$0xff]  ;;  %vm1620_vm15 = vcmp.ne.s32.totalorder %v5220_v27, 13  ;;  %v5221_v38 = vld [vmem:[#allocation14_spill] sm:$0xff]  ;;  %v5222_v26 = vld [vmem:[#allocation12_spill] sm:$0xff] }
 0x119   : > { %v2414_v11 = vpack.c.bf16 %v4679_v16, %v4673_v44  ;;  %v2413_v19 = vpack.c.bf16 %v1715_v40, %v1713_v62  ;;  %v1508_v48 = vrot.slane %v5219_v14, 1  ;;  %vm1621_vm1 = vcmp.ne.s32.totalorder %v5221_v38, 13  ;;  %v5227_v16 = vld [vmem:[#allocation18_spill] sm:$0xff] }
 0x11a   : > { %v4686_v50 = vpop.f32.mrb[0].mxu0  ;;  %v1487_v60 = vsel %vm1435_vm2, %v1482_v18, %v1486_v42  ;;  %v2951_v35 = vsel %vm1620_vm15, 1.0, %v5143_v2  ;;  %v1502_v57 = vrot.slane %v5222_v26, 1  ;;  %v1506_v37 = vrot.slane %v5223_v0, 1 }
 0x11b   : > { %v2020_v55 = vpop.f32.mrb[1].mxu0  ;;  %v1712_v29 = vmul.f32 %v2947_v9, %v1487_v60  ;;  %vm1623_vm3 = vcmp.ne.s32.totalorder %v5227_v16, 13  ;;  %v1756_v62 = vpack.c.bf16 %v3551_v3, %v4509_v41  ;;  %vm1630_vm4 = vcmp.ne.s32.totalorder %v4528_v4, 13  ;;  %v5229_v60 = vld [vmem:[#allocation26_spill] sm:$0xff]  ;;  %v5233_v4 = vld [vmem:[#allocation29_spill] sm:$0xff] }
 0x11c   : > { %2312 = vmatmul.mubr.bf16.gmra.mrb[40].mxu1 %v1750_v39  ;;  %v4688_v7 = vpop.f32.mrb[2].mxu0  ;;  %v1504_v39 = vrot.slane %v5218_v43, 1  ;;  %v1503_v56 = vsel %vm1435_vm2, %v1498_v17, %v1502_v57  ;;  %v1507_v47 = vsel %vm1435_vm2, %v1502_v57, %v1506_v37  ;;  %v1759_v55 = vpack.c.bf16 %v5213_v52, %v5212_v51 }
 0x11d   : > { %2648 = vmatmul.mubr.bf16.gmra.mrb[44].mxu0 %v2408_v10  ;;  %3037 = vmatprep.mubr.msk.bf16.mxu1 %vm1941_vm9, %v1753_v61  ;;  %v2023_v15 = vpop.f32.mrb[3].mxu0  ;;  %v2952_v61 = vsel %vm1621_vm1, 1.0, %v5143_v2  ;;  %vm1631_vm5 = vcmp.ne.s32.totalorder %v4534_v63, 13  ;;  %v1720_v3 = vmul.f32 %v2951_v35, %v1503_v56  ;;  %v1770_v51 = vpack.c.bf16 %v4543_v31, %v4540_v1 }
 0x11e   : > { %3094 = vmatprep.mubr.msk.bf16.mxu0 %vm1941_vm9, %v2411_v8  ;;  %v1491_v8 = vsel %vm1435_vm2, %v1486_v42, %v1490_v20  ;;  %v1505_v49 = vsel %vm1435_vm2, %v1500_v24, %v1504_v39  ;;  %v1509_v25 = vsel %vm1435_vm2, %v1504_v39, %v1508_v48  ;;  %v1516_v24 = vrot.slane %v5225_v13, 1 }
 0x11f   : > { %v1714_v21 = vmul.f32 %v2948_v34, %v1491_v8  ;;  %v1721_v44 = vmul.f32 %v2951_v35, %v1505_v49  ;;  %v1723_v9 = vmul.f32 %v2952_v61, %v1509_v25  ;;  %v5226_v34 = vld [vmem:[#allocation17_spill] sm:$0xff]  ;;  %v2954_v42 = vsel %vm1623_vm3, 1.0, %v5143_v2  ;;  %v5232_v25 = vld [vmem:[#allocation28_spill] sm:$0xff] }
 0x120   : > { %vm1622_vm0 = vcmp.ne.s32.totalorder %v5226_v34, 13  ;;  %v1722_v41 = vmul.f32 %v2952_v61, %v1507_v47  ;;  %v1514_v8 = vrot.slane %v5229_v60, 1  ;;  %v1538_v39 = vrot.slane %v4540_v1, 1 }
 0x121   : > { %v4702_v59 = vpop.f32.mrb[0].mxu1  ;;  %v2412_v18 = vpack.c.bf16 %v1714_v21, %v1712_v29  ;;  %v5230_v29 = vld [vmem:[#allocation23_spill] sm:$0xff]  ;;  %v1542_v27 = vrot.slane %v4543_v31, 1  ;;  %vm1624_vm6 = vcmp.ne.s32.totalorder %v5232_v25, 13  ;;  %vm1625_vm7 = vcmp.ne.s32.totalorder %v5233_v4, 13 }
 0x122   : > { %v2076_v20 = vpop.f32.mrb[1].mxu1  ;;  %v1520_v21 = vrot.slane %v5230_v29, 1  ;;  %v2416_v57 = vpack.c.bf16 %v1722_v41, %v1720_v3 }
 0x123   : > { %v4706_v33 = vpop.f32.mrb[2].mxu1  ;;  %v5231_v20 = vld [vmem:[#allocation31_spill] sm:$0xff]  ;;  %v1543_v63 = vsel %vm1435_vm2, %v1538_v39, %v1542_v27  ;;  %v1602_v35 = vsel %vm1435_vm2, %v1542_v27, 0.0 }
 0x124   : > { %2320 = vmatmul.mubr.bf16.gmra.mrb[44].mxu1 %v1752_v30  ;;  %v2079_v10 = vpop.f32.mrb[3].mxu1  ;;  %v2417_v30 = vpack.c.bf16 %v1723_v9, %v1721_v44  ;;  %v1521_v34 = vsel %vm1435_vm2, %v1516_v24, %v1520_v21 }
 0x125   : > { %2656 = vmatmul.mubr.bf16.gmra.mrb[48].mxu0 %v2410_v28  ;;  %3038 = vmatprep.mubr.msk.bf16.mxu1 %vm1941_vm9, %v1755_v22  ;;  %v1757_v28 = vpack.c.bf16 %v3553_v6, %v4455_v53  ;;  %v5224_v6 = vld [vmem:[#allocation16_spill] sm:$0xff]  ;;  %v1761_v10 = vpack.c.bf16 %v5218_v43, %v5214_v54  ;;  %v2956_v54 = vsel %vm1625_vm7, 1.0, %v5143_v2 }
 0x126   : > { %3095 = vmatprep.mubr.msk.bf16.mxu0 %vm1941_vm9, %v2413_v19  ;;  %v1512_v53 = vrot.slane %v5224_v6, 1  ;;  %v5228_v22 = vld [vmem:[#allocation20_spill] sm:$0xff]  ;;  %v1763_v4 = vpack.c.bf16 %v5224_v6, %v5219_v14 }
 0x127   : > { %v1510_v19 = vrot.slane %v5228_v22, 1 }
 0x128   : > { %v1517_v40 = vsel %vm1435_vm2, %v1512_v53, %v1516_v24 }
 0x129   : > { %v1727_v15 = vmul.f32 %v2954_v42, %v1517_v40  ;;  %v1511_v44 = vsel %vm1435_vm2, %v1506_v37, %v1510_v19  ;;  %v1515_v9 = vsel %vm1435_vm2, %v1510_v19, %v1514_v8  ;;  %v5234_v40 = vld [vmem:[#allocation27_spill] sm:$0xff]  ;;  %v5237_v19 = vld [vmem:[#allocation41_spill] sm:$0xff] }
 0x12a   : > { %v1726_v47 = vmul.f32 %v2954_v42, %v1515_v9  ;;  %v5239_v42 = vld [vmem:[#allocation37_spill] sm:$0xff] }
 0x12b   : > { %vm1627_vm10 = vcmp.ne.s32.totalorder %v5239_v42, 13 }
 0x12c   : > { %2328 = vmatmul.mubr.bf16.gmra.mrb[48].mxu1 %v1754_v5  ;;  %v1513_v5 = vsel %vm1435_vm2, %v1508_v48, %v1512_v53  ;;  %v4742_v52 = vpop.f32.mrb[4].mxu0  ;;  %v4755_v48 = vsel %vm1631_vm5, 1.0, %v5143_v2 }
 0x12d   : > { %2664 = vmatmul.mubr.bf16.gmra.mrb[52].mxu0 %v2412_v18  ;;  %3039 = vmatprep.mubr.msk.bf16.mxu1 %vm1941_vm9, %v1757_v28  ;;  %v2028_v38 = vpop.f32.mrb[5].mxu0  ;;  %v1758_v18 = vpack.c.bf16 %v5216_v45, %v5215_v23  ;;  %v1524_v28 = vrot.slane %v5231_v20, 1  ;;  %v4775_v45 = vmul.f32 %v4755_v48, %v1602_v35 }
 0x12e   : > { %3096 = vmatprep.mubr.msk.bf16.mxu0 %vm1941_vm9, %v2415_v32  ;;  %v2953_v32 = vsel %vm1622_vm0, 1.0, %v5143_v2  ;;  %v4761_v49 = vpop.f32.mrb[6].mxu0 }
 0x12f   : > { %v1725_v17 = vmul.f32 %v2953_v32, %v1513_v5  ;;  %v2031_v61 = vpop.f32.mrb[7].mxu0  ;;  %v1525_v16 = vsel %vm1435_vm2, %v1520_v21, %v1524_v28  ;;  %v1724_v56 = vmul.f32 %v2953_v32, %v1511_v44  ;;  %v1532_v21 = vrot.slane %v5237_v19, 1  ;;  %v5238_v32 = vld [vmem:[#allocation36_spill] sm:$0xff] }
 0x130   : > { %v1731_v24 = vmul.f32 %v2956_v54, %v1525_v16  ;;  %vm1626_vm8 = vcmp.ne.s32.totalorder %v5238_v32, 13  ;;  %v2958_v44 = vsel %vm1627_vm10, 1.0, %v5143_v2  ;;  %v1536_v16 = vrot.slane %v4358_v58, 1 }
 0x131   : > { %v2419_v53 = vpack.c.bf16 %v1727_v15, %v1725_v17  ;;  %v5236_v17 = vld [vmem:[#allocation32_spill] sm:$0xff]  ;;  %v2418_v25 = vpack.c.bf16 %v1726_v47, %v1724_v56 }
 0x132   : > { %v1528_v15 = vrot.slane %v5236_v17, 1  ;;  %v5242_v56 = vld [vmem:[#allocation48_spill] sm:$0xff]  ;;  %v1537_v42 = vsel %vm1435_vm2, %v1532_v21, %v1536_v16 }
 0x133   : > { %v1540_v47 = vrot.slane %v5242_v56, 1 }
 0x134   : > { %2336 = vmatmul.mubr.bf16.gmra.mrb[52].mxu1 %v1756_v62  ;;  %v2955_v62 = vsel %vm1624_vm6, 1.0, %v5143_v2 }
 0x135   : > { %2672 = vmatmul.mubr.bf16.gmra.mrb[56].mxu0 %v2414_v11  ;;  %3040 = vmatprep.mubr.msk.bf16.mxu1 %vm1941_vm9, %v1759_v55  ;;  %v4750_v11 = vsel %vm1630_vm4, 1.0, %v5143_v2  ;;  %v1729_v37 = vmul.f32 %v2955_v62, %v1521_v34  ;;  %v1518_v55 = vrot.slane %v5234_v40, 1  ;;  %v5241_v34 = vld [vmem:[#allocation45_spill] sm:$0xff] }
 0x136   : > { %3097 = vmatprep.mubr.msk.bf16.mxu0 %vm1941_vm9, %v2417_v30  ;;  %v4772_v23 = vmul.f32 %v4750_v11, %v1543_v63  ;;  %v5235_v30 = vld [vmem:[#allocation38_spill] sm:$0xff] }
 0x137   : > { %v4785_v5 = vpop.f32.mrb[4].mxu1  ;;  %v1522_v3 = vrot.slane %v5235_v30, 1  ;;  %v2421_v63 = vpack.c.bf16 %v1731_v24, %v1729_v37  ;;  %v1519_v35 = vsel %vm1435_vm2, %v1514_v8, %v1518_v55  ;;  %v5240_v8 = vld [vmem:[#allocation39_spill] sm:$0xff]  ;;  %v5243_v37 = vld [vmem:[#allocation46_spill] sm:$0xff] }
 0x138   : > { %v2426_v43 = vpack.c.bf16 %v4775_v45, %v4772_v23  ;;  %v2084_v41 = vpop.f32.mrb[5].mxu1  ;;  %v1526_v9 = vrot.slane %v5240_v8, 1  ;;  %vm1628_vm11 = vcmp.ne.s32.totalorder %v5243_v37, 13  ;;  %v5244_v24 = vld [vmem:[#allocation47_spill] sm:$0xff] }
 0x139   : > { %v4793_v27 = vpop.f32.mrb[6].mxu1  ;;  %v1523_v61 = vsel %vm1435_vm2, %v1518_v55, %v1522_v3  ;;  %vm1629_vm12 = vcmp.ne.s32.totalorder %v5244_v24, 13  ;;  %v1765_v55 = vpack.c.bf16 %v5230_v29, %v5225_v13 }
 0x13a   : > { %v2087_v38 = vpop.f32.mrb[7].mxu1 }
 0x13b   : > { %v1541_v38 = vsel %vm1435_vm2, %v1536_v16, %v1540_v47 }
 0x13c   : > { %2344 = vmatmul.mubr.bf16.gmra.mrb[56].mxu1 %v1758_v18  ;;  %v1760_v18 = vpack.c.bf16 %v5222_v26, %v5217_v36  ;;  %v1728_v36 = vmul.f32 %v2955_v62, %v1519_v35  ;;  %v1730_v26 = vmul.f32 %v2956_v54, %v1523_v61  ;;  %v1762_v62 = vpack.c.bf16 %v5228_v22, %v5223_v0 }
 0x13d   : > { %2680 = vmatmul.mubr.bf16.gmra.mrb[60].mxu0 %v2416_v57  ;;  %3041 = vmatprep.mubr.msk.bf16.mxu1 %vm1941_vm9, %v1761_v10  ;;  %v1529_v10 = vsel %vm1435_vm2, %v1524_v28, %v1528_v15  ;;  %v1533_v57 = vsel %vm1435_vm2, %v1528_v15, %v1532_v21  ;;  %v1530_v28 = vrot.slane %v5241_v34, 1  ;;  %v1527_v15 = vsel %vm1435_vm2, %v1522_v3, %v1526_v9 }
 0x13e   : > { %3098 = vmatprep.mubr.msk.bf16.mxu0 %vm1941_vm9, %v2419_v53  ;;  %v2957_v53 = vsel %vm1626_vm8, 1.0, %v5143_v2  ;;  %v1735_v6 = vmul.f32 %v2958_v44, %v1533_v57  ;;  %v2420_v54 = vpack.c.bf16 %v1730_v26, %v1728_v36  ;;  %v1534_v3 = vrot.slane %v4423_v46, 1 }
 0x13f   : > { %v1733_v14 = vmul.f32 %v2957_v53, %v1529_v10  ;;  %v1531_v32 = vsel %vm1435_vm2, %v1526_v9, %v1530_v28  ;;  %v1732_v0 = vmul.f32 %v2957_v53, %v1527_v15  ;;  %v1544_v21 = vrot.slane %v4490_v12, 1 }
 0x140   : > { %v1734_v22 = vmul.f32 %v2958_v44, %v1531_v32  ;;  %v1535_v61 = vsel %vm1435_vm2, %v1530_v28, %v1534_v3  ;;  %v1539_v10 = vsel %vm1435_vm2, %v1534_v3, %v1538_v39  ;;  %v1769_v9 = vpack.c.bf16 %v4358_v58, %v5237_v19 }
 0x141   : > { %v2423_v41 = vpack.c.bf16 %v1735_v6, %v1733_v14  ;;  %v1545_v57 = vsel %vm1435_vm2, %v1540_v47, %v1544_v21  ;;  %v1603_v53 = vsel %vm1435_vm2, %v1544_v21, 0.0  ;;  %v1766_v14 = vpack.c.bf16 %v5240_v8, %v5235_v30 }
 0x142   : > { %v1771_v30 = vpack.c.bf16 %v4490_v12, %v5242_v56  ;;  %vm2814_vm2 = vcmask 457728  }
 0x144   : > { %2352 = vmatmul.mubr.bf16.gmra.mrb[60].mxu1 %v1760_v18  ;;  %v2959_v18 = vsel %vm1628_vm11, 1.0, %v5143_v2 }
 0x145   : > { %2688 = vmatmul.mubr.bf16.gmra.mrb[64].mxu0 %v2418_v25  ;;  %3042 = vmatprep.mubr.msk.bf16.mxu1 %vm1941_vm9, %v1763_v4  ;;  %v2960_v25 = vsel %vm1629_vm12, 1.0, %v5143_v2  ;;  %v1737_v13 = vmul.f32 %v2959_v18, %v1537_v42  ;;  %v1764_v4 = vpack.c.bf16 %v5234_v40, %v5229_v60  ;;  %v1767_v2 = vpack.c.bf16 %v5236_v17, %v5231_v20 }
 0x146   : > { %3099 = vmatprep.mubr.msk.bf16.mxu0 %vm1941_vm9, %v2421_v63  ;;  %v1739_v29 = vmul.f32 %v2960_v25, %v1541_v38  ;;  %v2422_v63 = vpack.c.bf16 %v1734_v22, %v1732_v0  ;;  %v1736_v60 = vmul.f32 %v2959_v18, %v1535_v61  ;;  %v1738_v40 = vmul.f32 %v2960_v25, %v1539_v10 }
 0x147   : > { %v1741_v20 = vmul.f32 %v4750_v11, %v1545_v57  ;;  %v1743_v17 = vmul.f32 %v4755_v48, %v1603_v53  ;;  %v1768_v48 = vpack.c.bf16 %v4423_v46, %v5241_v34 }
 0x148   : > { %v2425_v35 = vpack.c.bf16 %v1739_v29, %v1737_v13  ;;  %v2424_v6 = vpack.c.bf16 %v1738_v40, %v1736_v60 }
 0x149   : > { %v2427_v28 = vpack.c.bf16 %v1743_v17, %v1741_v20  ;;  %v4901_v20 = vstv %s2756_s8 }
 0x14c   : > { %2360 = vmatmul.mubr.bf16.gmra.mrb[64].mxu1 %v1762_v62 }
 0x14d   : > { %2696 = vmatmul.mubr.bf16.gmra.mrb[68].mxu0 %v2420_v54  ;;  %3043 = vmatprep.mubr.msk.bf16.mxu1 %vm1941_vm9, %v1765_v55 }
 0x14e   : > { %3100 = vmatprep.mubr.msk.bf16.mxu0 %vm1941_vm9, %v2423_v41  ;;  %v4839_v44 = vpop.f32.mrb[8].mxu0 }
 0x14f   : > { %v2036_v36 = vpop.f32.mrb[9].mxu0 }
 0x150   : > { %v4845_v39 = vpop.f32.mrb[10].mxu0 }
 0x151   : > { %v2039_v26 = vpop.f32.mrb[11].mxu0 }
 0x154   : > { %2368 = vmatmul.mubr.bf16.gmra.mrb[68].mxu1 %v1764_v4 }
 0x155   : > { %2704 = vmatmul.mubr.bf16.gmra.mrb[72].mxu0 %v2422_v63  ;;  %3044 = vmatprep.mubr.msk.bf16.mxu1 %vm1941_vm9, %v1767_v2 }
 0x156   : > { %3101 = vmatprep.mubr.msk.bf16.mxu0 %vm1941_vm9, %v2425_v35  ;;  %v4851_v16 = vpop.f32.mrb[8].mxu1 }
 0x157   : > { %v2092_v47 = vpop.f32.mrb[9].mxu1 }
 0x158   : > { %v4853_v37 = vpop.f32.mrb[10].mxu1 }
 0x159   : > { %v2095_v11 = vpop.f32.mrb[11].mxu1 }
 0x15c   : > { %2376 = vmatmul.mubr.bf16.gmra.mrb[72].mxu1 %v1766_v14 }
 0x15d   : > { %2712 = vmatmul.mubr.bf16.gmra.mrb[76].mxu0 %v2424_v6  ;;  %3045 = vmatprep.mubr.msk.bf16.mxu1 %vm1941_vm9, %v1769_v9 }
 0x15e   : > { %3102 = vmatprep.mubr.msk.bf16.mxu0 %vm1941_vm9, %v2427_v28 }
 0x164   : > { %2384 = vmatmul.mubr.bf16.gmra.mrb[76].mxu1 %v1768_v48 }
 0x165   : > { %2720 = vmatmul.mubr.bf16.gmra.mrb[80].mxu0 %v2426_v43  ;;  %3046 = vmatprep.mubr.msk.bf16.mxu1 %vm1941_vm9, %v1771_v30 }
 0x16c   : > { %2392 = vmatmul.mubr.bf16.gmra.mrb[80].mxu1 %v1770_v51  ;;  %v4868_v58 = vpop.f32.mrb[12].mxu0 }
 0x16d   : > { %v2044_v19 = vpop.f32.mrb[13].mxu0 }
 0x16e   : > { %v4870_v8 = vpop.f32.mrb[14].mxu0 }
 0x16f   : > { %v2047_v46 = vpop.f32.mrb[15].mxu0 }
 0x172   : > { %v4872_v34 = vpop.f32.mrb[12].mxu1 }
 0x173   : > { %v2100_v12 = vpop.f32.mrb[13].mxu1 }
 0x174   : > { %v4874_v56 = vpop.f32.mrb[14].mxu1 }
 0x175   : > { %v2103_v24 = vpop.f32.mrb[15].mxu1 }
 0x18c   : > { %v4876_v23 = vpop.f32.mrb[16].mxu0 }
 0x18d   : > { %v2052_v45 = vpop.f32.mrb[17].mxu0 }
 0x18e   : > { %v4878_v43 = vpop.f32.mrb[18].mxu0 }
 0x18f   : > { %v2055_v62 = vpop.f32.mrb[19].mxu0 }
 0x194   : > { %v4880_v1 = vpop.f32.mrb[16].mxu1 }
 0x195   : > { %v2108_v31 = vpop.f32.mrb[17].mxu1 }
 0x196   : > { %v4882_v51 = vpop.f32.mrb[18].mxu1 }
 0x197   : > { %v2111_v54 = vpop.f32.mrb[19].mxu1 }
 0x1ab   : > { %v4884_v55 = vpop.f32.mrb[20].mxu0 }
 0x1ac   : > { %v2060_v41 = vpop.f32.mrb[21].mxu0 }
 0x1ad   : > { %v4886_v15 = vpop.f32.mrb[22].mxu0 }
 0x1ae   : > { %v2063_v32 = vpop.f32.mrb[23].mxu0 }
 0x1b1   : > { %v4888_v42 = vpop.f32.mrb[20].mxu1 }
 0x1b2   : > { %v2116_v38 = vpop.f32.mrb[21].mxu1 }
 0x1b3   : > { %v4890_v18 = vpop.f32.mrb[22].mxu1 }
 0x1b4   : > { %v2119_v25 = vpop.f32.mrb[23].mxu1 }
 0x1c7   : > { %v4892_v0 = vpop.f32.mrb[24].mxu0 }
 0x1c8   : > { %v2068_v22 = vpop.f32.mrb[25].mxu0 }
 0x1c9   : > { %v4894_v13 = vpop.f32.mrb[26].mxu0 }
 0x1ca   : > { %v2071_v29 = vpop.f32.mrb[27].mxu0 }
 0x1cf   : > { %v4896_v3 = vpop.f32.mrb[24].mxu1 }
 0x1d0   : > { %v2617_v21 = vpop.f32.mrb[28].mxu0  ;;  %v2124_v4 = vpop.f32.mrb[25].mxu1 }
 0x1d1   : > { %v2619_v63 = vpop.f32.mrb[29].mxu0  ;;  %v4898_v2 = vpop.f32.mrb[26].mxu1 }
 0x1d2   : > { %v2620_v35 = vpop.f32.mrb[30].mxu0  ;;  %v2127_v61 = vpop.f32.mrb[27].mxu1 }
 0x1d3   : > { %v2622_v10 = vpop.f32.mrb[31].mxu0 }
 0x1d7   : > { %v2289_v57 = vpop.f32.mrb[28].mxu1 }
 0x1d8   : > { %v2625_v53 = vpop.f32.mrb[32].mxu0  ;;  %v2290_v60 = vadd.f32 %v2289_v57, %v4686_v50  ;;  %v2291_v40 = vpop.f32.mrb[29].mxu1 }
 0x1d9   : > { %v2627_v36 = vpop.f32.mrb[33].mxu0  ;;  %v2292_v17 = vpop.f32.mrb[30].mxu1 }
 0x1da   : > { %v2628_v26 = vpop.f32.mrb[34].mxu0  ;;  %v2728_v14 = vadd.f32 %v2617_v21, %v2290_v60  ;;  %v2293_v6 = vadd.f32 %v2292_v17, %v4688_v7  ;;  %v2294_v9 = vpop.f32.mrb[31].mxu1 }
 0x1db   : > { %v2630_v28 = vpop.f32.mrb[35].mxu0 }
 0x1dc   : > { %v2758_v47 = vadd.f32 %v4901_v20, %v2728_v14  ;;  %v2729_v11 = vadd.f32 %v2620_v35, %v2293_v6 }
 0x1de   : > { %3242 = vtanh.f32 %v2758_v47  ;;  %v2759_v48 = vadd.f32 %v4901_v20, %v2729_v11 }
 0x1df   : > { %v2297_v30 = vpop.f32.mrb[32].mxu1 }
 0x1e0   : > { %v2633_v50 = vpop.f32.mrb[36].mxu0  ;;  %3244 = vtanh.f32 %v2759_v48  ;;  %v2298_v19 = vadd.f32 %v2297_v30, %v4742_v52  ;;  %v2299_v46 = vpop.f32.mrb[33].mxu1 }
 0x1e1   : > { %v2635_v12 = vpop.f32.mrb[37].mxu0  ;;  %v2300_v24 = vpop.f32.mrb[34].mxu1 }
 0x1e2   : > { %v2636_v45 = vpop.f32.mrb[38].mxu0  ;;  %v2730_v62 = vadd.f32 %v2625_v53, %v2298_v19  ;;  %v2301_v7 = vadd.f32 %v2300_v24, %v4761_v49  ;;  %v2302_v31 = vpop.f32.mrb[35].mxu1 }
 0x1e3   : > { %v2638_v54 = vpop.f32.mrb[39].mxu0 }
 0x1e4   : > { %v2760_v41 = vadd.f32 %v4901_v20, %v2730_v62  ;;  %v2731_v32 = vadd.f32 %v2628_v26, %v2301_v7 }
 0x1e6   : > { %3246 = vtanh.f32 %v2760_v41  ;;  %v2761_v52 = vadd.f32 %v4901_v20, %v2731_v32 }
 0x1e7   : > { %v2305_v38 = vpop.f32.mrb[36].mxu1 }
 0x1e8   : > { %v2641_v25 = vpop.f32.mrb[40].mxu0  ;;  %v3243_v49 = vpop.eup %3242  ;;  %3248 = vtanh.f32 %v2761_v52  ;;  %v2306_v22 = vadd.f32 %v2305_v38, %v4839_v44 }
 0x1e9   : > { %v2307_v29 = vpop.f32.mrb[37].mxu1  ;;  %v2643_v21 = vpop.f32.mrb[41].mxu0  ;;  %2815 = vst.msk [vmem:[%s4914_s26] sm:$0xff] %vm2814_vm2, %v3243_v49 }
 0x1ea   : > { %v2308_v4 = vpop.f32.mrb[38].mxu1  ;;  %v2644_v63 = vpop.f32.mrb[42].mxu0  ;;  %v2732_v61 = vadd.f32 %v2633_v50, %v2306_v22 }
 0x1eb   : > { %v3245_v35 = vpop.eup %3244  ;;  %v2309_v10 = vadd.f32 %v2308_v4, %v4845_v39  ;;  %v2310_v57 = vpop.f32.mrb[39].mxu1 }
 0x1ec   : > { %v2646_v53 = vpop.f32.mrb[43].mxu0  ;;  %2816 = vst.msk [vmem:[%s4914_s26 + $0x8] sm:$0xff] %vm2814_vm2, %v3245_v35  ;;  %v2762_v60 = vadd.f32 %v4901_v20, %v2732_v61 }
 0x1ed   : > { %v2733_v40 = vadd.f32 %v2636_v45, %v2309_v10 }
 0x1ee   : > { %3250 = vtanh.f32 %v2762_v60 }
 0x1ef   : > { %v2763_v44 = vadd.f32 %v4901_v20, %v2733_v40  ;;  %v2313_v36 = vpop.f32.mrb[40].mxu1 }
 0x1f0   : > { %v2649_v17 = vpop.f32.mrb[44].mxu0  ;;  %v3247_v26 = vpop.eup %3246  ;;  %v2314_v14 = vadd.f32 %v2313_v36, %v4868_v58 }
 0x1f1   : > { %3252 = vtanh.f32 %v2763_v44  ;;  %v2315_v6 = vpop.f32.mrb[41].mxu1  ;;  %v2651_v9 = vpop.f32.mrb[45].mxu0  ;;  %2817 = vst.msk [vmem:[%s4914_s26 + $0x10] sm:$0xff] %vm2814_vm2, %v3247_v26 }
 0x1f2   : > { %v2316_v39 = vpop.f32.mrb[42].mxu1  ;;  %v2652_v28 = vpop.f32.mrb[46].mxu0  ;;  %v2734_v11 = vadd.f32 %v2641_v25, %v2314_v14 }
 0x1f3   : > { %v3249_v47 = vpop.eup %3248  ;;  %v2317_v48 = vadd.f32 %v2316_v39, %v4870_v8  ;;  %v2318_v30 = vpop.f32.mrb[43].mxu1 }
 0x1f4   : > { %v2654_v50 = vpop.f32.mrb[47].mxu0  ;;  %2818 = vst.msk [vmem:[%s4914_s26 + $0x18] sm:$0xff] %vm2814_vm2, %v3249_v47  ;;  %v2764_v19 = vadd.f32 %v4901_v20, %v2734_v11 }
 0x1f5   : > { %v2735_v46 = vadd.f32 %v2644_v63, %v2317_v48 }
 0x1f6   : > { %3254 = vtanh.f32 %v2764_v19 }
 0x1f7   : > { %v2765_v58 = vadd.f32 %v4901_v20, %v2735_v46  ;;  %v2321_v12 = vpop.f32.mrb[44].mxu1 }
 0x1f8   : > { %v2657_v24 = vpop.f32.mrb[48].mxu0  ;;  %v3251_v45 = vpop.eup %3250  ;;  %v2322_v62 = vadd.f32 %v2321_v12, %v4876_v23 }
 0x1f9   : > { %3256 = vtanh.f32 %v2765_v58  ;;  %v2323_v7 = vpop.f32.mrb[45].mxu1  ;;  %v2659_v31 = vpop.f32.mrb[49].mxu0  ;;  %2819 = vst.msk [vmem:[%s4914_s26 + $0x20] sm:$0xff] %vm2814_vm2, %v3251_v45 }
 0x1fa   : > { %v2324_v8 = vpop.f32.mrb[46].mxu1  ;;  %v2660_v54 = vpop.f32.mrb[50].mxu0  ;;  %v2736_v32 = vadd.f32 %v2649_v17, %v2322_v62 }
 0x1fb   : > { %v3253_v41 = vpop.eup %3252  ;;  %v2325_v52 = vadd.f32 %v2324_v8, %v4878_v43  ;;  %v2326_v38 = vpop.f32.mrb[47].mxu1 }
 0x1fc   : > { %v2662_v25 = vpop.f32.mrb[51].mxu0  ;;  %2820 = vst.msk [vmem:[%s4914_s26 + $0x28] sm:$0xff] %vm2814_vm2, %v3253_v41  ;;  %v2766_v49 = vadd.f32 %v4901_v20, %v2736_v32 }
 0x1fd   : > { %v2737_v22 = vadd.f32 %v2652_v28, %v2325_v52 }
 0x1fe   : > { %3258 = vtanh.f32 %v2766_v49 }
 0x1ff   : > { %v2767_v23 = vadd.f32 %v4901_v20, %v2737_v22  ;;  %v2329_v29 = vpop.f32.mrb[48].mxu1 }
 0x200   : > { %v2665_v21 = vpop.f32.mrb[52].mxu0  ;;  %v3255_v4 = vpop.eup %3254  ;;  %v2330_v63 = vadd.f32 %v2329_v29, %v4884_v55 }
 0x201   : > { %3260 = vtanh.f32 %v2767_v23  ;;  %v2331_v35 = vpop.f32.mrb[49].mxu1  ;;  %v2667_v61 = vpop.f32.mrb[53].mxu0  ;;  %2821 = vst.msk [vmem:[%s4914_s26 + $0x30] sm:$0xff] %vm2814_vm2, %v3255_v4 }
 0x202   : > { %v2332_v43 = vpop.f32.mrb[50].mxu1  ;;  %v2668_v10 = vpop.f32.mrb[54].mxu0  ;;  %v2738_v53 = vadd.f32 %v2657_v24, %v2330_v63 }
 0x203   : > { %v3257_v57 = vpop.eup %3256  ;;  %v2333_v60 = vadd.f32 %v2332_v43, %v4886_v15  ;;  %v2334_v40 = vpop.f32.mrb[51].mxu1 }
 0x204   : > { %v2670_v44 = vpop.f32.mrb[55].mxu0  ;;  %2822 = vst.msk [vmem:[%s4914_s26 + $0x38] sm:$0xff] %vm2814_vm2, %v3257_v57  ;;  %v2768_v36 = vadd.f32 %v4901_v20, %v2738_v53 }
 0x205   : > { %v2739_v17 = vadd.f32 %v2660_v54, %v2333_v60 }
 0x206   : > { %3262 = vtanh.f32 %v2768_v36 }
 0x207   : > { %v2769_v55 = vadd.f32 %v4901_v20, %v2739_v17  ;;  %v2337_v26 = vpop.f32.mrb[52].mxu1 }
 0x208   : > { %v2673_v14 = vpop.f32.mrb[56].mxu0  ;;  %v3259_v6 = vpop.eup %3258  ;;  %v2338_v9 = vadd.f32 %v2337_v26, %v4892_v0 }
 0x209   : > { %3264 = vtanh.f32 %v2769_v55  ;;  %v2339_v39 = vpop.f32.mrb[53].mxu1  ;;  %v2675_v28 = vpop.f32.mrb[57].mxu0  ;;  %2823 = vst.msk [vmem:[%s4914_s26 + $0x40] sm:$0xff] %vm2814_vm2, %v3259_v6 }
 0x20a   : > { %v2340_v15 = vpop.f32.mrb[54].mxu1  ;;  %v2676_v47 = vpop.f32.mrb[58].mxu0  ;;  %v2740_v48 = vadd.f32 %v2665_v21, %v2338_v9 }
 0x20b   : > { %v3261_v11 = vpop.eup %3260  ;;  %v2341_v30 = vadd.f32 %v2340_v15, %v4894_v13  ;;  %v2342_v50 = vpop.f32.mrb[55].mxu1 }
 0x20c   : > { %v2678_v19 = vpop.f32.mrb[59].mxu0  ;;  %2824 = vst.msk [vmem:[%s4914_s26 + $0x48] sm:$0xff] %vm2814_vm2, %v3261_v11  ;;  %v2770_v46 = vadd.f32 %v4901_v20, %v2740_v48 }
 0x20d   : > { %v2741_v58 = vadd.f32 %v2668_v10, %v2341_v30 }
 0x20e   : > { %3266 = vtanh.f32 %v2770_v46 }
 0x20f   : > { %v2771_v0 = vadd.f32 %v4901_v20, %v2741_v58  ;;  %v2345_v12 = vpop.f32.mrb[56].mxu1 }
 0x210   : > { %v2681_v24 = vpop.f32.mrb[60].mxu0  ;;  %v3263_v45 = vpop.eup %3262  ;;  %v2346_v62 = vadd.f32 %v2345_v12, %v4702_v59 }
 0x211   : > { %3268 = vtanh.f32 %v2771_v0  ;;  %v2347_v7 = vpop.f32.mrb[57].mxu1  ;;  %v2683_v31 = vpop.f32.mrb[61].mxu0  ;;  %2825 = vst.msk [vmem:[%s4914_s26 + $0x50] sm:$0xff] %vm2814_vm2, %v3263_v45 }
 0x212   : > { %v2348_v13 = vpop.f32.mrb[58].mxu1  ;;  %v2684_v8 = vpop.f32.mrb[62].mxu0  ;;  %v2742_v41 = vadd.f32 %v2673_v14, %v2346_v62 }
 0x213   : > { %v3265_v54 = vpop.eup %3264  ;;  %v2349_v32 = vadd.f32 %v2348_v13, %v4706_v33  ;;  %v2350_v52 = vpop.f32.mrb[59].mxu1 }
 0x214   : > { %v2686_v38 = vpop.f32.mrb[63].mxu0  ;;  %2826 = vst.msk [vmem:[%s4914_s26 + $0x58] sm:$0xff] %vm2814_vm2, %v3265_v54  ;;  %v2772_v25 = vadd.f32 %v4901_v20, %v2742_v41 }
 0x215   : > { %v2743_v49 = vadd.f32 %v2676_v47, %v2349_v32 }
 0x216   : > { %3270 = vtanh.f32 %v2772_v25 }
 0x217   : > { %v2773_v59 = vadd.f32 %v4901_v20, %v2743_v49  ;;  %v2353_v22 = vpop.f32.mrb[60].mxu1 }
 0x218   : > { %v2689_v23 = vpop.f32.mrb[64].mxu0  ;;  %v3267_v29 = vpop.eup %3266  ;;  %v2354_v21 = vadd.f32 %v2353_v22, %v4785_v5 }
 0x219   : > { %3272 = vtanh.f32 %v2773_v59  ;;  %v2355_v4 = vpop.f32.mrb[61].mxu1  ;;  %v2691_v63 = vpop.f32.mrb[65].mxu0  ;;  %2827 = vst.msk [vmem:[%s4914_s26 + $0x60] sm:$0xff] %vm2814_vm2, %v3267_v29 }
 0x21a   : > { %v2356_v33 = vpop.f32.mrb[62].mxu1  ;;  %v2692_v35 = vpop.f32.mrb[66].mxu0  ;;  %v2744_v43 = vadd.f32 %v2681_v24, %v2354_v21 }
 0x21b   : > { %v3269_v61 = vpop.eup %3268  ;;  %v2357_v10 = vadd.f32 %v2356_v33, %v4793_v27  ;;  %v2358_v57 = vpop.f32.mrb[63].mxu1 }
 0x21c   : > { %v2694_v53 = vpop.f32.mrb[67].mxu0  ;;  %2828 = vst.msk [vmem:[%s4914_s26 + $0x68] sm:$0xff] %vm2814_vm2, %v3269_v61  ;;  %v2774_v60 = vadd.f32 %v4901_v20, %v2744_v43 }
 0x21d   : > { %v2745_v40 = vadd.f32 %v2684_v8, %v2357_v10 }
 0x21e   : > { %3274 = vtanh.f32 %v2774_v60 }
 0x21f   : > { %v2775_v5 = vadd.f32 %v4901_v20, %v2745_v40  ;;  %v2361_v44 = vpop.f32.mrb[64].mxu1 }
 0x220   : > { %v2697_v36 = vpop.f32.mrb[68].mxu0  ;;  %v3271_v17 = vpop.eup %3270  ;;  %v2362_v55 = vadd.f32 %v2361_v44, %v4851_v16 }
 0x221   : > { %3276 = vtanh.f32 %v2775_v5  ;;  %v2363_v26 = vpop.f32.mrb[65].mxu1  ;;  %v2699_v14 = vpop.f32.mrb[69].mxu0  ;;  %2829 = vst.msk [vmem:[%s4914_s26 + $0x70] sm:$0xff] %vm2814_vm2, %v3271_v17 }
 0x222   : > { %v2364_v27 = vpop.f32.mrb[66].mxu1  ;;  %v2700_v6 = vpop.f32.mrb[70].mxu0  ;;  %v2746_v39 = vadd.f32 %v2689_v23, %v2362_v55 }
 0x223   : > { %v3273_v9 = vpop.eup %3272  ;;  %v2365_v28 = vadd.f32 %v2364_v27, %v4853_v37  ;;  %v2366_v15 = vpop.f32.mrb[67].mxu1 }
 0x224   : > { %v2702_v47 = vpop.f32.mrb[71].mxu0  ;;  %2830 = vst.msk [vmem:[%s4914_s26 + $0x78] sm:$0xff] %vm2814_vm2, %v3273_v9  ;;  %v2776_v11 = vadd.f32 %v4901_v20, %v2746_v39 }
 0x225   : > { %v2747_v48 = vadd.f32 %v2692_v35, %v2365_v28 }
 0x226   : > { %3278 = vtanh.f32 %v2776_v11 }
 0x227   : > { %v2777_v16 = vadd.f32 %v4901_v20, %v2747_v48  ;;  %v2369_v30 = vpop.f32.mrb[68].mxu1 }
 0x228   : > { %v2705_v50 = vpop.f32.mrb[72].mxu0  ;;  %v3275_v19 = vpop.eup %3274  ;;  %v2370_v46 = vadd.f32 %v2369_v30, %v4872_v34 }
 0x229   : > { %3280 = vtanh.f32 %v2777_v16  ;;  %v2371_v58 = vpop.f32.mrb[69].mxu1  ;;  %v2707_v0 = vpop.f32.mrb[73].mxu0  ;;  %2831 = vst.msk [vmem:[%s4914_s26 + $0x80] sm:$0xff] %vm2814_vm2, %v3275_v19 }
 0x22a   : > { %v2372_v37 = vpop.f32.mrb[70].mxu1  ;;  %v2708_v12 = vpop.f32.mrb[74].mxu0  ;;  %v2748_v45 = vadd.f32 %v2697_v36, %v2370_v46 }
 0x22b   : > { %v3277_v24 = vpop.eup %3276  ;;  %v2373_v62 = vadd.f32 %v2372_v37, %v4874_v56  ;;  %v2374_v7 = vpop.f32.mrb[71].mxu1 }
 0x22c   : > { %v2710_v31 = vpop.f32.mrb[75].mxu0  ;;  %2832 = vst.msk [vmem:[%s4914_s26 + $0x88] sm:$0xff] %vm2814_vm2, %v3277_v24  ;;  %v2778_v13 = vadd.f32 %v4901_v20, %v2748_v45 }
 0x22d   : > { %v2749_v8 = vadd.f32 %v2700_v6, %v2373_v62 }
 0x22e   : > { %3282 = vtanh.f32 %v2778_v13 }
 0x22f   : > { %v2779_v34 = vadd.f32 %v4901_v20, %v2749_v8  ;;  %v2377_v54 = vpop.f32.mrb[72].mxu1 }
 0x230   : > { %v2713_v41 = vpop.f32.mrb[76].mxu0  ;;  %v3279_v32 = vpop.eup %3278  ;;  %v2378_v52 = vadd.f32 %v2377_v54, %v4880_v1 }
 0x231   : > { %3284 = vtanh.f32 %v2779_v34  ;;  %v2379_v38 = vpop.f32.mrb[73].mxu1  ;;  %v2715_v25 = vpop.f32.mrb[77].mxu0  ;;  %2833 = vst.msk [vmem:[%s4914_s26 + $0x90] sm:$0xff] %vm2814_vm2, %v3279_v32 }
 0x232   : > { %v2380_v56 = vpop.f32.mrb[74].mxu1  ;;  %v2716_v49 = vpop.f32.mrb[78].mxu0  ;;  %v2750_v22 = vadd.f32 %v2705_v50, %v2378_v52 }
 0x233   : > { %v3281_v59 = vpop.eup %3280  ;;  %v2381_v23 = vadd.f32 %v2380_v56, %v4882_v51  ;;  %v2382_v29 = vpop.f32.mrb[75].mxu1 }
 0x234   : > { %v2718_v21 = vpop.f32.mrb[79].mxu0  ;;  %2834 = vst.msk [vmem:[%s4914_s26 + $0x98] sm:$0xff] %vm2814_vm2, %v3281_v59  ;;  %v2780_v4 = vadd.f32 %v4901_v20, %v2750_v22 }
 0x235   : > { %v2751_v63 = vadd.f32 %v2708_v12, %v2381_v23 }
 0x236   : > { %3286 = vtanh.f32 %v2780_v4 }
 0x237   : > { %v2781_v1 = vadd.f32 %v4901_v20, %v2751_v63  ;;  %v2385_v33 = vpop.f32.mrb[76].mxu1 }
 0x238   : > { %v2721_v35 = vpop.f32.mrb[80].mxu0  ;;  %v3283_v61 = vpop.eup %3282  ;;  %v2386_v43 = vadd.f32 %v2385_v33, %v4888_v42 }
 0x239   : > { %3288 = vtanh.f32 %v2781_v1  ;;  %v2387_v10 = vpop.f32.mrb[77].mxu1  ;;  %v2723_v57 = vpop.f32.mrb[81].mxu0  ;;  %2835 = vst.msk [vmem:[%s4914_s26 + $0xa0] sm:$0xff] %vm2814_vm2, %v3283_v61 }
 0x23a   : > { %v2388_v51 = vpop.f32.mrb[78].mxu1  ;;  %v2724_v53 = vpop.f32.mrb[82].mxu0  ;;  %v2752_v40 = vadd.f32 %v2713_v41, %v2386_v43 }
 0x23b   : > { %v3285_v60 = vpop.eup %3284  ;;  %v2389_v5 = vadd.f32 %v2388_v51, %v4890_v18  ;;  %v2390_v44 = vpop.f32.mrb[79].mxu1 }
 0x23c   : > { %v2726_v36 = vpop.f32.mrb[83].mxu0  ;;  %2836 = vst.msk [vmem:[%s4914_s26 + $0xa8] sm:$0xff] %vm2814_vm2, %v3285_v60  ;;  %v2782_v17 = vadd.f32 %v4901_v20, %v2752_v40 }
 0x23d   : > { %v2753_v55 = vadd.f32 %v2716_v49, %v2389_v5 }
 0x23e   : > { %3290 = vtanh.f32 %v2782_v17 }
 0x23f   : > { %v2783_v42 = vadd.f32 %v4901_v20, %v2753_v55  ;;  %v2393_v26 = vpop.f32.mrb[80].mxu1 }
 0x240   : > { %v3287_v14 = vpop.eup %3286  ;;  %v2394_v27 = vadd.f32 %v2393_v26, %v4896_v3  ;;  %v2395_v6 = vpop.f32.mrb[81].mxu1 }
 0x241   : > { %3292 = vtanh.f32 %v2783_v42  ;;  %2837 = vst.msk [vmem:[%s4914_s26 + $0xb0] sm:$0xff] %vm2814_vm2, %v3287_v14  ;;  %v2396_v18 = vpop.f32.mrb[82].mxu1 }
 0x242   : > { %v2754_v39 = vadd.f32 %v2721_v35, %v2394_v27  ;;  %v2397_v28 = vadd.f32 %v2396_v18, %v4898_v2  ;;  %v2398_v15 = vpop.f32.mrb[83].mxu1 }
 0x243   : > { %v3289_v9 = vpop.eup %3288 }
 0x244   : > { %2838 = vst.msk [vmem:[%s4914_s26 + $0xb8] sm:$0xff] %vm2814_vm2, %v3289_v9  ;;  %v2784_v47 = vadd.f32 %v4901_v20, %v2754_v39  ;;  %v2755_v11 = vadd.f32 %v2724_v53, %v2397_v28 }
 0x246   : > { %3294 = vtanh.f32 %v2784_v47  ;;  %v2785_v3 = vadd.f32 %v4901_v20, %v2755_v11 }
 0x248   : > { %v3291_v48 = vpop.eup %3290  ;;  %3296 = vtanh.f32 %v2785_v3 }
 0x249   : > { %2839 = vst.msk [vmem:[%s4914_s26 + $0xc0] sm:$0xff] %vm2814_vm2, %v3291_v48 }
 0x24b   : > { %v3293_v16 = vpop.eup %3292 }
 0x24c   : > { %2840 = vst.msk [vmem:[%s4914_s26 + $0xc8] sm:$0xff] %vm2814_vm2, %v3293_v16 }
 0x250   : > { %v3295_v30 = vpop.eup %3294 }
 0x251   : > { %2841 = vst.msk [vmem:[%s4914_s26 + $0xd0] sm:$0xff] %vm2814_vm2, %v3295_v30 }
 0x252   : > { %v3297_v2 = vpop.eup %3296 }
 0x253   : > { %2842 = vst.msk [vmem:[%s4914_s26 + $0xd8] sm:$0xff] %vm2814_vm2, %v3297_v2 }
 0x254 PF: > { %s16_s20 = sadd.s32 1, %s3304_s20  }
 0x255   : > { %p13_p4 = scmp.ge.s32.totalorder %s16_s20, 4  }
 0x257   :  { %15 = sbr.rel (!%p13_p4) target bundleno = 2 (0x2), region = 72 }

</bundles_post_ra>
